<compile_context>
chip_gen: v7x
topology: tpu7x:2x2x1
jax: 0.10.0
libtpu: 0.0.40
codegen_flags: <defaults>
</compile_context>

<pallas_src>
import jax
import jax.numpy as jnp
from jax import lax
from jax.experimental import pallas as pl
from jax.experimental.pallas import tpu as pltpu

# ---- model hyper-parameters (from the PyTorch source) ----
N_EMBD = 27
N_HEAD = 1          # head_size == n_embd
N_LAYER = 1
VOCAB = 72          # library.encoding.max_token_value ~ encoding = 72
BLOCK_SIZE = 512
LN_EPS = 1e-5

# rows of the packed bias / LN-param slab (row, width):
#   0 ln1_g(C) 1 ln1_b(C) 2 ln2_g(C) 3 ln2_b(C) 4 lnf_g(C) 5 lnf_b(C)
#   6 proj_b(C) 7 ff1_b(4C) 8 ff2_b(C)          (lm_b folded into lm_w column)
_BIAS_ROWS = 9
_BIAS_WIDTH = 128   # >= 4*N_EMBD, one lane tile wide


def _layernorm(x, g, b):
    mu = jnp.mean(x, axis=-1, keepdims=True)
    var = jnp.mean((x - mu) ** 2, axis=-1, keepdims=True)
    return (x - mu) * lax.rsqrt(var + LN_EPS) * g + b


def gpt_kernel(
    idx_ref,      # (1, 1, N) int32     -- token ids, tokens on lanes
    tok_tab_ref,  # (V, C)  bf16
    pos_ref,      # (Tp, C) f32         -- position embeddings (one copy)
    wqkv_ref,     # (C, 3C) bf16        -- fused [Wq*hs^-0.5 | Wk | Wv]  (x @ W layout)
    proj_w_ref,   # (C, C)  bf16
    ff1_w_ref,    # (C, 4C) bf16
    ff2_w_ref,    # (4C, C) bf16
    lm_w_ref,     # (V, C+1) bf16       -- transposed LM head, bias as last column
    bias_ref,     # (9, 128) f32        -- packed LN params + biases
    out_ref,      # (1, Bb, V, Tp) f32  -- lane-dense log-probs (Tp on lanes)
    qkv_sc,       # VMEM (3, N, C) bf16 -- q / k / v scratch
    attn_sc,      # VMEM (N, C)    f32  -- attention output scratch
):
    Bb = out_ref.shape[1]
    V = out_ref.shape[2]
    Tp = out_ref.shape[3]
    C = tok_tab_ref.shape[1]
    N = Bb * Tp
    bf16 = jnp.bfloat16
    f32 = jnp.float32

    # ---- packed LN params / biases (single small slab load) ----
    biases = bias_ref[...]                          # (9, 128) f32
    ln1_g = biases[0:1, :C]
    ln1_b = biases[1:2, :C]
    ln2_g = biases[2:3, :C]
    ln2_b = biases[3:4, :C]
    lnf_g = biases[4:5, :C]
    lnf_b = biases[5:6, :C]
    proj_b = biases[6:7, :C]
    ff1_b = biases[7:8, :4 * C]
    ff2_b = biases[8:9, :C]

    # ---- embeddings: one-hot built tokens-on-lanes, contracted on the vocab dim ----
    tok_row = idx_ref[0]                                            # (1, N) int32
    onehot_t = (lax.broadcasted_iota(jnp.int32, (V, N), 0) == tok_row).astype(bf16)
    tok_emb = lax.dot_general(onehot_t, tok_tab_ref[...],
                              (((0,), (0,)), ((), ())),
                              preferred_element_type=f32)           # (N, C) f32
    x = tok_emb + jnp.tile(pos_ref[...], (Bb, 1))                   # (N, C) f32

    # ---- Block: x = x + SA(LN1(x)) ----
    h = _layernorm(x, ln1_g, ln1_b)                                 # (N, C)
    qkv = jnp.dot(h.astype(bf16), wqkv_ref[...],
                  preferred_element_type=f32)                       # (N, 3C) f32
    qkv_sc[0] = qkv[:, 0:C].astype(bf16)           # q (scale pre-folded into Wq)
    qkv_sc[1] = qkv[:, C:2 * C].astype(bf16)       # k
    qkv_sc[2] = qkv[:, 2 * C:3 * C].astype(bf16)   # v

    row = lax.broadcasted_iota(jnp.int32, (Tp, Tp), 0)
    col = lax.broadcasted_iota(jnp.int32, (Tp, Tp), 1)
    causal = row >= col                                             # bool, built once

    def attn_body(b, carry):
        start = pl.multiple_of(b * Tp, 128)
        qb = qkv_sc[0, pl.ds(start, Tp), :]                         # (Tp, C) bf16
        kb = qkv_sc[1, pl.ds(start, Tp), :]
        vb = qkv_sc[2, pl.ds(start, Tp), :]
        # contract last dims of both operands: no k.T materialization
        s = lax.dot_general(qb, kb, (((1,), (1,)), ((), ())),
                            preferred_element_type=f32)             # (Tp, Tp) f32
        s = jnp.where(causal, s, -1e30)                             # causal mask (f32)
        m = jnp.max(s, axis=-1, keepdims=True)
        e = jnp.exp(s - m)
        denom = jnp.sum(e, axis=-1, keepdims=True)
        wei = e * pl.reciprocal(denom, approx=True)                 # softmax (dropout = identity)
        attn_sc[pl.ds(start, Tp), :] = jnp.dot(
            wei.astype(bf16), vb, preferred_element_type=f32)       # (Tp, C)
        return carry

    lax.fori_loop(0, Bb, attn_body, 0)                              # bounds live (Tp,Tp) buffers

    sa = jnp.dot(attn_sc[...].astype(bf16), proj_w_ref[...],
                 preferred_element_type=f32) + proj_b
    x = x + sa

    # ---- Block: x = x + FFWD(LN2(x)) ----
    h2 = _layernorm(x, ln2_g, ln2_b)
    f = jnp.dot(h2.astype(bf16), ff1_w_ref[...],
                preferred_element_type=f32) + ff1_b
    f = jnp.maximum(f, 0.0)                                         # ReLU
    f = jnp.dot(f.astype(bf16), ff2_w_ref[...],
                preferred_element_type=f32) + ff2_b
    x = x + f

    # ---- final LN + transposed LM head + log_softmax over vocab (sublane axis) ----
    xf = _layernorm(x, lnf_g, lnf_b)                                # (N, C)
    xf_aug = jnp.concatenate([xf, jnp.ones((N, 1), f32)], axis=-1).astype(bf16)  # (N, C+1)
    logits_t = lax.dot_general(lm_w_ref[...], xf_aug,
                               (((1,), (1,)), ((), ())),
                               preferred_element_type=f32)          # (V, N) f32
    m = jnp.max(logits_t, axis=0, keepdims=True)                    # (1, N)
    lse = jnp.log(jnp.sum(jnp.exp(logits_t - m), axis=0, keepdims=True)) + m
    logp_t = logits_t - lse                                         # (V, N)

    # lane-dense stores: static slices at multiples of 128 (Tp % 128 == 0)
    for b in range(Bb):
        out_ref[0, b, :, :] = logp_t[:, b * Tp:(b + 1) * Tp]


def init_params(key):
    """Deterministic parameter init mirroring _init_weights (std=0.02 normals, zero bias)."""
    ks = jax.random.split(key, 12)
    n = N_EMBD
    p = {
        "tok_tab": 0.02 * jax.random.normal(ks[0], (VOCAB, n), jnp.float32),
        "pos_tab": 0.02 * jax.random.normal(ks[1], (BLOCK_SIZE, n), jnp.float32),
        # attention (head_size == n_embd since n_head == 1); weights stored as (in, out)
        "wq": 0.02 * jax.random.normal(ks[2], (n, n), jnp.float32),
        "wk": 0.02 * jax.random.normal(ks[3], (n, n), jnp.float32),
        "wv": 0.02 * jax.random.normal(ks[4], (n, n), jnp.float32),
        "proj_w": 0.02 * jax.random.normal(ks[5], (n, n), jnp.float32),
        "proj_b": jnp.zeros((1, n), jnp.float32),
        # feed-forward
        "ff1_w": 0.02 * jax.random.normal(ks[6], (n, 4 * n), jnp.float32),
        "ff1_b": jnp.zeros((1, 4 * n), jnp.float32),
        "ff2_w": 0.02 * jax.random.normal(ks[7], (4 * n, n), jnp.float32),
        "ff2_b": jnp.zeros((1, n), jnp.float32),
        # layer norms
        "ln1_g": jnp.ones((1, n), jnp.float32), "ln1_b": jnp.zeros((1, n), jnp.float32),
        "ln2_g": jnp.ones((1, n), jnp.float32), "ln2_b": jnp.zeros((1, n), jnp.float32),
        "lnf_g": jnp.ones((1, n), jnp.float32), "lnf_b": jnp.zeros((1, n), jnp.float32),
        # lm head
        "lm_w": 0.02 * jax.random.normal(ks[8], (n, VOCAB), jnp.float32),
        "lm_b": jnp.zeros((1, VOCAB), jnp.float32),
    }
    return p


def _round_up(x, m):
    return ((x + m - 1) // m) * m


def _device_kind():
    try:
        return jax.devices()[0].device_kind.lower()
    except Exception:
        return ""


def _pick_batch_block(B, Tp, num_tc):
    """Batch elements per grid step.

    Single-TC chips (v5e/v6e): fewest grid steps that fit the VMEM token cap (ideally G==1).
    v7x (2 TCs, 64 MiB VMEM): tighter token cap, keep G >= 2 and even so both TCs get work.
    """
    max_tokens = 2048 if num_tc >= 2 else 4096
    cap = max(1, max_tokens // Tp)
    divisors = [d for d in range(min(B, cap), 0, -1) if B % d == 0]
    if num_tc == 1:
        return divisors[0]
    for d in divisors:
        g = B // d
        if g >= 2 and g % 2 == 0:
            return d
    for d in divisors:
        if B // d >= 2:
            return d
    return divisors[0]


@jax.jit
def gpt_forward(idx, params):
    """idx: (B, T) int32 token ids (T <= block_size).  Returns log-probs (B, VOCAB, T)."""
    B, T = idx.shape
    if T > BLOCK_SIZE:
        raise ValueError(f"sequence length {T} exceeds block_size {BLOCK_SIZE}")
    C = N_EMBD

    # pad T up to a multiple of 128 -> every MXU tile / store is lane-dense;
    # the causal mask makes the first T positions exactly equal to the unpadded run.
    Tp = _round_up(T, 128)

    kind = _device_kind()
    is_v7 = "v7" in kind
    num_tc = 2 if is_v7 else 1
    bb = _pick_batch_block(B, Tp, num_tc)    # batch elements per grid step
    G = B // bb                              # grid length
    N = bb * Tp

    idxp = idx.astype(jnp.int32)
    if Tp != T:
        idxp = jnp.pad(idxp, ((0, 0), (0, Tp - T)))          # pad with token 0
    idx3 = idxp.reshape(G, 1, N)                              # tokens on lanes

    pos = params["pos_tab"][:Tp]                              # (Tp, C) f32, no host tiling

    # bf16 MXU inputs (f32 accumulation in-kernel); attention scale folded into Wq.
    to_bf16 = lambda a: a.astype(jnp.bfloat16)
    scale = float(N_EMBD) ** -0.5                             # head_size == n_embd (n_head == 1)
    tok_tab = to_bf16(params["tok_tab"])
    wqkv = to_bf16(jnp.concatenate(
        [params["wq"] * scale, params["wk"], params["wv"]], axis=1))
    proj_w = to_bf16(params["proj_w"])
    ff1_w = to_bf16(params["ff1_w"])
    ff2_w = to_bf16(params["ff2_w"])
    # transposed LM head with bias folded in as an extra input column: (V, C+1)
    lm_w_aug = to_bf16(jnp.concatenate(
        [params["lm_w"].T, params["lm_b"].reshape(VOCAB, 1)], axis=1))

    # pack the 9 tiny LN-param / bias vectors into one (9, 128) f32 slab (single DMA)
    slab = jnp.zeros((_BIAS_ROWS, _BIAS_WIDTH), jnp.float32)
    for r, name in enumerate(["ln1_g", "ln1_b", "ln2_g", "ln2_b", "lnf_g", "lnf_b",
                              "proj_b", "ff1_b", "ff2_b"]):
        v = params[name].reshape(-1)
        slab = slab.at[r, : v.shape[0]].set(v)

    weight_args = [tok_tab, pos, wqkv, proj_w, ff1_w, ff2_w, lm_w_aug, slab]
    # TODO(synk): weight matrices could be packed into one bf16 slab (single DMA) like the
    # bias slab; left separate to keep MXU operand slices trivially aligned.

    def full_spec(arr):
        nd = arr.ndim
        return pl.BlockSpec(arr.shape, lambda i, _nd=nd: (0,) * _nd)

    in_specs = [pl.BlockSpec((1, 1, N), lambda i: (i, 0, 0))] + [full_spec(a) for a in weight_args]
    out_specs = pl.BlockSpec((1, bb, VOCAB, Tp), lambda i: (i, 0, 0, 0))

    vmem_limit = (48 if is_v7 else 64) * 1024 * 1024

    out = pl.pallas_call(
        gpt_kernel,
        out_shape=jax.ShapeDtypeStruct((G, bb, VOCAB, Tp), jnp.float32),
        grid=(G,),
        in_specs=in_specs,
        out_specs=out_specs,
        scratch_shapes=[
            pltpu.VMEM((3, N, N_EMBD), jnp.bfloat16),   # q, k, v
            pltpu.VMEM((N, N_EMBD), jnp.float32),       # attention output
        ],
        compiler_params=pltpu.CompilerParams(
            dimension_semantics=("parallel",),
            vmem_limit_bytes=vmem_limit),
    )(idx3, *weight_args)

    # (G, bb, V, Tp) -> (B, V, Tp) is a leading-dim merge only; drop the seq padding.
    out = out.reshape(B, VOCAB, Tp)
    if Tp != T:
        out = out[:, :, :T]
    return out


def gpt_forward_ref(idx, params):
    """Pure-JAX f32 reference for numerical check (matches PyTorch forward, eval mode)."""
    B, T = idx.shape
    x = params["tok_tab"][idx] + params["pos_tab"][:T][None]      # (B, T, C)

    def ln(z, g, b):
        mu = z.mean(-1, keepdims=True)
        var = ((z - mu) ** 2).mean(-1, keepdims=True)
        return (z - mu) / jnp.sqrt(var + LN_EPS) * g + b

    h = ln(x, params["ln1_g"], params["ln1_b"])
    q = h @ params["wq"]; k = h @ params["wk"]; v = h @ params["wv"]
    scores = jnp.einsum("btc,bsc->bts", q, k) * (k.shape[-1] ** -0.5)
    mask = jnp.tril(jnp.ones((T, T), bool))
    scores = jnp.where(mask, scores, -jnp.inf)
    wei = jax.nn.softmax(scores, axis=-1)
    x = x + (jnp.einsum("bts,bsc->btc", wei, v) @ params["proj_w"] + params["proj_b"])
    h2 = ln(x, params["ln2_g"], params["ln2_b"])
    f = jax.nn.relu(h2 @ params["ff1_w"] + params["ff1_b"]) @ params["ff2_w"] + params["ff2_b"]
    x = x + f
    logits = ln(x, params["lnf_g"], params["lnf_b"]) @ params["lm_w"] + params["lm_b"]
    return jnp.transpose(jax.nn.log_softmax(logits, axis=-1), (0, 2, 1))


if __name__ == "__main__":
    key = jax.random.PRNGKey(0)
    pkey, ikey = jax.random.split(key)
    params = init_params(pkey)

    B, T = 2, 8  # small shapes; T <= block_size (kernel pads T to 128 internally)
    idx = jax.random.randint(ikey, (B, T), 0, VOCAB, dtype=jnp.int32)

    out = gpt_forward(idx, params)
    out = jax.block_until_ready(out)
    assert out.shape == (B, VOCAB, T)

    ref = gpt_forward_ref(idx, params)
    # tolerance loosened vs pure f32: kernel feeds the MXU bf16 (f32 accumulation) and
    # uses an approx-reciprocal softmax denominator.
    assert jnp.allclose(out, ref, rtol=1e-2, atol=1e-2), "mismatch vs pure-JAX reference"

    # TODO(synk): nll_loss / generate() (multinomial sampling loop) are host-side glue, not kernel work.
    print("KERNEL_OK")
</pallas_src>

<mosaic_0001>
module attributes {stable_mosaic.version = 11 : i64} {
  func.func @gpt_kernel(%arg0: i32, %arg1: memref<1x1x256xi32, #tpu.memory_space<vmem>>, %arg2: memref<72x27xbf16, #tpu.memory_space<vmem>>, %arg3: memref<128x27xf32, #tpu.memory_space<vmem>>, %arg4: memref<27x81xbf16, #tpu.memory_space<vmem>>, %arg5: memref<27x27xbf16, #tpu.memory_space<vmem>>, %arg6: memref<27x108xbf16, #tpu.memory_space<vmem>>, %arg7: memref<108x27xbf16, #tpu.memory_space<vmem>>, %arg8: memref<72x28xbf16, #tpu.memory_space<vmem>>, %arg9: memref<9x128xf32, #tpu.memory_space<vmem>>, %arg10: memref<1x2x72x128xf32, #tpu.memory_space<vmem>>, %arg11: memref<3x256x27xbf16, #tpu.memory_space<vmem>>, %arg12: memref<256x27xf32, #tpu.memory_space<vmem>>) attributes {dimension_semantics = [#tpu.dimension_semantics<parallel>], iteration_bounds = array<i64: 1>, scalar_prefetch = 0 : i64, scratch_operands = 2 : i64, tpu.core_type = #tpu.core_type<tc>, window_params = [{transform_indices = @transform_0, window_bounds = array<i64: 1, 1, 256>}, {pipeline_mode = #tpu.pipeline_mode<synchronous>, transform_indices = @transform_1, window_bounds = array<i64: 72, 27>}, {pipeline_mode = #tpu.pipeline_mode<synchronous>, transform_indices = @transform_2, window_bounds = array<i64: 128, 27>}, {pipeline_mode = #tpu.pipeline_mode<synchronous>, transform_indices = @transform_3, window_bounds = array<i64: 27, 81>}, {pipeline_mode = #tpu.pipeline_mode<synchronous>, transform_indices = @transform_4, window_bounds = array<i64: 27, 27>}, {pipeline_mode = #tpu.pipeline_mode<synchronous>, transform_indices = @transform_5, window_bounds = array<i64: 27, 108>}, {pipeline_mode = #tpu.pipeline_mode<synchronous>, transform_indices = @transform_6, window_bounds = array<i64: 108, 27>}, {pipeline_mode = #tpu.pipeline_mode<synchronous>, transform_indices = @transform_7, window_bounds = array<i64: 72, 28>}, {pipeline_mode = #tpu.pipeline_mode<synchronous>, transform_indices = @transform_8, window_bounds = array<i64: 9, 128>}, {transform_indices = @transform_9, window_bounds = array<i64: 1, 2, 72, 128>}]} {
    %c0 = arith.constant 0 : index
    %c0_0 = arith.constant 0 : index
    %0 = vector.load %arg9[%c0, %c0_0] : memref<9x128xf32, #tpu.memory_space<vmem>>, vector<9x128xf32>
    %1 = vector.extract_strided_slice %0 {offsets = [0, 0], sizes = [1, 27], strides = [1, 1]} : vector<9x128xf32> to vector<1x27xf32>
    %2 = vector.extract_strided_slice %0 {offsets = [1, 0], sizes = [1, 27], strides = [1, 1]} : vector<9x128xf32> to vector<1x27xf32>
    %3 = vector.extract_strided_slice %0 {offsets = [2, 0], sizes = [1, 27], strides = [1, 1]} : vector<9x128xf32> to vector<1x27xf32>
    %4 = vector.extract_strided_slice %0 {offsets = [3, 0], sizes = [1, 27], strides = [1, 1]} : vector<9x128xf32> to vector<1x27xf32>
    %5 = vector.extract_strided_slice %0 {offsets = [4, 0], sizes = [1, 27], strides = [1, 1]} : vector<9x128xf32> to vector<1x27xf32>
    %6 = vector.extract_strided_slice %0 {offsets = [5, 0], sizes = [1, 27], strides = [1, 1]} : vector<9x128xf32> to vector<1x27xf32>
    %7 = vector.extract_strided_slice %0 {offsets = [6, 0], sizes = [1, 27], strides = [1, 1]} : vector<9x128xf32> to vector<1x27xf32>
    %8 = vector.extract_strided_slice %0 {offsets = [7, 0], sizes = [1, 108], strides = [1, 1]} : vector<9x128xf32> to vector<1x108xf32>
    %9 = vector.extract_strided_slice %0 {offsets = [8, 0], sizes = [1, 27], strides = [1, 1]} : vector<9x128xf32> to vector<1x27xf32>
    %c0_1 = arith.constant 0 : index
    %c0_2 = arith.constant 0 : index
    %c0_3 = arith.constant 0 : index
    %10 = vector.load %arg1[%c0_1, %c0_2, %c0_3] : memref<1x1x256xi32, #tpu.memory_space<vmem>>, vector<1x1x256xi32>
    %11 = vector.shape_cast %10 : vector<1x1x256xi32> to vector<1x256xi32>
    %12 = tpu.iota {dimensions = array<i32: 0>} : vector<72x256xi32>
    %13 = vector.broadcast %11 : vector<1x256xi32> to vector<72x256xi32>
    %14 = arith.cmpi eq, %12, %13 : vector<72x256xi32>
    %15 = arith.extui %14 : vector<72x256xi1> to vector<72x256xi32>
    %16 = arith.sitofp %15 : vector<72x256xi32> to vector<72x256xf32>
    %17 = arith.truncf %16 : vector<72x256xf32> to vector<72x256xbf16>
    %c0_4 = arith.constant 0 : index
    %c0_5 = arith.constant 0 : index
    %18 = vector.load %arg2[%c0_4, %c0_5] : memref<72x27xbf16, #tpu.memory_space<vmem>>, vector<72x27xbf16>
    %cst = arith.constant dense<0.000000e+00> : vector<256x27xf32>
    %19 = tpu.matmul %17, %18, %cst {dimension_numbers = #tpu.dot_dimension_numbers<[0], [0], [1], [1], [0, 1, 1, 1], [], []>} : vector<72x256xbf16>, vector<72x27xbf16>, vector<256x27xf32> -> vector<256x27xf32>
    %c0_6 = arith.constant 0 : index
    %c0_7 = arith.constant 0 : index
    %20 = vector.load %arg3[%c0_6, %c0_7] : memref<128x27xf32, #tpu.memory_space<vmem>>, vector<128x27xf32>
    %21 = tpu.concatenate %20, %20 in 0 : vector<128x27xf32>, vector<128x27xf32> -> vector<256x27xf32>
    %22 = arith.addf %19, %21 : vector<256x27xf32>
    %cst_8 = arith.constant dense<0.000000e+00> : vector<256xf32>
    %23 = vector.multi_reduction <add>, %22, %cst_8 [1] : vector<256x27xf32> to vector<256xf32>
    %24 = vector.shape_cast %23 : vector<256xf32> to vector<256x1xf32>
    %cst_9 = arith.constant 2.700000e+01 : f32
    %25 = vector.broadcast %cst_9 : f32 to vector<256x1xf32>
    %26 = arith.divf %24, %25 : vector<256x1xf32>
    %27 = vector.broadcast %26 : vector<256x1xf32> to vector<256x27xf32>
    %28 = arith.subf %22, %27 : vector<256x27xf32>
    %29 = arith.mulf %28, %28 : vector<256x27xf32>
    %cst_10 = arith.constant dense<0.000000e+00> : vector<256xf32>
    %30 = vector.multi_reduction <add>, %29, %cst_10 [1] : vector<256x27xf32> to vector<256xf32>
    %31 = vector.shape_cast %30 : vector<256xf32> to vector<256x1xf32>
    %cst_11 = arith.constant 2.700000e+01 : f32
    %32 = vector.broadcast %cst_11 : f32 to vector<256x1xf32>
    %33 = arith.divf %31, %32 : vector<256x1xf32>
    %34 = vector.broadcast %26 : vector<256x1xf32> to vector<256x27xf32>
    %35 = arith.subf %22, %34 : vector<256x27xf32>
    %cst_12 = arith.constant 9.99999974E-6 : f32
    %36 = vector.broadcast %cst_12 : f32 to vector<256x1xf32>
    %37 = arith.addf %33, %36 : vector<256x1xf32>
    %38 = math.rsqrt %37 : vector<256x1xf32>
    %39 = vector.broadcast %38 : vector<256x1xf32> to vector<256x27xf32>
    %40 = arith.mulf %35, %39 : vector<256x27xf32>
    %41 = vector.broadcast %1 : vector<1x27xf32> to vector<256x27xf32>
    %42 = arith.mulf %40, %41 : vector<256x27xf32>
    %43 = vector.broadcast %2 : vector<1x27xf32> to vector<256x27xf32>
    %44 = arith.addf %42, %43 : vector<256x27xf32>
    %45 = arith.truncf %44 : vector<256x27xf32> to vector<256x27xbf16>
    %c0_13 = arith.constant 0 : index
    %c0_14 = arith.constant 0 : index
    %46 = vector.load %arg4[%c0_13, %c0_14] : memref<27x81xbf16, #tpu.memory_space<vmem>>, vector<27x81xbf16>
    %cst_15 = arith.constant dense<0.000000e+00> : vector<256x81xf32>
    %47 = tpu.matmul %45, %46, %cst_15 {dimension_numbers = #tpu.dot_dimension_numbers<[1], [0], [0], [1], [0, 0, 1, 1], [], []>} : vector<256x27xbf16>, vector<27x81xbf16>, vector<256x81xf32> -> vector<256x81xf32>
    %48 = vector.extract_strided_slice %47 {offsets = [0, 0], sizes = [256, 27], strides = [1, 1]} : vector<256x81xf32> to vector<256x27xf32>
    %49 = arith.truncf %48 : vector<256x27xf32> to vector<256x27xbf16>
    %c0_16 = arith.constant 0 : index
    %c0_17 = arith.constant 0 : index
    %c0_18 = arith.constant 0 : index
    %50 = vector.load %arg11[%c0_16, %c0_17, %c0_18] : memref<3x256x27xbf16, #tpu.memory_space<vmem>>, vector<1x256x27xbf16>
    %51 = vector.shape_cast %50 : vector<1x256x27xbf16> to vector<256x27xbf16>
    %52 = vector.shape_cast %49 : vector<256x27xbf16> to vector<1x256x27xbf16>
    tpu.vector_store %arg11[%c0_16, %c0_17, %c0_18], %52 {strides = array<i32>} : memref<3x256x27xbf16, #tpu.memory_space<vmem>>, vector<1x256x27xbf16>,
    %53 = vector.extract_strided_slice %47 {offsets = [0, 27], sizes = [256, 27], strides = [1, 1]} : vector<256x81xf32> to vector<256x27xf32>
    %54 = arith.truncf %53 : vector<256x27xf32> to vector<256x27xbf16>
    %c1 = arith.constant 1 : index
    %c0_19 = arith.constant 0 : index
    %c0_20 = arith.constant 0 : index
    %55 = vector.load %arg11[%c1, %c0_19, %c0_20] : memref<3x256x27xbf16, #tpu.memory_space<vmem>>, vector<1x256x27xbf16>
    %56 = vector.shape_cast %55 : vector<1x256x27xbf16> to vector<256x27xbf16>
    %57 = vector.shape_cast %54 : vector<256x27xbf16> to vector<1x256x27xbf16>
    tpu.vector_store %arg11[%c1, %c0_19, %c0_20], %57 {strides = array<i32>} : memref<3x256x27xbf16, #tpu.memory_space<vmem>>, vector<1x256x27xbf16>,
    %58 = vector.extract_strided_slice %47 {offsets = [0, 54], sizes = [256, 27], strides = [1, 1]} : vector<256x81xf32> to vector<256x27xf32>
    %59 = arith.truncf %58 : vector<256x27xf32> to vector<256x27xbf16>
    %c2 = arith.constant 2 : index
    %c0_21 = arith.constant 0 : index
    %c0_22 = arith.constant 0 : index
    %60 = vector.load %arg11[%c2, %c0_21, %c0_22] : memref<3x256x27xbf16, #tpu.memory_space<vmem>>, vector<1x256x27xbf16>
    %61 = vector.shape_cast %60 : vector<1x256x27xbf16> to vector<256x27xbf16>
    %62 = vector.shape_cast %59 : vector<256x27xbf16> to vector<1x256x27xbf16>
    tpu.vector_store %arg11[%c2, %c0_21, %c0_22], %62 {strides = array<i32>} : memref<3x256x27xbf16, #tpu.memory_space<vmem>>, vector<1x256x27xbf16>,
    %63 = tpu.iota {dimensions = array<i32: 0>} : vector<128x128xi32>
    %64 = tpu.iota {dimensions = array<i32: 1>} : vector<128x128xi32>
    %65 = arith.cmpi sge, %63, %64 : vector<128x128xi32>
    %c0_i32 = arith.constant 0 : i32
    %c2_i32 = arith.constant 2 : i32
    %66 = arith.addi %c0_i32, %c2_i32 : i32
    %c1_i32 = arith.constant 1 : i32
    scf.for %arg13 = %c0_i32 to %66 step %c1_i32  : i32 {
      %c128_i32 = arith.constant 128 : i32
      %155 = arith.muli %arg13, %c128_i32 : i32
      %156 = tpu.assume_multiple %155, 128 : i32
      %c0_60 = arith.constant 0 : index
      %157 = arith.index_cast %156 : i32 to index
      %c0_61 = arith.constant 0 : index
      %158 = vector.load %arg11[%c0_60, %157, %c0_61] : memref<3x256x27xbf16, #tpu.memory_space<vmem>>, vector<1x128x27xbf16>
      %159 = vector.shape_cast %158 : vector<1x128x27xbf16> to vector<128x27xbf16>
      %c1_62 = arith.constant 1 : index
      %160 = arith.index_cast %156 : i32 to index
      %c0_63 = arith.constant 0 : index
      %161 = vector.load %arg11[%c1_62, %160, %c0_63] : memref<3x256x27xbf16, #tpu.memory_space<vmem>>, vector<1x128x27xbf16>
      %162 = vector.shape_cast %161 : vector<1x128x27xbf16> to vector<128x27xbf16>
      %c2_64 = arith.constant 2 : index
      %163 = arith.index_cast %156 : i32 to index
      %c0_65 = arith.constant 0 : index
      %164 = vector.load %arg11[%c2_64, %163, %c0_65] : memref<3x256x27xbf16, #tpu.memory_space<vmem>>, vector<1x128x27xbf16>
      %165 = vector.shape_cast %164 : vector<1x128x27xbf16> to vector<128x27xbf16>
      %cst_66 = arith.constant dense<0.000000e+00> : vector<128x128xf32>
      %166 = tpu.matmul %159, %162, %cst_66 {dimension_numbers = #tpu.dot_dimension_numbers<[1], [1], [0], [0], [0, 0, 1, 0], [], []>} : vector<128x27xbf16>, vector<128x27xbf16>, vector<128x128xf32> -> vector<128x128xf32>
      %cst_67 = arith.constant -1.000000e+30 : f32
      %167 = vector.broadcast %cst_67 : f32 to vector<128x128xf32>
      %168 = arith.select %65, %166, %167 : vector<128x128xi1>, vector<128x128xf32>
      %cst_68 = arith.constant dense<0xFF800000> : vector<128xf32>
      %169 = vector.multi_reduction <maximumf>, %168, %cst_68 [1] : vector<128x128xf32> to vector<128xf32>
      %170 = vector.shape_cast %169 : vector<128xf32> to vector<128x1xf32>
      %171 = vector.broadcast %170 : vector<128x1xf32> to vector<128x128xf32>
      %172 = arith.subf %168, %171 : vector<128x128xf32>
      %173 = math.exp %172 : vector<128x128xf32>
      %cst_69 = arith.constant dense<0.000000e+00> : vector<128xf32>
      %174 = vector.multi_reduction <add>, %173, %cst_69 [1] : vector<128x128xf32> to vector<128xf32>
      %175 = vector.shape_cast %174 : vector<128xf32> to vector<128x1xf32>
      %176 = tpu.reciprocal %175 {approx = true} : vector<128x1xf32> -> vector<128x1xf32>
      %177 = vector.broadcast %176 : vector<128x1xf32> to vector<128x128xf32>
      %178 = arith.mulf %173, %177 : vector<128x128xf32>
      %179 = arith.truncf %178 : vector<128x128xf32> to vector<128x128xbf16>
      %cst_70 = arith.constant dense<0.000000e+00> : vector<128x27xf32>
      %180 = tpu.matmul %179, %165, %cst_70 {dimension_numbers = #tpu.dot_dimension_numbers<[1], [0], [0], [1], [0, 0, 1, 1], [], []>} : vector<128x128xbf16>, vector<128x27xbf16>, vector<128x27xf32> -> vector<128x27xf32>
      %181 = arith.index_cast %156 : i32 to index
      %c0_71 = arith.constant 0 : index
      %182 = vector.load %arg12[%181, %c0_71] : memref<256x27xf32, #tpu.memory_space<vmem>>, vector<128x27xf32>
      tpu.vector_store %arg12[%181, %c0_71], %180 {strides = array<i32>} : memref<256x27xf32, #tpu.memory_space<vmem>>, vector<128x27xf32>,
    }
    %c2_i32_23 = arith.constant 2 : i32
    %c0_24 = arith.constant 0 : index
    %c0_25 = arith.constant 0 : index
    %67 = vector.load %arg12[%c0_24, %c0_25] : memref<256x27xf32, #tpu.memory_space<vmem>>, vector<256x27xf32>
    %68 = arith.truncf %67 : vector<256x27xf32> to vector<256x27xbf16>
    %c0_26 = arith.constant 0 : index
    %c0_27 = arith.constant 0 : index
    %69 = vector.load %arg5[%c0_26, %c0_27] : memref<27x27xbf16, #tpu.memory_space<vmem>>, vector<27x27xbf16>
    %cst_28 = arith.constant dense<0.000000e+00> : vector<256x27xf32>
    %70 = tpu.matmul %68, %69, %cst_28 {dimension_numbers = #tpu.dot_dimension_numbers<[1], [0], [0], [1], [0, 0, 1, 1], [], []>} : vector<256x27xbf16>, vector<27x27xbf16>, vector<256x27xf32> -> vector<256x27xf32>
    %71 = vector.broadcast %7 : vector<1x27xf32> to vector<256x27xf32>
    %72 = arith.addf %70, %71 : vector<256x27xf32>
    %73 = arith.addf %22, %72 : vector<256x27xf32>
    %cst_29 = arith.constant dense<0.000000e+00> : vector<256xf32>
    %74 = vector.multi_reduction <add>, %73, %cst_29 [1] : vector<256x27xf32> to vector<256xf32>
    %75 = vector.shape_cast %74 : vector<256xf32> to vector<256x1xf32>
    %cst_30 = arith.constant 2.700000e+01 : f32
    %76 = vector.broadcast %cst_30 : f32 to vector<256x1xf32>
    %77 = arith.divf %75, %76 : vector<256x1xf32>
    %78 = vector.broadcast %77 : vector<256x1xf32> to vector<256x27xf32>
    %79 = arith.subf %73, %78 : vector<256x27xf32>
    %80 = arith.mulf %79, %79 : vector<256x27xf32>
    %cst_31 = arith.constant dense<0.000000e+00> : vector<256xf32>
    %81 = vector.multi_reduction <add>, %80, %cst_31 [1] : vector<256x27xf32> to vector<256xf32>
    %82 = vector.shape_cast %81 : vector<256xf32> to vector<256x1xf32>
    %cst_32 = arith.constant 2.700000e+01 : f32
    %83 = vector.broadcast %cst_32 : f32 to vector<256x1xf32>
    %84 = arith.divf %82, %83 : vector<256x1xf32>
    %85 = vector.broadcast %77 : vector<256x1xf32> to vector<256x27xf32>
    %86 = arith.subf %73, %85 : vector<256x27xf32>
    %cst_33 = arith.constant 9.99999974E-6 : f32
    %87 = vector.broadcast %cst_33 : f32 to vector<256x1xf32>
    %88 = arith.addf %84, %87 : vector<256x1xf32>
    %89 = math.rsqrt %88 : vector<256x1xf32>
    %90 = vector.broadcast %89 : vector<256x1xf32> to vector<256x27xf32>
    %91 = arith.mulf %86, %90 : vector<256x27xf32>
    %92 = vector.broadcast %3 : vector<1x27xf32> to vector<256x27xf32>
    %93 = arith.mulf %91, %92 : vector<256x27xf32>
    %94 = vector.broadcast %4 : vector<1x27xf32> to vector<256x27xf32>
    %95 = arith.addf %93, %94 : vector<256x27xf32>
    %96 = arith.truncf %95 : vector<256x27xf32> to vector<256x27xbf16>
    %c0_34 = arith.constant 0 : index
    %c0_35 = arith.constant 0 : index
    %97 = vector.load %arg6[%c0_34, %c0_35] : memref<27x108xbf16, #tpu.memory_space<vmem>>, vector<27x108xbf16>
    %cst_36 = arith.constant dense<0.000000e+00> : vector<256x108xf32>
    %98 = tpu.matmul %96, %97, %cst_36 {dimension_numbers = #tpu.dot_dimension_numbers<[1], [0], [0], [1], [0, 0, 1, 1], [], []>} : vector<256x27xbf16>, vector<27x108xbf16>, vector<256x108xf32> -> vector<256x108xf32>
    %99 = vector.broadcast %8 : vector<1x108xf32> to vector<256x108xf32>
    %100 = arith.addf %98, %99 : vector<256x108xf32>
    %cst_37 = arith.constant 0.000000e+00 : f32
    %101 = vector.broadcast %cst_37 : f32 to vector<256x108xf32>
    %102 = arith.maximumf %100, %101 : vector<256x108xf32>
    %103 = arith.truncf %102 : vector<256x108xf32> to vector<256x108xbf16>
    %c0_38 = arith.constant 0 : index
    %c0_39 = arith.constant 0 : index
    %104 = vector.load %arg7[%c0_38, %c0_39] : memref<108x27xbf16, #tpu.memory_space<vmem>>, vector<108x27xbf16>
    %cst_40 = arith.constant dense<0.000000e+00> : vector<256x27xf32>
    %105 = tpu.matmul %103, %104, %cst_40 {dimension_numbers = #tpu.dot_dimension_numbers<[1], [0], [0], [1], [0, 0, 1, 1], [], []>} : vector<256x108xbf16>, vector<108x27xbf16>, vector<256x27xf32> -> vector<256x27xf32>
    %106 = vector.broadcast %9 : vector<1x27xf32> to vector<256x27xf32>
    %107 = arith.addf %105, %106 : vector<256x27xf32>
    %108 = arith.addf %73, %107 : vector<256x27xf32>
    %cst_41 = arith.constant dense<0.000000e+00> : vector<256xf32>
    %109 = vector.multi_reduction <add>, %108, %cst_41 [1] : vector<256x27xf32> to vector<256xf32>
    %110 = vector.shape_cast %109 : vector<256xf32> to vector<256x1xf32>
    %cst_42 = arith.constant 2.700000e+01 : f32
    %111 = vector.broadcast %cst_42 : f32 to vector<256x1xf32>
    %112 = arith.divf %110, %111 : vector<256x1xf32>
    %113 = vector.broadcast %112 : vector<256x1xf32> to vector<256x27xf32>
    %114 = arith.subf %108, %113 : vector<256x27xf32>
    %115 = arith.mulf %114, %114 : vector<256x27xf32>
    %cst_43 = arith.constant dense<0.000000e+00> : vector<256xf32>
    %116 = vector.multi_reduction <add>, %115, %cst_43 [1] : vector<256x27xf32> to vector<256xf32>
    %117 = vector.shape_cast %116 : vector<256xf32> to vector<256x1xf32>
    %cst_44 = arith.constant 2.700000e+01 : f32
    %118 = vector.broadcast %cst_44 : f32 to vector<256x1xf32>
    %119 = arith.divf %117, %118 : vector<256x1xf32>
    %120 = vector.broadcast %112 : vector<256x1xf32> to vector<256x27xf32>
    %121 = arith.subf %108, %120 : vector<256x27xf32>
    %cst_45 = arith.constant 9.99999974E-6 : f32
    %122 = vector.broadcast %cst_45 : f32 to vector<256x1xf32>
    %123 = arith.addf %119, %122 : vector<256x1xf32>
    %124 = math.rsqrt %123 : vector<256x1xf32>
    %125 = vector.broadcast %124 : vector<256x1xf32> to vector<256x27xf32>
    %126 = arith.mulf %121, %125 : vector<256x27xf32>
    %127 = vector.broadcast %5 : vector<1x27xf32> to vector<256x27xf32>
    %128 = arith.mulf %126, %127 : vector<256x27xf32>
    %129 = vector.broadcast %6 : vector<1x27xf32> to vector<256x27xf32>
    %130 = arith.addf %128, %129 : vector<256x27xf32>
    %cst_46 = arith.constant 1.000000e+00 : f32
    %131 = vector.broadcast %cst_46 : f32 to vector<256x1xf32>
    %132 = tpu.concatenate %130, %131 in 1 : vector<256x27xf32>, vector<256x1xf32> -> vector<256x28xf32>
    %133 = arith.truncf %132 : vector<256x28xf32> to vector<256x28xbf16>
    %c0_47 = arith.constant 0 : index
    %c0_48 = arith.constant 0 : index
    %134 = vector.load %arg8[%c0_47, %c0_48] : memref<72x28xbf16, #tpu.memory_space<vmem>>, vector<72x28xbf16>
    %cst_49 = arith.constant dense<0.000000e+00> : vector<72x256xf32>
    %135 = tpu.matmul %134, %133, %cst_49 {dimension_numbers = #tpu.dot_dimension_numbers<[1], [1], [0], [0], [0, 0, 1, 0], [], []>} : vector<72x28xbf16>, vector<256x28xbf16>, vector<72x256xf32> -> vector<72x256xf32>
    %cst_50 = arith.constant dense<0xFF800000> : vector<256xf32>
    %136 = vector.multi_reduction <maximumf>, %135, %cst_50 [0] : vector<72x256xf32> to vector<256xf32>
    %137 = vector.shape_cast %136 : vector<256xf32> to vector<1x256xf32>
    %138 = vector.broadcast %137 : vector<1x256xf32> to vector<72x256xf32>
    %139 = arith.subf %135, %138 : vector<72x256xf32>
    %140 = math.exp %139 : vector<72x256xf32>
    %cst_51 = arith.constant dense<0.000000e+00> : vector<256xf32>
    %141 = vector.multi_reduction <add>, %140, %cst_51 [0] : vector<72x256xf32> to vector<256xf32>
    %142 = vector.shape_cast %141 : vector<256xf32> to vector<1x256xf32>
    %143 = math.log %142 : vector<1x256xf32>
    %144 = arith.addf %143, %137 : vector<1x256xf32>
    %145 = vector.broadcast %144 : vector<1x256xf32> to vector<72x256xf32>
    %146 = arith.subf %135, %145 : vector<72x256xf32>
    %147 = vector.extract_strided_slice %146 {offsets = [0, 0], sizes = [72, 128], strides = [1, 1]} : vector<72x256xf32> to vector<72x128xf32>
    %c0_52 = arith.constant 0 : index
    %c0_53 = arith.constant 0 : index
    %c0_54 = arith.constant 0 : index
    %c0_55 = arith.constant 0 : index
    %148 = vector.load %arg10[%c0_52, %c0_53, %c0_54, %c0_55] : memref<1x2x72x128xf32, #tpu.memory_space<vmem>>, vector<1x1x72x128xf32>
    %149 = vector.shape_cast %148 : vector<1x1x72x128xf32> to vector<72x128xf32>
    %150 = vector.shape_cast %147 : vector<72x128xf32> to vector<1x1x72x128xf32>
    tpu.vector_store %arg10[%c0_52, %c0_53, %c0_54, %c0_55], %150 {strides = array<i32>} : memref<1x2x72x128xf32, #tpu.memory_space<vmem>>, vector<1x1x72x128xf32>,
    %151 = vector.extract_strided_slice %146 {offsets = [0, 128], sizes = [72, 128], strides = [1, 1]} : vector<72x256xf32> to vector<72x128xf32>
    %c0_56 = arith.constant 0 : index
    %c1_57 = arith.constant 1 : index
    %c0_58 = arith.constant 0 : index
    %c0_59 = arith.constant 0 : index
    %152 = vector.load %arg10[%c0_56, %c1_57, %c0_58, %c0_59] : memref<1x2x72x128xf32, #tpu.memory_space<vmem>>, vector<1x1x72x128xf32>
    %153 = vector.shape_cast %152 : vector<1x1x72x128xf32> to vector<72x128xf32>
    %154 = vector.shape_cast %151 : vector<72x128xf32> to vector<1x1x72x128xf32>
    tpu.vector_store %arg10[%c0_56, %c1_57, %c0_58, %c0_59], %154 {strides = array<i32>} : memref<1x2x72x128xf32, #tpu.memory_space<vmem>>, vector<1x1x72x128xf32>,
    return
  }
  func.func @transform_0(%arg0: i32) -> (i32, i32, i32) {
    %c0_i32 = arith.constant 0 : i32
    %c0_i32_0 = arith.constant 0 : i32
    %c0_i32_1 = arith.constant 0 : i32
    return %arg0, %c0_i32, %c0_i32_0 : i32, i32, i32
  }
  func.func @transform_1(%arg0: i32) -> (i32, i32) {
    %c0_i32 = arith.constant 0 : i32
    %c0_i32_0 = arith.constant 0 : i32
    %c0_i32_1 = arith.constant 0 : i32
    return %c0_i32, %c0_i32_0 : i32, i32
  }
  func.func @transform_2(%arg0: i32) -> (i32, i32) {
    %c0_i32 = arith.constant 0 : i32
    %c0_i32_0 = arith.constant 0 : i32
    %c0_i32_1 = arith.constant 0 : i32
    return %c0_i32, %c0_i32_0 : i32, i32
  }
  func.func @transform_3(%arg0: i32) -> (i32, i32) {
    %c0_i32 = arith.constant 0 : i32
    %c0_i32_0 = arith.constant 0 : i32
    %c0_i32_1 = arith.constant 0 : i32
    return %c0_i32, %c0_i32_0 : i32, i32
  }
  func.func @transform_4(%arg0: i32) -> (i32, i32) {
    %c0_i32 = arith.constant 0 : i32
    %c0_i32_0 = arith.constant 0 : i32
    %c0_i32_1 = arith.constant 0 : i32
    return %c0_i32, %c0_i32_0 : i32, i32
  }
  func.func @transform_5(%arg0: i32) -> (i32, i32) {
    %c0_i32 = arith.constant 0 : i32
    %c0_i32_0 = arith.constant 0 : i32
    %c0_i32_1 = arith.constant 0 : i32
    return %c0_i32, %c0_i32_0 : i32, i32
  }
  func.func @transform_6(%arg0: i32) -> (i32, i32) {
    %c0_i32 = arith.constant 0 : i32
    %c0_i32_0 = arith.constant 0 : i32
    %c0_i32_1 = arith.constant 0 : i32
    return %c0_i32, %c0_i32_0 : i32, i32
  }
  func.func @transform_7(%arg0: i32) -> (i32, i32) {
    %c0_i32 = arith.constant 0 : i32
    %c0_i32_0 = arith.constant 0 : i32
    %c0_i32_1 = arith.constant 0 : i32
    return %c0_i32, %c0_i32_0 : i32, i32
  }
  func.func @transform_8(%arg0: i32) -> (i32, i32) {
    %c0_i32 = arith.constant 0 : i32
    %c0_i32_0 = arith.constant 0 : i32
    %c0_i32_1 = arith.constant 0 : i32
    return %c0_i32, %c0_i32_0 : i32, i32
  }
  func.func @transform_9(%arg0: i32) -> (i32, i32, i32, i32) {
    %c0_i32 = arith.constant 0 : i32
    %c0_i32_0 = arith.constant 0 : i32
    %c0_i32_1 = arith.constant 0 : i32
    %c0_i32_2 = arith.constant 0 : i32
    return %arg0, %c0_i32, %c0_i32_0, %c0_i32_1 : i32, i32, i32, i32
  }
}

</mosaic_0001>

<bundles_post_ra>
// kernel: gpt_forward.1
= control target key start
LH: loop header
LB: loop body
LE: loop exit
PB: predicated region body
PF: predicated region fallthrough
CT: control target
= control target key end

     0   :  { %14 = vsyncpa [#allocation5], 0  ;;  %s7921_s0 = inlined_call_operand.hbm [shape: s32[1,1,256], index: 0, kind: input, shape index: {}]   ;;  %s7922_s1 = inlined_call_operand.hbm [shape: bf16[72,27], index: 1, kind: input, shape index: {}]   ;;  %s7923_s2 = inlined_call_operand.hbm [shape: f32[128,27], index: 2, kind: input, shape index: {}]   ;;  %s7924_s3 = inlined_call_operand.hbm [shape: bf16[27,81], index: 3, kind: input, shape index: {}]   ;;  %s7925_s4 = inlined_call_operand.hbm [shape: bf16[27,27], index: 4, kind: input, shape index: {}]   ;;  %s7926_s5 = inlined_call_operand.hbm [shape: bf16[27,108], index: 5, kind: input, shape index: {}]   ;;  %s7927_s6 = inlined_call_operand.hbm [shape: bf16[108,27], index: 6, kind: input, shape index: {}]   ;;  %s7928_s7 = inlined_call_operand.hbm [shape: bf16[72,28], index: 7, kind: input, shape index: {}]   ;;  %s7929_s8 = inlined_call_operand.hbm [shape: f32[9,128], index: 8, kind: input, shape index: {}]   ;;  %s7930_s9 = inlined_call_operand.hbm [shape: f32[1,2,72,128], index: 9, kind: output, shape index: {}]  }
   0x1   :  { %15 = vsyncpa [#allocation8], 0 }
   0x2   :  { %16 = vsyncpa [#allocation11], 0 }
   0x3   :  { %17 = vsyncpa [#allocation14], 0 }
   0x4   :  { %18 = vsyncpa [#allocation17], 0 }
   0x5   :  { %19 = vsyncpa [#allocation6], 0  ;;  %s5424_s30 = smov [#allocation7]   ;;  %s5184_s13 = scalar_lea.hbm %s7922_s1, 576 }
   0x6   :  { %s35_s10 = sshll.u32 %s5424_s30, 4  ;;  %p5185_p0 = scmp.ne.s32.totalorder %s7922_s1, %s5184_s13  ;;  %s36_s10 = int_to_ptr.vmem [resolvable:$true] %s35_s10 }
   0x7   :  { %p5188_p1 = scmp.lt.u32.totalorder %s5184_s13, %s7922_s1 }
   0x9   :  { %p5190_p2 = pnand %p5188_p1, %p5185_p0 }
   0xb   :  { %5193 = shalt.err (!%p5190_p2)
}
   0xc   :  { %s5194_s18 = scalar_lea.vmem %s36_s10, 576  ;;  %p5199_p4 = scmp.lt.s32.totalorder %s36_s10, %s36_s10 }
   0xd   :  { %p5195_p3 = scmp.ne.s32.totalorder %s36_s10, %s5194_s18  ;;  %p5200_p5 = scmp.lt.s32.totalorder %s5194_s18, %s5194_s18 }
   0xf   :  { %p5201_p6 = por %p5200_p5, %p5199_p4 }
  0x11   :  { %p5202_p7 = pnand %p5201_p6, %p5195_p3 }
  0x13   :  { %5205 = shalt.err (!%p5202_p7)
}
  0x14   :  { %s5425_s19 = smov 64   ;;  %s5426_s20 = smov 4  }
  0x15   :  { %41 = dma.hbm_to_vmem [thread:$0]  %s7922_s1, 576, %s36_s10, [#allocation8], %s5425_s19, %s5425_s19, %s5426_s20  }
  0x16   :  { %s5427_s23 = smov [#allocation10]   ;;  %s5428_s25 = smov [#allocation13]  }
  0x17   :  { %s59_s24 = sshll.u32 %s5427_s23, 4  ;;  %s83_s26 = sshll.u32 %s5428_s25, 4  ;;  %s60_s24 = int_to_ptr.vmem [resolvable:$true] %s59_s24  ;;  %s84_s26 = int_to_ptr.vmem [resolvable:$true] %s83_s26 }
  0x18   :  { %s5206_s29 = scalar_lea.hbm %s7924_s3, 256 }
  0x19   :  { %p5207_p8 = scmp.ne.s32.totalorder %s7924_s3, %s5206_s29  ;;  %p5210_p9 = scmp.lt.u32.totalorder %s5206_s29, %s7924_s3 }
  0x1b   :  { %p5212_p10 = pnand %p5210_p9, %p5207_p8 }
  0x1d   :  { %5215 = shalt.err (!%p5212_p10)
}
  0x1e   :  { %s5216_s1 = scalar_lea.vmem %s60_s24, 256  ;;  %p5221_p12 = scmp.lt.s32.totalorder %s60_s24, %s60_s24 }
  0x1f   :  { %p5217_p11 = scmp.ne.s32.totalorder %s60_s24, %s5216_s1  ;;  %p5222_p13 = scmp.lt.s32.totalorder %s5216_s1, %s5216_s1 }
  0x21   :  { %p5223_p0 = por %p5222_p13, %p5221_p12 }
  0x23   :  { %p5224_p1 = pnand %p5223_p0, %p5217_p11 }
  0x25   :  { %5227 = shalt.err (!%p5224_p1)
}
  0x26   :  { %65 = dma.hbm_to_vmem [thread:$0]  %s7924_s3, 256, %s60_s24, [#allocation11], %s5425_s19, %s5425_s19, %s5426_s20  }
  0x27   :  { %s5228_s17 = scalar_lea.hbm %s7926_s5, 256 }
  0x28   :  { %p5229_p2 = scmp.ne.s32.totalorder %s7926_s5, %s5228_s17  ;;  %p5232_p3 = scmp.lt.u32.totalorder %s5228_s17, %s7926_s5 }
  0x2a   :  { %p5234_p4 = pnand %p5232_p3, %p5229_p2 }
  0x2c   :  { %5237 = shalt.err (!%p5234_p4)
}
  0x2d   :  { %s5238_s25 = scalar_lea.vmem %s84_s26, 256  ;;  %p5243_p6 = scmp.lt.s32.totalorder %s84_s26, %s84_s26 }
  0x2e   :  { %p5239_p5 = scmp.ne.s32.totalorder %s84_s26, %s5238_s25  ;;  %p5244_p7 = scmp.lt.s32.totalorder %s5238_s25, %s5238_s25 }
  0x30   :  { %p5245_p8 = por %p5244_p7, %p5243_p6 }
  0x32   :  { %p5246_p9 = pnand %p5245_p8, %p5239_p5 }
  0x34   :  { %5249 = shalt.err (!%p5246_p9)
}
  0x35   :  { %89 = dma.hbm_to_vmem [thread:$0]  %s7926_s5, 256, %s84_s26, [#allocation14], %s5425_s19, %s5425_s19, %s5426_s20  }
  0x36   :  { %s5429_s27 = smov [#allocation16]   ;;  %s5430_s29 = smov [#allocation4]  }
  0x37   :  { %s107_s28 = sshll.u32 %s5429_s27, 4  ;;  %s26_s30 = sshll.u32 %s5430_s29, 4  ;;  %s108_s28 = int_to_ptr.vmem [resolvable:$true] %s107_s28  ;;  %s27_s30 = int_to_ptr.vmem [resolvable:$true] %s26_s30 }
  0x38   :  { %s5250_s13 = scalar_lea.hbm %s7928_s7, 576 }
  0x39   :  { %p5251_p10 = scmp.ne.s32.totalorder %s7928_s7, %s5250_s13  ;;  %p5254_p11 = scmp.lt.u32.totalorder %s5250_s13, %s7928_s7 }
  0x3b   :  { %p5256_p12 = pnand %p5254_p11, %p5251_p10 }
  0x3d   :  { %5259 = shalt.err (!%p5256_p12)
}
  0x3e   :  { %s5260_s5 = scalar_lea.vmem %s108_s28, 576  ;;  %p5265_p0 = scmp.lt.s32.totalorder %s108_s28, %s108_s28 }
  0x3f   :  { %p5261_p13 = scmp.ne.s32.totalorder %s108_s28, %s5260_s5  ;;  %p5266_p1 = scmp.lt.s32.totalorder %s5260_s5, %s5260_s5 }
  0x41   :  { %p5267_p2 = por %p5266_p1, %p5265_p0 }
  0x43   :  { %p5268_p3 = pnand %p5267_p2, %p5261_p13 }
  0x45   :  { %5271 = shalt.err (!%p5268_p3)
}
  0x46   :  { %113 = dma.hbm_to_vmem [thread:$0]  %s7928_s7, 576, %s108_s28, [#allocation17], %s5425_s19, %s5425_s19, %s5426_s20  }
  0x47   :  { %s5272_s21 = scalar_lea.hbm %s7921_s0, 32 }
  0x48   :  { %p5273_p4 = scmp.ne.s32.totalorder %s7921_s0, %s5272_s21  ;;  %p5276_p5 = scmp.lt.u32.totalorder %s5272_s21, %s7921_s0 }
  0x4a   :  { %p5278_p6 = pnand %p5276_p5, %p5273_p4 }
  0x4c   :  { %5281 = shalt.err (!%p5278_p6)
}
  0x4d   :  { %s5282_s24 = scalar_lea.vmem %s27_s30, 32  ;;  %p5287_p8 = scmp.lt.s32.totalorder %s27_s30, %s27_s30 }
  0x4e   :  { %p5283_p7 = scmp.ne.s32.totalorder %s27_s30, %s5282_s24  ;;  %p5288_p9 = scmp.lt.s32.totalorder %s5282_s24, %s5282_s24 }
  0x50   :  { %p5289_p10 = por %p5288_p9, %p5287_p8 }
  0x52   :  { %p5290_p11 = pnand %p5289_p10, %p5283_p7 }
  0x54   :  { %5293 = shalt.err (!%p5290_p11)
}
  0x55   :  { %29 = dma.hbm_to_vmem [thread:$0]  %s7921_s0, 32, %s27_s30, [#allocation5]  }
  0x56   :  { %s5431_s28 = smov [#allocation9]   ;;  %s5294_s13 = scalar_lea.hbm %s7923_s2, 2048 }
  0x57   :  { %s47_s29 = sshll.u32 %s5431_s28, 4  ;;  %p5295_p12 = scmp.ne.s32.totalorder %s7923_s2, %s5294_s13  ;;  %s48_s29 = int_to_ptr.vmem [resolvable:$true] %s47_s29 }
  0x58   :  { %p5298_p13 = scmp.lt.u32.totalorder %s5294_s13, %s7923_s2 }
  0x5a   :  { %p5300_p0 = pnand %p5298_p13, %p5295_p12 }
  0x5c   :  { %5303 = shalt.err (!%p5300_p0)
}
  0x5d   :  { %s5304_s5 = scalar_lea.vmem %s48_s29, 2048  ;;  %p5309_p2 = scmp.lt.s32.totalorder %s48_s29, %s48_s29 }
  0x5e   :  { %p5305_p1 = scmp.ne.s32.totalorder %s48_s29, %s5304_s5  ;;  %p5310_p3 = scmp.lt.s32.totalorder %s5304_s5, %s5304_s5 }
  0x60   :  { %p5311_p4 = por %p5310_p3, %p5309_p2 }
  0x62   :  { %p5312_p5 = pnand %p5311_p4, %p5305_p1 }
  0x64   :  { %5315 = shalt.err (!%p5312_p5)
}
  0x65   :  { %s5432_s0 = smov 128   ;;  %s5433_s30 = smov 8  }
  0x66   :  { %53 = dma.hbm_to_vmem [thread:$0]  %s7923_s2, 2048, %s48_s29, [#allocation8], %s5432_s0, %s5432_s0, %s5433_s30  }
  0x67   :  { %s5434_s17 = smov [#allocation12]   ;;  %s5435_s21 = smov [#allocation15]  }
  0x68   :  { %s71_s18 = sshll.u32 %s5434_s17, 4  ;;  %s95_s22 = sshll.u32 %s5435_s21, 4  ;;  %s72_s18 = int_to_ptr.vmem [resolvable:$true] %s71_s18  ;;  %s5579_s22 = int_to_ptr.vmem [resolvable:$true] %s95_s22 }
  0x69   :  { %s5316_s3 = scalar_lea.hbm %s7925_s4, 256 }
  0x6a   :  { %p5317_p6 = scmp.ne.s32.totalorder %s7925_s4, %s5316_s3  ;;  %p5320_p7 = scmp.lt.u32.totalorder %s5316_s3, %s7925_s4 }
  0x6c   :  { %p5322_p8 = pnand %p5320_p7, %p5317_p6 }
  0x6e   :  { %5325 = shalt.err (!%p5322_p8)
}
  0x6f   :  { %s5326_s2 = scalar_lea.vmem %s72_s18, 256  ;;  %p5331_p10 = scmp.lt.s32.totalorder %s72_s18, %s72_s18 }
  0x70   :  { %p5327_p9 = scmp.ne.s32.totalorder %s72_s18, %s5326_s2  ;;  %p5332_p11 = scmp.lt.s32.totalorder %s5326_s2, %s5326_s2 }
  0x72   :  { %p5333_p12 = por %p5332_p11, %p5331_p10 }
  0x74   :  { %p5334_p13 = pnand %p5333_p12, %p5327_p9 }
  0x76   :  { %5337 = shalt.err (!%p5334_p13)
}
  0x77   :  { %77 = dma.hbm_to_vmem [thread:$0]  %s7925_s4, 256, %s72_s18, [#allocation11], %s5425_s19, %s5425_s19, %s5426_s20  }
  0x78   :  { %s5338_s1 = scalar_lea.hbm %s7927_s6, 896 }
  0x79   :  { %p5339_p0 = scmp.ne.s32.totalorder %s7927_s6, %s5338_s1  ;;  %p5342_p1 = scmp.lt.u32.totalorder %s5338_s1, %s7927_s6 }
  0x7b   :  { %p5344_p2 = pnand %p5342_p1, %p5339_p0 }
  0x7d   :  { %5347 = shalt.err (!%p5344_p2)
}
  0x7e   :  { %s5348_s26 = scalar_lea.vmem %s5579_s22, 896  ;;  %p5353_p4 = scmp.lt.s32.totalorder %s5579_s22, %s5579_s22 }
  0x7f   :  { %p5349_p3 = scmp.ne.s32.totalorder %s5579_s22, %s5348_s26  ;;  %p5354_p5 = scmp.lt.s32.totalorder %s5348_s26, %s5348_s26 }
  0x81   :  { %p5355_p6 = por %p5354_p5, %p5353_p4 }
  0x83   :  { %p5356_p7 = pnand %p5355_p6, %p5349_p3 }
  0x85   :  { %5359 = shalt.err (!%p5356_p7)
}
  0x86   :  { %101 = dma.hbm_to_vmem [thread:$0]  %s7927_s6, 896, %s5579_s22, [#allocation14], %s5425_s19, %s5425_s19, %s5426_s20  }
  0x87   :  { %s5436_s17 = smov [#allocation18]   ;;  %s5360_s25 = scalar_lea.hbm %s7929_s8, 256 }
  0x88   :  { %s119_s18 = sshll.u32 %s5436_s17, 4  ;;  %p5361_p8 = scmp.ne.s32.totalorder %s7929_s8, %s5360_s25  ;;  %s120_s18 = int_to_ptr.vmem [resolvable:$true] %s119_s18 }
  0x89   :  { %p5364_p9 = scmp.lt.u32.totalorder %s5360_s25, %s7929_s8 }
  0x8b   :  { %p5366_p10 = pnand %p5364_p9, %p5361_p8 }
  0x8d   :  { %5369 = shalt.err (!%p5366_p10)
}
  0x8e   :  { %s5370_s28 = scalar_lea.vmem %s120_s18, 256  ;;  %p5375_p12 = scmp.lt.s32.totalorder %s120_s18, %s120_s18 }
  0x8f   :  { %p5371_p11 = scmp.ne.s32.totalorder %s120_s18, %s5370_s28  ;;  %p5376_p13 = scmp.lt.s32.totalorder %s5370_s28, %s5370_s28 }
  0x91   :  { %p5377_p0 = por %p5376_p13, %p5375_p12 }
  0x93   :  { %p5378_p1 = pnand %p5377_p0, %p5371_p11 }
  0x95   :  { %5381 = shalt.err (!%p5378_p1)
}
  0x96   :  { %125 = dma.hbm_to_vmem [thread:$0]  %s7929_s8, 256, %s120_s18, [#allocation17], %s5432_s0, %s5432_s0, %s5433_s30  }
  0x97   :  { %5408 = dma.done.wait [#allocation5], 32  }
  0x98   :  { %5409 = vsyncadd [#allocation5], 4294967264 }
  0x99   :  { %5410 = dma.done.wait [#allocation8], 2624  }
  0x9a   :  { %5411 = vsyncadd [#allocation8], 4294964672 }
  0x9b   :  { %5412 = dma.done.wait [#allocation11], 512  }
  0x9c   :  { %5413 = vsyncadd [#allocation11], 4294966784 }
  0x9d   :  { %5414 = dma.done.wait [#allocation14], 1152  }
  0x9e   :  { %5415 = vsyncadd [#allocation14], 4294966144 }
  0x9f   :  { %5416 = dma.done.wait [#allocation17], 832  }
  0xa0   :  { %5417 = vsyncadd [#allocation17], 4294966464  ;;  %v157_v0 = vlaneseq  ;;  %v5666_v12 = vld [vmem:[#allocation18 + $0x8] ss:$0 sm:$0xff]  ;;  %v156_v13 = vld [vmem:[#allocation4] sm:$0x3] }
  0xa1   :  { %8000 = vst [vmem:[#allocation30_spill] sm:$0xff] %v5666_v12  ;;  %v4865_v15 = vld [vmem:[#allocation7] sm:$0xff]   ;;  %v4866_v22 = vld [vmem:[#allocation7 + $0x8] sm:$0xff]   ;;  %v4867_v23 = vld [vmem:[#allocation7 + $0x10] sm:$0xff]   ;;  %v5437_v24 = vmov 0.0   ;;  %s5439_s8 = smov 101  }
  0xa2   :  { %v5631_v1 = vshrl.u32 %v157_v0, 7  ;;  %v5633_v2 = vand.u32 127, %v157_v0  ;;  %4556 = vmatprep.subr.bf16.mxu0 %v4865_v15  ;;  %v4868_v34 = vld [vmem:[#allocation7 + $0x18] sm:$0xff]   ;;  %v4869_v41 = vld [vmem:[#allocation7 + $0x20] ss:$0 sps:$4 sm:$0xff]   ;;  %s5440_s20 = smov 74  }
  0xa3   :  { %4557 = vmatpush3.bf16.msra.mxu0 %v4865_v15  ;;  %s6377_s22 = smov 0  }
  0xa4   :  { %v5636_v3 = vadd.s32 8, %v5631_v1  ;;  %v7932_v4 = vsub.s32 0, %v5631_v1  ;;  %v5640_v5 = vadd.s32 72, %v5631_v1  ;;  %v5643_v6 = vadd.s32 80, %v5631_v1  ;;  %4558 = vmatprep.subr.bf16.mxu0 %v4866_v22 }
  0xa5   :  { %v5646_v7 = vadd.s32 88, %v5631_v1  ;;  %v5649_v8 = vadd.s32 96, %v5631_v1  ;;  %v5652_v9 = vadd.s32 104, %v5631_v1  ;;  %v5655_v10 = vadd.s32 112, %v5631_v1 }
  0xa6   :  { %v5658_v11 = vadd.s32 120, %v5631_v1  ;;  %vm1461_vm0 = vcmp.ge.s32.totalorder %v5631_v1, %v5633_v2  ;;  %vm1462_vm1 = vcmp.ge.s32.totalorder %v5636_v3, %v5633_v2  ;;  %v5678_v14 = vrot.slane %v156_v13, %v7932_v4 }
  0xa7   :  { %7996 = vst [vmem:[#allocation26_spill] sm:$0xff] %v5649_v8  ;;  %7997 = vst [vmem:[#allocation27_spill] sm:$0xff] %v5652_v9  ;;  %v5685_v16 = vadd.s32 16, %v5631_v1  ;;  %v5688_v17 = vadd.s32 24, %v5631_v1  ;;  %v5691_v18 = vadd.s32 32, %v5631_v1  ;;  %v5694_v19 = vadd.s32 40, %v5631_v1  ;;  %4559 = vmatpush3.bf16.msra.mxu0 %v4866_v22 }
  0xa8   :  { %7998 = vst [vmem:[#allocation28_spill] sm:$0xff] %v5655_v10  ;;  %7999 = vst [vmem:[#allocation29_spill] sm:$0xff] %v5658_v11  ;;  %vm175_vm9 = vcmp.eq.s32.totalorder %v5631_v1, %v5678_v14  ;;  %vm177_vm10 = vcmp.eq.s32.totalorder %v5636_v3, %v5678_v14  ;;  %v5701_v20 = vadd.s32 48, %v5631_v1  ;;  %v5704_v21 = vadd.s32 56, %v5631_v1  ;;  %4560 = vmatprep.subr.bf16.mxu0 %v4867_v23 }
  0xa9   :  { %v4245_v25 = vsel %vm175_vm9, 1.0, %v5437_v24  ;;  %v4247_v26 = vsel %vm177_vm10, 1.0, %v5437_v24  ;;  %vm179_vm11 = vcmp.eq.s32.totalorder %v5685_v16, %v5678_v14  ;;  %vm181_vm12 = vcmp.eq.s32.totalorder %v5688_v17, %v5678_v14 }
  0xaa   :  { %v229_v27 = vpack.c.bf16 %v4247_v26, %v4245_v25  ;;  %v4249_v28 = vsel %vm179_vm11, 1.0, %v5437_v24  ;;  %v4251_v29 = vsel %vm181_vm12, 1.0, %v5437_v24  ;;  %vm1463_vm13 = vcmp.ge.s32.totalorder %v5685_v16, %v5633_v2 }
  0xab   :  { %vm1464_vm14 = vcmp.ge.s32.totalorder %v5688_v17, %v5633_v2  ;;  %vm183_vm15 = vcmp.eq.s32.totalorder %v5691_v18, %v5678_v14  ;;  %vm185_vm9 = vcmp.eq.s32.totalorder %v5694_v19, %v5678_v14  ;;  %v231_v30 = vpack.c.bf16 %v4251_v29, %v4249_v28  ;;  %4561 = vmatpush3.bf16.msra.mxu0 %v4867_v23  ;;  %v5785_v29 = vld [vmem:[#allocation9] sm:$0xff] }
  0xac   :  { %264 = vxpose.xlu0.c.b16.start [1/5] (short) %v229_v27, 128  ;;  %v4253_v31 = vsel %vm183_vm15, 1.0, %v5437_v24  ;;  %vm1465_vm10 = vcmp.ge.s32.totalorder %v5691_v18, %v5633_v2  ;;  %vm1466_vm11 = vcmp.ge.s32.totalorder %v5694_v19, %v5633_v2  ;;  %v4255_v32 = vsel %vm185_vm9, 1.0, %v5437_v24  ;;  %4562 = vmatprep.subr.bf16.mxu0 %v4868_v34 }
  0xad   :  { %vm187_vm12 = vcmp.eq.s32.totalorder %v5701_v20, %v5678_v14  ;;  %vm189_vm8 = vcmp.eq.s32.totalorder %v5704_v21, %v5678_v14  ;;  %vm1467_vm7 = vcmp.ge.s32.totalorder %v5701_v20, %v5633_v2  ;;  %vm1468_vm15 = vcmp.ge.s32.totalorder %v5704_v21, %v5633_v2 }
  0xae   :  { %v5737_v33 = vadd.s32 64, %v5631_v1  ;;  %v4257_v35 = vsel %vm187_vm12, 1.0, %v5437_v24  ;;  %v4259_v36 = vsel %vm189_vm8, 1.0, %v5437_v24  ;;  %v7931_v37 = vsub.s32 1, %v5631_v1 }
  0xaf   :  { %v233_v38 = vpack.c.bf16 %v4255_v32, %v4253_v31  ;;  %v235_v40 = vpack.c.bf16 %v4259_v36, %v4257_v35  ;;  %vm372_vm12 = vcmask 1043456   ;;  %4563 = vmatpush3.bf16.msra.mxu0 %v4868_v34  ;;  %v5787_v31 = vld [vmem:[#allocation9 + $0x10] sm:$0xff]  ;;  %v5789_v34 = vld [vmem:[#allocation9 + $0x8] sm:$0xff] }
  0xb0   :  { %265 = vxpose.xlu0.c.b16.cont [2/5] (short) %v231_v30, 128  ;;  %v174_v39 = vrot.slane %v156_v13, %v7931_v37  ;;  %vm191_vm6 = vcmp.eq.s32.totalorder %v5737_v33, %v5678_v14  ;;  %4820 = vmatprep.subr.msk.bf16.mxu0 %vm372_vm12, %v4869_v41  ;;  %v374_v48 = vsel %vm372_vm12, %v4869_v41, 0  ;;  %vm1107_vm12 = vcmask 1045504  }
  0xb1   :  { %v4261_v46 = vsel %vm191_vm6, 1.0, %v5437_v24  ;;  %vm537_vm6 = vcmask 220160  }
  0xb2   :  { %vm176_vm8 = vcmp.eq.s32.totalorder %v5631_v1, %v174_v39  ;;  %vm178_vm5 = vcmp.eq.s32.totalorder %v5636_v3, %v174_v39  ;;  %vm180_vm4 = vcmp.eq.s32.totalorder %v5685_v16, %v174_v39  ;;  %vm182_vm3 = vcmp.eq.s32.totalorder %v5688_v17, %v174_v39 }
  0xb3   :  { %v4246_v42 = vsel %vm176_vm8, 1.0, %v5437_v24  ;;  %v4248_v43 = vsel %vm178_vm5, 1.0, %v5437_v24  ;;  %v4250_v44 = vsel %vm180_vm4, 1.0, %v5437_v24  ;;  %v4252_v45 = vsel %vm182_vm3, 1.0, %v5437_v24  ;;  %4565 = vmatpush3.bf16.msra.mxu0 %v374_v48  ;;  %v5813_v48 = vld [vmem:[#allocation9 + $0x30] sm:$0xff] }
  0xb4   :  { %266 = vxpose.xlu0.c.b16.cont [3/5] (short) %v233_v38, 128  ;;  %v230_v47 = vpack.c.bf16 %v4248_v43, %v4246_v42  ;;  %vm184_vm2 = vcmp.eq.s32.totalorder %v5691_v18, %v174_v39  ;;  %vm186_vm9 = vcmp.eq.s32.totalorder %v5694_v19, %v174_v39  ;;  %v232_v49 = vpack.c.bf16 %v4252_v45, %v4250_v44  ;;  %v5794_v38 = vld [vmem:[#allocation9 + $0x18] sm:$0xff]  ;;  %v5809_v45 = vld [vmem:[#allocation9 + $0x20] sm:$0xff] }
  0xb5   :  { %v237_v50 = vpack.c.bf16 %v4261_v46, %v4261_v46  ;;  %v4254_v51 = vsel %vm184_vm2, 1.0, %v5437_v24  ;;  %v4256_v52 = vsel %vm186_vm9, 1.0, %v5437_v24  ;;  %vm188_vm3 = vcmp.eq.s32.totalorder %v5701_v20, %v174_v39 }
  0xb6   :  { %280 = vxpose.xlu1.c.b16.start [1/5] (short) %v230_v47, 128  ;;  %vm190_vm4 = vcmp.eq.s32.totalorder %v5704_v21, %v174_v39  ;;  %v234_v53 = vpack.c.bf16 %v4256_v52, %v4254_v51  ;;  %v4258_v54 = vsel %vm188_vm3, 1.0, %v5437_v24  ;;  %vm192_vm5 = vcmp.eq.s32.totalorder %v5737_v33, %v174_v39 }
  0xb7   :  { %v4260_v55 = vsel %vm190_vm4, 1.0, %v5437_v24  ;;  %v4262_v57 = vsel %vm192_vm5, 1.0, %v5437_v24  ;;  %vm323_vm2 = vcmask 588800   ;;  %vm1106_vm9 = vcmask 1044480  }
  0xb8   :  { %267 = vxpose.xlu0.c.b16.cont [4/5] (short) %v235_v40, 128  ;;  %v236_v56 = vpack.c.bf16 %v4260_v55, %v4258_v54  ;;  %v238_v58 = vpack.c.bf16 %v4262_v57, %v4262_v57  ;;  %v5822_v54 = vld [vmem:[#allocation9 + $0x38] sm:$0xff] }
  0xba   :  { %281 = vxpose.xlu1.c.b16.cont [2/5] (short) %v232_v49, 128 }
  0xbc   :  { %268 = vxpose.xlu0.c.b16.end [5/5] (short) %v237_v50, 128  ;;  %v5815_v50 = vld [vmem:[#allocation9 + $0x28] sm:$0xff] }
  0xbe   :  { %282 = vxpose.xlu1.c.b16.cont [3/5] (short) %v234_v53, 128 }
  0xc2   :  { %283 = vxpose.xlu1.c.b16.cont [4/5] (short) %v236_v56, 128 }
  0xc6   :  { %284 = vxpose.xlu1.c.b16.end [5/5] (short) %v238_v58, 128 }
 0x112   :  { %v272_v59 = vpop.trf.xlu0 }
 0x113   :  { %4566 = vmatprep.mubr.msk.bf16.mxu0 %vm323_vm2, %v272_v59 }
 0x116   :  { %v273_v60 = vpop.trf.xlu0 }
 0x117   :  { %4567 = vmatmul.mubr.msk.bf16.vlgmr.msra.gmra.mrb[0].mxu0 %vm323_vm2, %v273_v60 }
 0x11a   :  { %v274_v61 = vpop.trf.xlu0 }
 0x11b   :  { %4570 = vmatprep.mubr.msk.bf16.mxu0 %vm323_vm2, %v274_v61  ;;  %v5837_v61 = vld [vmem:[#allocation9 + $0x40] sm:$0xff] }
 0x11c   :  { %v288_v0 = vpop.trf.xlu1 }
 0x11e   :  { %v275_v62 = vpop.trf.xlu0 }
 0x11f   :  { %4571 = vmatmul.mubr.msk.bf16.gmra.mrb[4].mxu0 %vm323_vm2, %v275_v62 }
 0x120   :  { %v289_v14 = vpop.trf.xlu1 }
 0x122   :  { %v276_v63 = vpop.trf.xlu0 }
 0x123   :  { %4574 = vmatprep.mubr.msk.bf16.mxu0 %vm323_vm2, %v276_v63 }
 0x124   :  { %v290_v23 = vpop.trf.xlu1 }
 0x126   :  { %v277_v13 = vpop.trf.xlu0 }
 0x127   :  { %4575 = vmatmul.mubr.msk.bf16.gmra.mrb[8].mxu0 %vm323_vm2, %v277_v13 }
 0x128   :  { %v291_v24 = vpop.trf.xlu1 }
 0x12a   :  { %v278_v15 = vpop.trf.xlu0 }
 0x12b   :  { %4578 = vmatprep.mubr.msk.bf16.mxu0 %vm323_vm2, %v278_v15 }
 0x12c   :  { %v292_v25 = vpop.trf.xlu1 }
 0x12e   :  { %v279_v22 = vpop.trf.xlu0 }
 0x12f   :  { %4579 = vmatmul.mubr.msk.bf16.gmra.mrb[12].mxu0 %vm323_vm2, %v279_v22 }
 0x130   :  { %4582 = vmatprep.mubr.msk.bf16.mxu0 %vm323_vm2, %v288_v0  ;;  %v293_v26 = vpop.trf.xlu1  ;;  %v5841_v0 = vld [vmem:[#allocation9 + $0x50] sm:$0xff] }
 0x134   :  { %v294_v27 = vpop.trf.xlu1 }
 0x137   :  { %4583 = vmatmul.mubr.msk.bf16.gmra.mrb[16].mxu0 %vm323_vm2, %v289_v14  ;;  %v5843_v14 = vld [vmem:[#allocation9 + $0x48] sm:$0xff] }
 0x138   :  { %4586 = vmatprep.mubr.msk.bf16.mxu0 %vm323_vm2, %v290_v23  ;;  %v295_v28 = vpop.trf.xlu1 }
 0x13f   :  { %4587 = vmatmul.mubr.msk.bf16.gmra.mrb[20].mxu0 %vm323_vm2, %v291_v24  ;;  %v5850_v24 = vld [vmem:[#allocation9 + $0x58] sm:$0xff] }
 0x140   :  { %4590 = vmatprep.mubr.msk.bf16.mxu0 %vm323_vm2, %v292_v25 }
 0x147   :  { %4591 = vmatmul.mubr.msk.bf16.gmra.mrb[24].mxu0 %vm323_vm2, %v293_v26 }
 0x148   :  { %4594 = vmatprep.mubr.msk.bf16.mxu0 %vm323_vm2, %v294_v27 }
 0x14f   :  { %4595 = vmatmul.mubr.msk.bf16.gmra.mrb[28].mxu0 %vm323_vm2, %v295_v28 }
 0x1ea   :  { %v4568_v30 = vpop.f32.mrb[0].mxu0 }
 0x1eb   :  { %v410_v32 = vpop.f32.mrb[1].mxu0  ;;  %v5797_v40 = vadd.f32 %v4568_v30, %v5787_v31 }
 0x1ec   :  { %v5792_v35 = vadd.f32 %v410_v32, %v5785_v29  ;;  %v4569_v36 = vpop.f32.mrb[2].mxu0 }
 0x1ed   :  { %v413_v39 = vpop.f32.mrb[3].mxu0  ;;  %8002 = vst [vmem:[#allocation32_spill] sm:$0xff] %v5797_v40  ;;  %v5805_v43 = vadd.f32 %v4569_v36, %v5794_v38  ;;  %v544_v47 = vsel %vm537_vm6, %v5797_v40, 0.0  ;;  %v5865_v36 = vld [vmem:[#allocation9 + $0x60] sm:$0xff] }
 0x1ee   :  { %8001 = vst [vmem:[#allocation31_spill] sm:$0xff] %v5792_v35  ;;  %v5800_v41 = vadd.f32 %v413_v39, %v5789_v34  ;;  %v538_v42 = vsel %vm537_vm6, %v5792_v35, 0.0 }
 0x1ef   :  { %539 = vadd.xlane.f32.xlu0 %v538_v42  ;;  %8004 = vst [vmem:[#allocation34_spill] sm:$0xff] %v5805_v43  ;;  %v547_v53 = vsel %vm537_vm6, %v5805_v43, 0.0 }
 0x1f0   :  { %8003 = vst [vmem:[#allocation33_spill] sm:$0xff] %v5800_v41  ;;  %v541_v44 = vsel %vm537_vm6, %v5800_v41, 0.0 }
 0x1f1   :  { %542 = vadd.xlane.f32.xlu1 %v541_v44  ;;  %v5869_v44 = vld [vmem:[#allocation9 + $0x70] sm:$0xff] }
 0x1f2   :  { %v4572_v46 = vpop.f32.mrb[4].mxu0 }
 0x1f3   :  { %545 = vadd.xlane.f32.xlu0 %v544_v47  ;;  %v426_v49 = vpop.f32.mrb[5].mxu0  ;;  %v5825_v56 = vadd.f32 %v4572_v46, %v5813_v48  ;;  %v5871_v47 = vld [vmem:[#allocation9 + $0x68] sm:$0xff] }
 0x1f4   :  { %v5818_v51 = vadd.f32 %v426_v49, %v5809_v45  ;;  %v4573_v52 = vpop.f32.mrb[6].mxu0 }
 0x1f5   :  { %548 = vadd.xlane.f32.xlu1 %v547_v53  ;;  %v429_v55 = vpop.f32.mrb[7].mxu0  ;;  %8006 = vst [vmem:[#allocation36_spill] sm:$0xff] %v5825_v56  ;;  %v5833_v59 = vadd.f32 %v4573_v52, %v5822_v54  ;;  %v556_v63 = vsel %vm537_vm6, %v5825_v56, 0.0 }
 0x1f6   :  { %8005 = vst [vmem:[#allocation35_spill] sm:$0xff] %v5818_v51  ;;  %v5828_v57 = vadd.f32 %v429_v55, %v5815_v50  ;;  %v550_v58 = vsel %vm537_vm6, %v5818_v51, 0.0  ;;  %v5878_v55 = vld [vmem:[#allocation9 + $0x78] sm:$0xff] }
 0x1f7   :  { %551 = vadd.xlane.f32.xlu0 %v550_v58  ;;  %8008 = vst [vmem:[#allocation38_spill] sm:$0xff] %v5833_v59  ;;  %v559_v23 = vsel %vm537_vm6, %v5833_v59, 0.0 }
 0x1f8   :  { %8007 = vst [vmem:[#allocation37_spill] sm:$0xff] %v5828_v57  ;;  %v553_v60 = vsel %vm537_vm6, %v5828_v57, 0.0 }
 0x1f9   :  { %554 = vadd.xlane.f32.xlu1 %v553_v60 }
 0x1fa   :  { %v4576_v62 = vpop.f32.mrb[8].mxu0 }
 0x1fb   :  { %557 = vadd.xlane.f32.xlu0 %v556_v63  ;;  %v442_v13 = vpop.f32.mrb[9].mxu0  ;;  %v5853_v26 = vadd.f32 %v4576_v62, %v5841_v0 }
 0x1fc   :  { %v5846_v15 = vadd.f32 %v442_v13, %v5837_v61  ;;  %v4577_v22 = vpop.f32.mrb[10].mxu0 }
 0x1fd   :  { %560 = vadd.xlane.f32.xlu1 %v559_v23  ;;  %v445_v25 = vpop.f32.mrb[11].mxu0  ;;  %8010 = vst [vmem:[#allocation40_spill] sm:$0xff] %v5853_v26  ;;  %v5861_v30 = vadd.f32 %v4577_v22, %v5850_v24  ;;  %v568_v42 = vsel %vm537_vm6, %v5853_v26, 0.0 }
 0x1fe   :  { %8009 = vst [vmem:[#allocation39_spill] sm:$0xff] %v5846_v15  ;;  %v5856_v27 = vadd.f32 %v445_v25, %v5843_v14  ;;  %v562_v28 = vsel %vm537_vm6, %v5846_v15, 0.0 }
 0x1ff   :  { %563 = vadd.xlane.f32.xlu0 %v562_v28  ;;  %8012 = vst [vmem:[#allocation42_spill] sm:$0xff] %v5861_v30  ;;  %v571_v53 = vsel %vm537_vm6, %v5861_v30, 0.0 }
 0x200   :  { %8011 = vst [vmem:[#allocation41_spill] sm:$0xff] %v5856_v27  ;;  %v565_v32 = vsel %vm537_vm6, %v5856_v27, 0.0 }
 0x201   :  { %566 = vadd.xlane.f32.xlu1 %v565_v32 }
 0x202   :  { %v4580_v39 = vpop.f32.mrb[12].mxu0 }
 0x203   :  { %569 = vadd.xlane.f32.xlu0 %v568_v42  ;;  %v458_v46 = vpop.f32.mrb[13].mxu0  ;;  %v5881_v60 = vadd.f32 %v4580_v39, %v5869_v44 }
 0x204   :  { %v5874_v49 = vadd.f32 %v458_v46, %v5865_v36  ;;  %v4581_v52 = vpop.f32.mrb[14].mxu0 }
 0x205   :  { %572 = vadd.xlane.f32.xlu1 %v571_v53  ;;  %v461_v58 = vpop.f32.mrb[15].mxu0  ;;  %8014 = vst [vmem:[#allocation44_spill] sm:$0xff] %v5881_v60  ;;  %v5889_v13 = vadd.f32 %v4581_v52, %v5878_v55  ;;  %v580_v25 = vsel %vm537_vm6, %v5881_v60, 0.0 }
 0x206   :  { %8013 = vst [vmem:[#allocation43_spill] sm:$0xff] %v5874_v49  ;;  %v5884_v62 = vadd.f32 %v461_v58, %v5871_v47  ;;  %v574_v63 = vsel %vm537_vm6, %v5874_v49, 0.0 }
 0x207   :  { %575 = vadd.xlane.f32.xlu0 %v574_v63  ;;  %8016 = vst [vmem:[#allocation46_spill] sm:$0xff] %v5889_v13  ;;  %v583_v42 = vsel %vm537_vm6, %v5889_v13, 0.0 }
 0x208   :  { %8015 = vst [vmem:[#allocation45_spill] sm:$0xff] %v5884_v62  ;;  %v577_v22 = vsel %vm537_vm6, %v5884_v62, 0.0 }
 0x209   :  { %578 = vadd.xlane.f32.xlu1 %v577_v22 }
 0x20a   :  { %v4584_v23 = vpop.f32.mrb[16].mxu0 }
 0x20b   :  { %v474_v28 = vpop.f32.mrb[17].mxu0  ;;  %581 = vadd.xlane.f32.xlu0 %v580_v25  ;;  %v5901_v52 = vadd.f32 %v4584_v23, %v5787_v31 }
 0x20c   :  { %v5896_v32 = vadd.f32 %v474_v28, %v5785_v29  ;;  %v4585_v39 = vpop.f32.mrb[18].mxu0 }
 0x20d   :  { %v477_v46 = vpop.f32.mrb[19].mxu0  ;;  %584 = vadd.xlane.f32.xlu1 %v583_v42  ;;  %8018 = vst [vmem:[#allocation48_spill] sm:$0xff] %v5901_v52  ;;  %v5909_v63 = vadd.f32 %v4585_v39, %v5794_v38  ;;  %v592_v25 = vsel %vm537_vm6, %v5901_v52, 0.0 }
 0x20e   :  { %8017 = vst [vmem:[#allocation47_spill] sm:$0xff] %v5896_v32  ;;  %v5904_v53 = vadd.f32 %v477_v46, %v5789_v34  ;;  %v586_v58 = vsel %vm537_vm6, %v5896_v32, 0.0 }
 0x20f   :  { %587 = vadd.xlane.f32.xlu0 %v586_v58  ;;  %8020 = vst [vmem:[#allocation50_spill] sm:$0xff] %v5909_v63  ;;  %v595_v28 = vsel %vm537_vm6, %v5909_v63, 0.0 }
 0x210   :  { %8019 = vst [vmem:[#allocation49_spill] sm:$0xff] %v5904_v53  ;;  %v589_v29 = vsel %vm537_vm6, %v5904_v53, 0.0 }
 0x211   :  { %590 = vadd.xlane.f32.xlu1 %v589_v29 }
 0x212   :  { %v4588_v22 = vpop.f32.mrb[20].mxu0 }
 0x213   :  { %v490_v31 = vpop.f32.mrb[21].mxu0  ;;  %593 = vadd.xlane.f32.xlu0 %v592_v25  ;;  %v5921_v38 = vadd.f32 %v4588_v22, %v5813_v48 }
 0x214   :  { %v5916_v34 = vadd.f32 %v490_v31, %v5809_v45  ;;  %v4589_v23 = vpop.f32.mrb[22].mxu0 }
 0x215   :  { %v493_v42 = vpop.f32.mrb[23].mxu0  ;;  %596 = vadd.xlane.f32.xlu1 %v595_v28  ;;  %8022 = vst [vmem:[#allocation52_spill] sm:$0xff] %v5921_v38  ;;  %v5929_v58 = vadd.f32 %v4589_v23, %v5822_v54  ;;  %v604_v25 = vsel %vm537_vm6, %v5921_v38, 0.0 }
 0x216   :  { %8021 = vst [vmem:[#allocation51_spill] sm:$0xff] %v5916_v34  ;;  %v5924_v39 = vadd.f32 %v493_v42, %v5815_v50  ;;  %v598_v46 = vsel %vm537_vm6, %v5916_v34, 0.0 }
 0x217   :  { %599 = vadd.xlane.f32.xlu0 %v598_v46  ;;  %8024 = vst [vmem:[#allocation54_spill] sm:$0xff] %v5929_v58  ;;  %v607_v31 = vsel %vm537_vm6, %v5929_v58, 0.0 }
 0x218   :  { %8023 = vst [vmem:[#allocation53_spill] sm:$0xff] %v5924_v39  ;;  %v601_v45 = vsel %vm537_vm6, %v5924_v39, 0.0 }
 0x219   :  { %602 = vadd.xlane.f32.xlu1 %v601_v45 }
 0x21a   :  { %v4592_v29 = vpop.f32.mrb[24].mxu0 }
 0x21b   :  { %v506_v48 = vpop.f32.mrb[25].mxu0  ;;  %605 = vadd.xlane.f32.xlu0 %v604_v25  ;;  %v5941_v54 = vadd.f32 %v4592_v29, %v5841_v0 }
 0x21c   :  { %v5936_v50 = vadd.f32 %v506_v48, %v5837_v61  ;;  %v4593_v22 = vpop.f32.mrb[26].mxu0 }
 0x21d   :  { %v509_v28 = vpop.f32.mrb[27].mxu0  ;;  %608 = vadd.xlane.f32.xlu1 %v607_v31  ;;  %8026 = vst [vmem:[#allocation56_spill] sm:$0xff] %v5941_v54  ;;  %v5949_v46 = vadd.f32 %v4593_v22, %v5850_v24  ;;  %v616_v25 = vsel %vm537_vm6, %v5941_v54, 0.0 }
 0x21e   :  { %8025 = vst [vmem:[#allocation55_spill] sm:$0xff] %v5936_v50  ;;  %v5944_v23 = vadd.f32 %v509_v28, %v5843_v14  ;;  %v610_v42 = vsel %vm537_vm6, %v5936_v50, 0.0 }
 0x21f   :  { %611 = vadd.xlane.f32.xlu0 %v610_v42  ;;  %8028 = vst [vmem:[#allocation58_spill] sm:$0xff] %v5949_v46  ;;  %v619_v48 = vsel %vm537_vm6, %v5949_v46, 0.0 }
 0x220   :  { %8027 = vst [vmem:[#allocation57_spill] sm:$0xff] %v5944_v23  ;;  %v613_v61 = vsel %vm537_vm6, %v5944_v23, 0.0 }
 0x221   :  { %614 = vadd.xlane.f32.xlu1 %v613_v61 }
 0x222   :  { %v4596_v45 = vpop.f32.mrb[28].mxu0 }
 0x223   :  { %v522_v0 = vpop.f32.mrb[29].mxu0  ;;  %617 = vadd.xlane.f32.xlu0 %v616_v25  ;;  %v5961_v24 = vadd.f32 %v4596_v45, %v5869_v44 }
 0x224   :  { %v5956_v14 = vadd.f32 %v522_v0, %v5865_v36  ;;  %v4597_v29 = vpop.f32.mrb[30].mxu0 }
 0x225   :  { %v525_v31 = vpop.f32.mrb[31].mxu0  ;;  %620 = vadd.xlane.f32.xlu1 %v619_v48  ;;  %8030 = vst [vmem:[#allocation60_spill] sm:$0xff] %v5961_v24  ;;  %v5969_v42 = vadd.f32 %v4597_v29, %v5878_v55  ;;  %v628_v61 = vsel %vm537_vm6, %v5961_v24, 0.0 }
 0x226   :  { %8029 = vst [vmem:[#allocation59_spill] sm:$0xff] %v5956_v14  ;;  %v5964_v22 = vadd.f32 %v525_v31, %v5871_v47  ;;  %v622_v28 = vsel %vm537_vm6, %v5956_v14, 0.0 }
 0x227   :  { %623 = vadd.xlane.f32.xlu0 %v622_v28  ;;  %8032 = vst [vmem:[#allocation62_spill] sm:$0xff] %v5969_v42  ;;  %v631_v44 = vsel %vm537_vm6, %v5969_v42, 0.0 }
 0x228   :  { %8031 = vst [vmem:[#allocation61_spill] sm:$0xff] %v5964_v22  ;;  %v625_v36 = vsel %vm537_vm6, %v5964_v22, 0.0 }
 0x229   :  { %626 = vadd.xlane.f32.xlu1 %v625_v36 }
 0x22b   :  { %629 = vadd.xlane.f32.xlu0 %v628_v61 }
 0x22d   :  { %632 = vadd.xlane.f32.xlu1 %v631_v44 }
 0x27c   :  { %v540_v47 = vpop.xlane.xlu0 %539 }
 0x27d   :  { %v635_v45 = vmul.f32 0.037037037, %v540_v47 }
 0x27e   :  { %v543_v25 = vpop.xlane.xlu1 %542 }
 0x27f   :  { %v5978_v0 = vsub.f32 %v5792_v35, %v635_v45  ;;  %v636_v55 = vmul.f32 0.037037037, %v543_v25 }
 0x280   :  { %v546_v29 = vpop.xlane.xlu0 %545 }
 0x281   :  { %v5981_v48 = vsub.f32 %v5800_v41, %v636_v55  ;;  %v637_v31 = vmul.f32 0.037037037, %v546_v29  ;;  %v699_v28 = vmul.f32 %v5978_v0, %v5978_v0 }
 0x282   :  { %v549_v36 = vpop.xlane.xlu1 %548 }
 0x283   :  { %v5986_v61 = vsub.f32 %v5797_v40, %v637_v31  ;;  %v638_v44 = vmul.f32 0.037037037, %v549_v36  ;;  %v731_v47 = vsel %vm537_vm6, %v699_v28, 0.0  ;;  %v700_v45 = vmul.f32 %v5981_v48, %v5981_v48 }
 0x284   :  { %732 = vadd.xlane.f32.xlu0 %v731_v47  ;;  %v552_v25 = vpop.xlane.xlu0 %551 }
 0x285   :  { %v5992_v37 = vsub.f32 %v5805_v43, %v638_v44  ;;  %v639_v55 = vmul.f32 0.037037037, %v552_v25  ;;  %v734_v29 = vsel %vm537_vm6, %v700_v45, 0.0  ;;  %v701_v4 = vmul.f32 %v5986_v61, %v5986_v61 }
 0x286   :  { %v555_v12 = vpop.xlane.xlu1 %554  ;;  %735 = vadd.xlane.f32.xlu1 %v734_v29 }
 0x287   :  { %v5998_v31 = vsub.f32 %v5818_v51, %v639_v55  ;;  %v640_v28 = vmul.f32 0.037037037, %v555_v12  ;;  %v737_v36 = vsel %vm537_vm6, %v701_v4, 0.0  ;;  %v702_v47 = vmul.f32 %v5992_v37, %v5992_v37 }
 0x288   :  { %738 = vadd.xlane.f32.xlu0 %v737_v36  ;;  %v558_v44 = vpop.xlane.xlu0 %557 }
 0x289   :  { %v6004_v25 = vsub.f32 %v5828_v57, %v640_v28  ;;  %v641_v45 = vmul.f32 0.037037037, %v558_v44  ;;  %v740_v41 = vsel %vm537_vm6, %v702_v47, 0.0  ;;  %v703_v29 = vmul.f32 %v5998_v31, %v5998_v31 }
 0x28a   :  { %v561_v43 = vpop.xlane.xlu1 %560  ;;  %741 = vadd.xlane.f32.xlu1 %v740_v41 }
 0x28b   :  { %v6010_v12 = vsub.f32 %v5825_v56, %v641_v45  ;;  %v642_v4 = vmul.f32 0.037037037, %v561_v43  ;;  %v743_v55 = vsel %vm537_vm6, %v703_v29, 0.0  ;;  %v704_v36 = vmul.f32 %v6004_v25, %v6004_v25 }
 0x28c   :  { %744 = vadd.xlane.f32.xlu0 %v743_v55  ;;  %v564_v28 = vpop.xlane.xlu0 %563 }
 0x28d   :  { %v6016_v44 = vsub.f32 %v5833_v59, %v642_v4  ;;  %v643_v47 = vmul.f32 0.037037037, %v564_v28  ;;  %v746_v57 = vsel %vm537_vm6, %v704_v36, 0.0  ;;  %v705_v41 = vmul.f32 %v6010_v12, %v6010_v12 }
 0x28e   :  { %v567_v51 = vpop.xlane.xlu1 %566  ;;  %747 = vadd.xlane.f32.xlu1 %v746_v57 }
 0x28f   :  { %v6022_v43 = vsub.f32 %v5846_v15, %v643_v47  ;;  %v644_v45 = vmul.f32 0.037037037, %v567_v51  ;;  %v749_v29 = vsel %vm537_vm6, %v705_v41, 0.0  ;;  %v706_v55 = vmul.f32 %v6016_v44, %v6016_v44 }
 0x290   :  { %750 = vadd.xlane.f32.xlu0 %v749_v29  ;;  %v570_v4 = vpop.xlane.xlu0 %569 }
 0x291   :  { %v6028_v28 = vsub.f32 %v5856_v27, %v644_v45  ;;  %v645_v36 = vmul.f32 0.037037037, %v570_v4  ;;  %v752_v59 = vsel %vm537_vm6, %v706_v55, 0.0  ;;  %v707_v57 = vmul.f32 %v6022_v43, %v6022_v43 }
 0x292   :  { %v573_v56 = vpop.xlane.xlu1 %572  ;;  %753 = vadd.xlane.f32.xlu1 %v752_v59 }
 0x293   :  { %v6034_v51 = vsub.f32 %v5853_v26, %v645_v36  ;;  %v646_v47 = vmul.f32 0.037037037, %v573_v56  ;;  %v755_v41 = vsel %vm537_vm6, %v707_v57, 0.0  ;;  %v708_v29 = vmul.f32 %v6028_v28, %v6028_v28  ;;  %v4870_v26 = vld [vmem:[#allocation10] sm:$0xff]  }
 0x294   :  { %756 = vadd.xlane.f32.xlu0 %v755_v41  ;;  %v576_v45 = vpop.xlane.xlu0 %575  ;;  %4598 = vmatprep.subr.bf16.mxu1 %v4870_v26 }
 0x295   :  { %v6040_v4 = vsub.f32 %v5861_v30, %v646_v47  ;;  %v647_v55 = vmul.f32 0.037037037, %v576_v45  ;;  %v758_v27 = vsel %vm537_vm6, %v708_v29, 0.0  ;;  %v709_v59 = vmul.f32 %v6034_v51, %v6034_v51  ;;  %4599 = vmatpush3.bf16.msra.mxu1 %v4870_v26 }
 0x296   :  { %759 = vadd.xlane.f32.xlu1 %v758_v27  ;;  %v579_v36 = vpop.xlane.xlu1 %578 }
 0x297   :  { %v6046_v56 = vsub.f32 %v5874_v49, %v647_v55  ;;  %v648_v57 = vmul.f32 0.037037037, %v579_v36  ;;  %v761_v15 = vsel %vm537_vm6, %v709_v59, 0.0  ;;  %v710_v41 = vmul.f32 %v6040_v4, %v6040_v4 }
 0x298   :  { %762 = vadd.xlane.f32.xlu0 %v761_v15  ;;  %v582_v47 = vpop.xlane.xlu0 %581 }
 0x299   :  { %v6052_v45 = vsub.f32 %v5884_v62, %v648_v57  ;;  %v649_v29 = vmul.f32 0.037037037, %v582_v47  ;;  %v764_v30 = vsel %vm537_vm6, %v710_v41, 0.0  ;;  %v711_v27 = vmul.f32 %v6046_v56, %v6046_v56 }
 0x29a   :  { %765 = vadd.xlane.f32.xlu1 %v764_v30  ;;  %v585_v55 = vpop.xlane.xlu1 %584 }
 0x29b   :  { %v6058_v36 = vsub.f32 %v5881_v60, %v649_v29  ;;  %v650_v59 = vmul.f32 0.037037037, %v585_v55  ;;  %v767_v49 = vsel %vm537_vm6, %v711_v27, 0.0  ;;  %v712_v15 = vmul.f32 %v6052_v45, %v6052_v45 }
 0x29c   :  { %768 = vadd.xlane.f32.xlu0 %v767_v49  ;;  %v588_v57 = vpop.xlane.xlu0 %587 }
 0x29d   :  { %v6064_v47 = vsub.f32 %v5889_v13, %v650_v59  ;;  %v651_v41 = vmul.f32 0.037037037, %v588_v57  ;;  %v770_v62 = vsel %vm537_vm6, %v712_v15, 0.0  ;;  %v713_v30 = vmul.f32 %v6058_v36, %v6058_v36 }
 0x29e   :  { %771 = vadd.xlane.f32.xlu1 %v770_v62  ;;  %v591_v29 = vpop.xlane.xlu1 %590 }
 0x29f   :  { %v6070_v55 = vsub.f32 %v5896_v32, %v651_v41  ;;  %v652_v27 = vmul.f32 0.037037037, %v591_v29  ;;  %v773_v60 = vsel %vm537_vm6, %v713_v30, 0.0  ;;  %v714_v49 = vmul.f32 %v6064_v47, %v6064_v47 }
 0x2a0   :  { %774 = vadd.xlane.f32.xlu0 %v773_v60  ;;  %v594_v59 = vpop.xlane.xlu0 %593 }
 0x2a1   :  { %v6076_v57 = vsub.f32 %v5904_v53, %v652_v27  ;;  %v653_v15 = vmul.f32 0.037037037, %v594_v59  ;;  %v776_v13 = vsel %vm537_vm6, %v714_v49, 0.0  ;;  %v715_v62 = vmul.f32 %v6070_v55, %v6070_v55 }
 0x2a2   :  { %777 = vadd.xlane.f32.xlu1 %v776_v13  ;;  %v597_v41 = vpop.xlane.xlu1 %596 }
 0x2a3   :  { %v6082_v29 = vsub.f32 %v5901_v52, %v653_v15  ;;  %v654_v30 = vmul.f32 0.037037037, %v597_v41  ;;  %v779_v32 = vsel %vm537_vm6, %v715_v62, 0.0  ;;  %v716_v60 = vmul.f32 %v6076_v57, %v6076_v57 }
 0x2a4   :  { %780 = vadd.xlane.f32.xlu0 %v779_v32  ;;  %v600_v27 = vpop.xlane.xlu0 %599 }
 0x2a5   :  { %v6088_v59 = vsub.f32 %v5909_v63, %v654_v30  ;;  %v655_v49 = vmul.f32 0.037037037, %v600_v27  ;;  %v782_v53 = vsel %vm537_vm6, %v716_v60, 0.0  ;;  %v717_v13 = vmul.f32 %v6082_v29, %v6082_v29  ;;  %v4871_v60 = vld [vmem:[#allocation10 + $0x8] sm:$0x3f]  }
 0x2a6   :  { %783 = vadd.xlane.f32.xlu1 %v782_v53  ;;  %v603_v15 = vpop.xlane.xlu1 %602  ;;  %v5438_v63 = vmov 65535  }
 0x2a7   :  { %v6094_v62 = vsub.f32 %v5916_v34, %v655_v49  ;;  %v656_v41 = vmul.f32 0.037037037, %v603_v15  ;;  %v785_v32 = vsel %vm537_vm6, %v717_v13, 0.0  ;;  %v718_v30 = vmul.f32 %v6088_v59, %v6088_v59 }
 0x2a8   :  { %786 = vadd.xlane.f32.xlu0 %v785_v32  ;;  %v606_v27 = vpop.xlane.xlu0 %605  ;;  %v1108_v52 = vsel %vm1106_vm9, 4294967295, %v5438_v63 }
 0x2a9   :  { %v6100_v53 = vsub.f32 %v5924_v39, %v656_v41  ;;  %v657_v35 = vmul.f32 0.037037037, %v606_v27  ;;  %v788_v49 = vsel %vm537_vm6, %v718_v30, 0.0  ;;  %v719_v13 = vmul.f32 %v6094_v62, %v6094_v62 }
 0x2aa   :  { %789 = vadd.xlane.f32.xlu1 %v788_v49  ;;  %v609_v15 = vpop.xlane.xlu1 %608  ;;  %v6106_v34 = vsel %vm1107_vm12, %v1108_v52, 0 }
 0x2ab   :  { %8033 = vst [vmem:[#allocation63_spill] sm:$0xff] %v6106_v34  ;;  %v6109_v26 = vsub.f32 %v5921_v38, %v657_v35  ;;  %v658_v32 = vmul.f32 0.037037037, %v609_v15  ;;  %v791_v63 = vsel %vm537_vm6, %v719_v13, 0.0  ;;  %v720_v41 = vmul.f32 %v6100_v53, %v6100_v53 }
 0x2ac   :  { %792 = vadd.xlane.f32.xlu0 %v791_v63  ;;  %v612_v27 = vpop.xlane.xlu0 %611  ;;  %v1111_v30 = vand.u32 %v4871_v60, %v6106_v34 }
 0x2ad   :  { %v6116_v39 = vsub.f32 %v5929_v58, %v658_v32  ;;  %v659_v49 = vmul.f32 0.037037037, %v612_v27  ;;  %v794_v52 = vsel %vm537_vm6, %v720_v41, 0.0  ;;  %v721_v35 = vmul.f32 %v6109_v26, %v6109_v26 }
 0x2ae   :  { %795 = vadd.xlane.f32.xlu1 %v794_v52  ;;  %v615_v15 = vpop.xlane.xlu1 %614  ;;  %4600 = vmatprep.subr.bf16.mxu1 %v1111_v30 }
 0x2af   :  { %v6122_v13 = vsub.f32 %v5936_v50, %v659_v49  ;;  %v660_v38 = vmul.f32 0.037037037, %v615_v15  ;;  %v797_v63 = vsel %vm537_vm6, %v721_v35, 0.0  ;;  %v722_v60 = vmul.f32 %v6116_v39, %v6116_v39  ;;  %4601 = vmatpush3.bf16.msra.mxu1 %v1111_v30 }
 0x2b0   :  { %798 = vadd.xlane.f32.xlu0 %v797_v63  ;;  %v618_v32 = vpop.xlane.xlu0 %617 }
 0x2b1   :  { %v6128_v41 = vsub.f32 %v5944_v23, %v660_v38  ;;  %v661_v27 = vmul.f32 0.037037037, %v618_v32  ;;  %v800_v52 = vsel %vm537_vm6, %v722_v60, 0.0  ;;  %v723_v58 = vmul.f32 %v6122_v13, %v6122_v13 }
 0x2b2   :  { %801 = vadd.xlane.f32.xlu1 %v800_v52  ;;  %v621_v49 = vpop.xlane.xlu1 %620 }
 0x2b3   :  { %v6134_v15 = vsub.f32 %v5941_v54, %v661_v27  ;;  %v662_v35 = vmul.f32 0.037037037, %v621_v49  ;;  %v803_v50 = vsel %vm537_vm6, %v723_v58, 0.0  ;;  %v724_v30 = vmul.f32 %v6128_v41, %v6128_v41 }
 0x2b4   :  { %804 = vadd.xlane.f32.xlu0 %v803_v50  ;;  %v624_v38 = vpop.xlane.xlu0 %623 }
 0x2b5   :  { %v6140_v63 = vsub.f32 %v5949_v46, %v662_v35  ;;  %v663_v60 = vmul.f32 0.037037037, %v624_v38  ;;  %v806_v32 = vsel %vm537_vm6, %v724_v30, 0.0  ;;  %v725_v52 = vmul.f32 %v6134_v15, %v6134_v15 }
 0x2b6   :  { %807 = vadd.xlane.f32.xlu1 %v806_v32  ;;  %v627_v27 = vpop.xlane.xlu1 %626 }
 0x2b7   :  { %v6146_v49 = vsub.f32 %v5956_v14, %v663_v60  ;;  %v664_v58 = vmul.f32 0.037037037, %v627_v27  ;;  %v809_v23 = vsel %vm537_vm6, %v725_v52, 0.0  ;;  %v726_v50 = vmul.f32 %v6140_v63, %v6140_v63 }
 0x2b8   :  { %810 = vadd.xlane.f32.xlu0 %v809_v23  ;;  %v630_v35 = vpop.xlane.xlu0 %629 }
 0x2b9   :  { %v6152_v38 = vsub.f32 %v5964_v22, %v664_v58  ;;  %v665_v30 = vmul.f32 0.037037037, %v630_v35  ;;  %v812_v46 = vsel %vm537_vm6, %v726_v50, 0.0  ;;  %v727_v32 = vmul.f32 %v6146_v49, %v6146_v49 }
 0x2ba   :  { %813 = vadd.xlane.f32.xlu1 %v812_v46  ;;  %v633_v60 = vpop.xlane.xlu1 %632 }
 0x2bb   :  { %v6158_v27 = vsub.f32 %v5961_v24, %v665_v30  ;;  %v666_v52 = vmul.f32 0.037037037, %v633_v60  ;;  %v815_v14 = vsel %vm537_vm6, %v727_v32, 0.0  ;;  %v728_v23 = vmul.f32 %v6152_v38, %v6152_v38 }
 0x2bc   :  { %816 = vadd.xlane.f32.xlu0 %v815_v14 }
 0x2bd   :  { %v6164_v58 = vsub.f32 %v5969_v42, %v666_v52  ;;  %v818_v50 = vsel %vm537_vm6, %v728_v23, 0.0  ;;  %v729_v35 = vmul.f32 %v6158_v27, %v6158_v27 }
 0x2be   :  { %819 = vadd.xlane.f32.xlu1 %v818_v50 }
 0x2bf   :  { %v821_v46 = vsel %vm537_vm6, %v729_v35, 0.0  ;;  %v730_v30 = vmul.f32 %v6164_v58, %v6164_v58 }
 0x2c0   :  { %822 = vadd.xlane.f32.xlu0 %v821_v46 }
 0x2c1   :  { %v824_v32 = vsel %vm537_vm6, %v730_v30, 0.0  ;;  %v6173_v30 = vld [vmem:[#allocation18] sm:$0xff] }
 0x2c2   :  { %825 = vadd.xlane.f32.xlu1 %v824_v32  ;;  %8034 = vst [vmem:[#allocation64_spill] sm:$0xff] %v6173_v30 }
 0x311   :  { %v733_v60 = vpop.xlane.xlu0 %732 }
 0x312   :  { %v827_v14 = vmul.f32 0.037037037, %v733_v60 }
 0x313   :  { %v736_v24 = vpop.xlane.xlu1 %735 }
 0x314   :  { %v859_v52 = vadd.f32 1e-05, %v827_v14  ;;  %v828_v42 = vmul.f32 0.037037037, %v736_v24 }
 0x315   :  { %v739_v22 = vpop.xlane.xlu0 %738 }
 0x316   :  { %4872 = vrsqrt.f32 %v859_v52  ;;  %v860_v23 = vadd.f32 1e-05, %v828_v42  ;;  %v829_v54 = vmul.f32 0.037037037, %v739_v22  ;;  %v8035_v22 = vsub.s32 0, %v5631_v1 }
 0x317   :  { %v742_v40 = vpop.xlane.xlu1 %741 }
 0x318   :  { %4874 = vrsqrt.f32 %v860_v23  ;;  %v861_v50 = vadd.f32 1e-05, %v829_v54  ;;  %v830_v35 = vmul.f32 0.037037037, %v742_v40  ;;  %v6178_v42 = vrot.slane %v6173_v30, %v8035_v22 }
 0x319   :  { %v745_v34 = vpop.xlane.xlu0 %744 }
 0x31a   :  { %4876 = vrsqrt.f32 %v861_v50  ;;  %v862_v11 = vadd.f32 1e-05, %v830_v35  ;;  %v831_v46 = vmul.f32 0.037037037, %v745_v34  ;;  %v8036_v50 = vsub.s32 1, %v5631_v1 }
 0x31b   :  { %v748_v10 = vpop.xlane.xlu1 %747 }
 0x31c   :  { %4878 = vrsqrt.f32 %v862_v11  ;;  %v863_v32 = vadd.f32 1e-05, %v831_v46  ;;  %v832_v60 = vmul.f32 0.037037037, %v748_v10  ;;  %v6183_v11 = vrot.slane %v6173_v30, %v8036_v50 }
 0x31d   :  { %v751_v14 = vpop.xlane.xlu0 %750 }
 0x31e   :  { %4880 = vrsqrt.f32 %v863_v32  ;;  %v864_v24 = vadd.f32 1e-05, %v832_v60  ;;  %v833_v52 = vmul.f32 0.037037037, %v751_v14 }
 0x31f   :  { %v754_v40 = vpop.xlane.xlu1 %753 }
 0x320   :  { %v4873_v54 = vpop.eup %4872  ;;  %4882 = vrsqrt.f32 %v864_v24  ;;  %v865_v23 = vadd.f32 1e-05, %v833_v52  ;;  %v834_v34 = vmul.f32 0.037037037, %v754_v40 }
 0x321   :  { %v757_v10 = vpop.xlane.xlu0 %756  ;;  %v923_v35 = vmul.f32 %v4873_v54, %v5978_v0 }
 0x322   :  { %v4875_v46 = vpop.eup %4874  ;;  %4884 = vrsqrt.f32 %v865_v23  ;;  %v866_v32 = vadd.f32 1e-05, %v834_v34  ;;  %v835_v60 = vmul.f32 0.037037037, %v757_v10 }
 0x323   :  { %v760_v14 = vpop.xlane.xlu1 %759  ;;  %v924_v22 = vmul.f32 %v4875_v46, %v5981_v48  ;;  %v959_v9 = vmul.f32 %v6178_v42, %v923_v35 }
 0x324   :  { %v4877_v24 = vpop.eup %4876  ;;  %4886 = vrsqrt.f32 %v866_v32  ;;  %v867_v52 = vadd.f32 1e-05, %v835_v60  ;;  %v836_v40 = vmul.f32 0.037037037, %v760_v14 }
 0x325   :  { %v925_v8 = vmul.f32 %v4877_v24, %v5986_v61  ;;  %v763_v50 = vpop.xlane.xlu0 %762  ;;  %v960_v30 = vmul.f32 %v6178_v42, %v924_v22  ;;  %v995_v0 = vadd.f32 %v6183_v11, %v959_v9 }
 0x326   :  { %v4879_v54 = vpop.eup %4878  ;;  %4888 = vrsqrt.f32 %v867_v52  ;;  %v868_v23 = vadd.f32 1e-05, %v836_v40  ;;  %v837_v34 = vmul.f32 0.037037037, %v763_v50 }
 0x327   :  { %v926_v10 = vmul.f32 %v4879_v54, %v5992_v37  ;;  %v766_v48 = vpop.xlane.xlu1 %765  ;;  %v996_v35 = vadd.f32 %v6183_v11, %v960_v30  ;;  %v961_v46 = vmul.f32 %v6178_v42, %v925_v8 }
 0x328   :  { %v4881_v32 = vpop.eup %4880  ;;  %4890 = vrsqrt.f32 %v868_v23  ;;  %v869_v60 = vadd.f32 1e-05, %v837_v34  ;;  %v838_v61 = vmul.f32 0.037037037, %v766_v48 }
 0x329   :  { %v927_v14 = vmul.f32 %v4881_v32, %v5998_v31  ;;  %v769_v22 = vpop.xlane.xlu0 %768  ;;  %v1027_v24 = vpack.c.bf16 %v996_v35, %v995_v0  ;;  %v962_v9 = vmul.f32 %v6178_v42, %v926_v10  ;;  %v997_v52 = vadd.f32 %v6183_v11, %v961_v46 }
 0x32a   :  { %v4883_v40 = vpop.eup %4882  ;;  %4892 = vrsqrt.f32 %v869_v60  ;;  %v870_v37 = vadd.f32 1e-05, %v838_v61  ;;  %v839_v50 = vmul.f32 0.037037037, %v769_v22 }
 0x32b   :  { %v928_v30 = vmul.f32 %v4883_v40, %v6004_v25  ;;  %v772_v54 = vpop.xlane.xlu1 %771  ;;  %4602 = vmatprep.mubr.msk.bf16.mxu1 %vm537_vm6, %v1027_v24  ;;  %v998_v8 = vadd.f32 %v6183_v11, %v962_v9  ;;  %v963_v23 = vmul.f32 %v6178_v42, %v927_v14 }
 0x32c   :  { %v4885_v31 = vpop.eup %4884  ;;  %4894 = vrsqrt.f32 %v870_v37  ;;  %v871_v0 = vadd.f32 1e-05, %v839_v50  ;;  %v840_v34 = vmul.f32 0.037037037, %v772_v54 }
 0x32d   :  { %v929_v10 = vmul.f32 %v4885_v31, %v6010_v12  ;;  %v775_v48 = vpop.xlane.xlu0 %774  ;;  %v1028_v35 = vpack.c.bf16 %v998_v8, %v997_v52  ;;  %v964_v46 = vmul.f32 %v6178_v42, %v928_v30  ;;  %v999_v32 = vadd.f32 %v6183_v11, %v963_v23 }
 0x32e   :  { %v4887_v25 = vpop.eup %4886  ;;  %4896 = vrsqrt.f32 %v871_v0  ;;  %v872_v60 = vadd.f32 1e-05, %v840_v34  ;;  %v841_v61 = vmul.f32 0.037037037, %v775_v48 }
 0x32f   :  { %v930_v22 = vmul.f32 %v4887_v25, %v6016_v44  ;;  %v778_v24 = vpop.xlane.xlu1 %777  ;;  %4603 = vmatmul.mubr.msk.bf16.vlgmr.msra.gmra.mrb[0].mxu1 %vm537_vm6, %v1028_v35  ;;  %v1000_v14 = vadd.f32 %v6183_v11, %v964_v46  ;;  %v965_v9 = vmul.f32 %v6178_v42, %v929_v10 }
 0x330   :  { %v4889_v12 = vpop.eup %4888  ;;  %4898 = vrsqrt.f32 %v872_v60  ;;  %v873_v52 = vadd.f32 1e-05, %v841_v61  ;;  %v842_v40 = vmul.f32 0.037037037, %v778_v24 }
 0x331   :  { %v931_v37 = vmul.f32 %v4889_v12, %v6022_v43  ;;  %v781_v50 = vpop.xlane.xlu0 %780  ;;  %v1029_v30 = vpack.c.bf16 %v1000_v14, %v999_v32  ;;  %v966_v54 = vmul.f32 %v6178_v42, %v930_v22  ;;  %v1001_v8 = vadd.f32 %v6183_v11, %v965_v9 }
 0x332   :  { %v4891_v44 = vpop.eup %4890  ;;  %4900 = vrsqrt.f32 %v873_v52  ;;  %v874_v23 = vadd.f32 1e-05, %v842_v40  ;;  %v843_v31 = vmul.f32 0.037037037, %v781_v50 }
 0x333   :  { %v932_v0 = vmul.f32 %v4891_v44, %v6028_v28  ;;  %v784_v34 = vpop.xlane.xlu1 %783  ;;  %4606 = vmatprep.mubr.msk.bf16.mxu1 %vm537_vm6, %v1029_v30  ;;  %v1002_v10 = vadd.f32 %v6183_v11, %v966_v54  ;;  %v967_v48 = vmul.f32 %v6178_v42, %v931_v37 }
 0x334   :  { %v4893_v43 = vpop.eup %4892  ;;  %4902 = vrsqrt.f32 %v874_v23  ;;  %v875_v35 = vadd.f32 1e-05, %v843_v31  ;;  %v844_v46 = vmul.f32 0.037037037, %v784_v34 }
 0x335   :  { %v933_v32 = vmul.f32 %v4893_v43, %v6034_v51  ;;  %v787_v25 = vpop.xlane.xlu0 %786  ;;  %v1030_v60 = vpack.c.bf16 %v1002_v10, %v1001_v8  ;;  %v968_v61 = vmul.f32 %v6178_v42, %v932_v0  ;;  %v1003_v22 = vadd.f32 %v6183_v11, %v967_v48 }
 0x336   :  { %v4895_v28 = vpop.eup %4894  ;;  %4904 = vrsqrt.f32 %v875_v35  ;;  %v876_v24 = vadd.f32 1e-05, %v844_v46  ;;  %v845_v14 = vmul.f32 0.037037037, %v787_v25 }
 0x337   :  { %v934_v9 = vmul.f32 %v4895_v28, %v6040_v4  ;;  %v790_v12 = vpop.xlane.xlu1 %789  ;;  %4607 = vmatmul.mubr.msk.bf16.gmra.mrb[4].mxu1 %vm537_vm6, %v1030_v60  ;;  %v1004_v52 = vadd.f32 %v6183_v11, %v968_v61  ;;  %v969_v40 = vmul.f32 %v6178_v42, %v933_v32 }
 0x338   :  { %v4897_v51 = vpop.eup %4896  ;;  %4906 = vrsqrt.f32 %v876_v24  ;;  %v877_v37 = vadd.f32 1e-05, %v845_v14  ;;  %v846_v50 = vmul.f32 0.037037037, %v790_v12 }
 0x339   :  { %v935_v30 = vmul.f32 %v4897_v51, %v6046_v56  ;;  %v793_v54 = vpop.xlane.xlu0 %792  ;;  %v1031_v8 = vpack.c.bf16 %v1004_v52, %v1003_v22  ;;  %v970_v44 = vmul.f32 %v6178_v42, %v934_v9  ;;  %v1005_v23 = vadd.f32 %v6183_v11, %v969_v40 }
 0x33a   :  { %v4899_v4 = vpop.eup %4898  ;;  %4908 = vrsqrt.f32 %v877_v37  ;;  %v878_v31 = vadd.f32 1e-05, %v846_v50  ;;  %v847_v0 = vmul.f32 0.037037037, %v793_v54 }
 0x33b   :  { %v936_v34 = vmul.f32 %v4899_v4, %v6052_v45  ;;  %v796_v10 = vpop.xlane.xlu1 %795  ;;  %4610 = vmatprep.mubr.msk.bf16.mxu1 %vm537_vm6, %v1031_v8  ;;  %v1006_v48 = vadd.f32 %v6183_v11, %v970_v44  ;;  %v971_v43 = vmul.f32 %v6178_v42, %v935_v30 }
 0x33c   :  { %v4901_v56 = vpop.eup %4900  ;;  %4910 = vrsqrt.f32 %v878_v31  ;;  %v879_v35 = vadd.f32 1e-05, %v847_v0  ;;  %v848_v46 = vmul.f32 0.037037037, %v796_v10 }
 0x33d   :  { %v937_v32 = vmul.f32 %v4901_v56, %v6058_v36  ;;  %v799_v25 = vpop.xlane.xlu0 %798  ;;  %v1032_v60 = vpack.c.bf16 %v1006_v48, %v1005_v23  ;;  %v972_v61 = vmul.f32 %v6178_v42, %v936_v34  ;;  %v1007_v22 = vadd.f32 %v6183_v11, %v971_v43 }
 0x33e   :  { %v4903_v45 = vpop.eup %4902  ;;  %4912 = vrsqrt.f32 %v879_v35  ;;  %v880_v28 = vadd.f32 1e-05, %v848_v46  ;;  %v849_v24 = vmul.f32 0.037037037, %v799_v25 }
 0x33f   :  { %v938_v14 = vmul.f32 %v4903_v45, %v6064_v47  ;;  %v802_v9 = vpop.xlane.xlu1 %801  ;;  %4611 = vmatmul.mubr.msk.bf16.gmra.mrb[8].mxu1 %vm537_vm6, %v1032_v60  ;;  %v1008_v12 = vadd.f32 %v6183_v11, %v972_v61  ;;  %v973_v52 = vmul.f32 %v6178_v42, %v937_v32 }
 0x340   :  { %v4905_v36 = vpop.eup %4904  ;;  %4914 = vrsqrt.f32 %v880_v28  ;;  %v881_v40 = vadd.f32 1e-05, %v849_v24  ;;  %v850_v51 = vmul.f32 0.037037037, %v802_v9 }
 0x341   :  { %v939_v37 = vmul.f32 %v4905_v36, %v6070_v55  ;;  %v805_v50 = vpop.xlane.xlu0 %804  ;;  %v1033_v30 = vpack.c.bf16 %v1008_v12, %v1007_v22  ;;  %v974_v54 = vmul.f32 %v6178_v42, %v938_v14  ;;  %v1009_v8 = vadd.f32 %v6183_v11, %v973_v52 }
 0x342   :  { %v4907_v47 = vpop.eup %4906  ;;  %4916 = vrsqrt.f32 %v881_v40  ;;  %v882_v44 = vadd.f32 1e-05, %v850_v51  ;;  %v851_v23 = vmul.f32 0.037037037, %v805_v50 }
 0x343   :  { %v940_v4 = vmul.f32 %v4907_v47, %v6076_v57  ;;  %v808_v31 = vpop.xlane.xlu1 %807  ;;  %4614 = vmatprep.mubr.msk.bf16.mxu1 %vm537_vm6, %v1033_v30  ;;  %v1010_v0 = vadd.f32 %v6183_v11, %v974_v54  ;;  %v975_v34 = vmul.f32 %v6178_v42, %v939_v37 }
 0x344   :  { %v4909_v55 = vpop.eup %4908  ;;  %4918 = vrsqrt.f32 %v882_v44  ;;  %v883_v10 = vadd.f32 1e-05, %v851_v23  ;;  %v852_v48 = vmul.f32 0.037037037, %v808_v31 }
 0x345   :  { %v941_v43 = vmul.f32 %v4909_v55, %v6082_v29  ;;  %v811_v56 = vpop.xlane.xlu0 %810  ;;  %v1034_v35 = vpack.c.bf16 %v1010_v0, %v1009_v8  ;;  %v976_v46 = vmul.f32 %v6178_v42, %v940_v4  ;;  %v1011_v32 = vadd.f32 %v6183_v11, %v975_v34 }
 0x346   :  { %v4911_v57 = vpop.eup %4910  ;;  %4920 = vrsqrt.f32 %v883_v10  ;;  %v884_v25 = vadd.f32 1e-05, %v852_v48  ;;  %v853_v60 = vmul.f32 0.037037037, %v811_v56 }
 0x347   :  { %v942_v61 = vmul.f32 %v4911_v57, %v6088_v59  ;;  %v814_v22 = vpop.xlane.xlu1 %813  ;;  %4615 = vmatmul.mubr.msk.bf16.gmra.mrb[12].mxu1 %vm537_vm6, %v1034_v35  ;;  %v1012_v45 = vadd.f32 %v6183_v11, %v976_v46  ;;  %v977_v28 = vmul.f32 %v6178_v42, %v941_v43 }
 0x348   :  { %v4913_v29 = vpop.eup %4912  ;;  %4922 = vrsqrt.f32 %v884_v25  ;;  %v885_v24 = vadd.f32 1e-05, %v853_v60  ;;  %v854_v14 = vmul.f32 0.037037037, %v814_v22 }
 0x349   :  { %v943_v9 = vmul.f32 %v4913_v29, %v6094_v62  ;;  %v817_v12 = vpop.xlane.xlu0 %816  ;;  %v1035_v52 = vpack.c.bf16 %v1012_v45, %v1011_v32  ;;  %v978_v36 = vmul.f32 %v6178_v42, %v942_v61  ;;  %v1013_v40 = vadd.f32 %v6183_v11, %v977_v28 }
 0x34a   :  { %v4915_v59 = vpop.eup %4914  ;;  %4924 = vrsqrt.f32 %v885_v24  ;;  %v886_v51 = vadd.f32 1e-05, %v854_v14  ;;  %v855_v37 = vmul.f32 0.037037037, %v817_v12 }
 0x34b   :  { %v944_v50 = vmul.f32 %v4915_v59, %v6100_v53  ;;  %v820_v30 = vpop.xlane.xlu1 %819  ;;  %4618 = vmatprep.mubr.msk.bf16.mxu1 %vm537_vm6, %v1035_v52  ;;  %v1014_v54 = vadd.f32 %v6183_v11, %v978_v36  ;;  %v979_v8 = vmul.f32 %v6178_v42, %v943_v9 }
 0x34c   :  { %v4917_v62 = vpop.eup %4916  ;;  %4926 = vrsqrt.f32 %v886_v51  ;;  %v887_v47 = vadd.f32 1e-05, %v855_v37  ;;  %v856_v44 = vmul.f32 0.037037037, %v820_v30 }
 0x34d   :  { %v945_v23 = vmul.f32 %v4917_v62, %v6109_v26  ;;  %v823_v4 = vpop.xlane.xlu0 %822  ;;  %v1036_v31 = vpack.c.bf16 %v1014_v54, %v1013_v40  ;;  %v980_v0 = vmul.f32 %v6178_v42, %v944_v50  ;;  %v1015_v34 = vadd.f32 %v6183_v11, %v979_v8 }
 0x34e   :  { %v4919_v53 = vpop.eup %4918  ;;  %4928 = vrsqrt.f32 %v887_v47  ;;  %v888_v55 = vadd.f32 1e-05, %v856_v44  ;;  %v857_v10 = vmul.f32 0.037037037, %v823_v4 }
 0x34f   :  { %v946_v48 = vmul.f32 %v4919_v53, %v6116_v39  ;;  %v826_v43 = vpop.xlane.xlu1 %825  ;;  %4619 = vmatmul.mubr.msk.bf16.gmra.mrb[16].mxu1 %vm537_vm6, %v1036_v31  ;;  %v1016_v56 = vadd.f32 %v6183_v11, %v980_v0  ;;  %v981_v35 = vmul.f32 %v6178_v42, %v945_v23 }
 0x350   :  { %v4921_v26 = vpop.eup %4920  ;;  %4930 = vrsqrt.f32 %v888_v55  ;;  %v889_v46 = vadd.f32 1e-05, %v857_v10  ;;  %v858_v32 = vmul.f32 0.037037037, %v826_v43 }
 0x351   :  { %v947_v57 = vmul.f32 %v4921_v26, %v6122_v13  ;;  %v1037_v25 = vpack.c.bf16 %v1016_v56, %v1015_v34  ;;  %v982_v60 = vmul.f32 %v6178_v42, %v946_v48  ;;  %v1017_v61 = vadd.f32 %v6183_v11, %v981_v35 }
 0x352   :  { %v4923_v22 = vpop.eup %4922  ;;  %4932 = vrsqrt.f32 %v889_v46  ;;  %v890_v39 = vadd.f32 1e-05, %v858_v32 }
 0x353   :  { %v948_v45 = vmul.f32 %v4923_v22, %v6128_v41  ;;  %4622 = vmatprep.mubr.msk.bf16.mxu1 %vm537_vm6, %v1037_v25  ;;  %v1018_v28 = vadd.f32 %v6183_v11, %v982_v60  ;;  %v983_v29 = vmul.f32 %v6178_v42, %v947_v57 }
 0x354   :  { %v4925_v24 = vpop.eup %4924  ;;  %4934 = vrsqrt.f32 %v890_v39 }
 0x355   :  { %v949_v13 = vmul.f32 %v4925_v24, %v6134_v15  ;;  %v1038_v14 = vpack.c.bf16 %v1018_v28, %v1017_v61  ;;  %v984_v9 = vmul.f32 %v6178_v42, %v948_v45  ;;  %v1019_v12 = vadd.f32 %v6183_v11, %v983_v29 }
 0x356   :  { %v4927_v52 = vpop.eup %4926 }
 0x357   :  { %v950_v36 = vmul.f32 %v4927_v52, %v6140_v63  ;;  %4623 = vmatmul.mubr.msk.bf16.gmra.mrb[20].mxu1 %vm537_vm6, %v1038_v14  ;;  %v1020_v41 = vadd.f32 %v6183_v11, %v984_v9  ;;  %v985_v40 = vmul.f32 %v6178_v42, %v949_v13 }
 0x358   :  { %v4929_v59 = vpop.eup %4928 }
 0x359   :  { %v951_v51 = vmul.f32 %v4929_v59, %v6146_v49  ;;  %v1039_v37 = vpack.c.bf16 %v1020_v41, %v1019_v12  ;;  %v986_v15 = vmul.f32 %v6178_v42, %v950_v36  ;;  %v1021_v50 = vadd.f32 %v6183_v11, %v985_v40 }
 0x35a   :  { %v4931_v30 = vpop.eup %4930 }
 0x35b   :  { %v952_v54 = vmul.f32 %v4931_v30, %v6152_v38  ;;  %4626 = vmatprep.mubr.msk.bf16.mxu1 %vm537_vm6, %v1039_v37  ;;  %v1022_v63 = vadd.f32 %v6183_v11, %v986_v15  ;;  %v987_v8 = vmul.f32 %v6178_v42, %v951_v51 }
 0x35c   :  { %v4933_v62 = vpop.eup %4932 }
 0x35d   :  { %v953_v47 = vmul.f32 %v4933_v62, %v6158_v27  ;;  %v1040_v44 = vpack.c.bf16 %v1022_v63, %v1021_v50  ;;  %v988_v49 = vmul.f32 %v6178_v42, %v952_v54  ;;  %v1023_v23 = vadd.f32 %v6183_v11, %v987_v8 }
 0x35e   :  { %v4935_v4 = vpop.eup %4934 }
 0x35f   :  { %v954_v31 = vmul.f32 %v4935_v4, %v6164_v58  ;;  %4627 = vmatmul.mubr.msk.bf16.gmra.mrb[24].mxu1 %vm537_vm6, %v1040_v44  ;;  %v1024_v38 = vadd.f32 %v6183_v11, %v988_v49  ;;  %v989_v0 = vmul.f32 %v6178_v42, %v953_v47 }
 0x361   :  { %v1041_v34 = vpack.c.bf16 %v1024_v38, %v1023_v23  ;;  %v990_v53 = vmul.f32 %v6178_v42, %v954_v31  ;;  %v1025_v55 = vadd.f32 %v6183_v11, %v989_v0 }
 0x363   :  { %4630 = vmatprep.mubr.msk.bf16.mxu1 %vm537_vm6, %v1041_v34  ;;  %v1026_v27 = vadd.f32 %v6183_v11, %v990_v53 }
 0x365   :  { %v1042_v10 = vpack.c.bf16 %v1026_v27, %v1025_v55 }
 0x367   :  { %4631 = vmatmul.mubr.msk.bf16.gmra.mrb[28].mxu1 %vm537_vm6, %v1042_v10 }
 0x402   :  { %v4604_v48 = vpop.f32.mrb[0].mxu1 }
 0x403   :  { %v1147_v58 = vpop.f32.mrb[1].mxu1 }
 0x404   :  { %v4605_v43 = vpop.f32.mrb[2].mxu1 }
 0x405   :  { %v1275_v56 = vpack.c.bf16 %v4605_v43, %v4604_v48  ;;  %v1150_v35 = vpop.f32.mrb[3].mxu1 }
 0x406   :  { %v1274_v26 = vpack.c.bf16 %v1150_v35, %v1147_v58 }
 0x407   :  { %1291 = vst.msk [vmem:[#allocation2 + $0x8] sm:$0xff] %vm537_vm6, %v1275_v56  ;;  %1324 = vrot.lane.b32.xlu1 %v1275_v56, %s5439_s8 }
 0x408   :  { %1290 = vst.msk [vmem:[#allocation2] sm:$0xff] %vm537_vm6, %v1274_v26  ;;  %1322 = vrot.lane.b32.xlu0 %v1274_v26, %s5439_s8 }
 0x40a   :  { %v4608_v42 = vpop.f32.mrb[4].mxu1 }
 0x40b   :  { %1389 = vrot.lane.b32.xlu1 %v1275_v56, %s5440_s20  ;;  %v1163_v11 = vpop.f32.mrb[5].mxu1 }
 0x40c   :  { %1387 = vrot.lane.b32.xlu0 %v1274_v26, %s5440_s20  ;;  %v4609_v46 = vpop.f32.mrb[6].mxu1 }
 0x40d   :  { %v1277_v32 = vpack.c.bf16 %v4609_v46, %v4608_v42  ;;  %v1166_v57 = vpop.f32.mrb[7].mxu1 }
 0x40e   :  { %v1276_v25 = vpack.c.bf16 %v1166_v57, %v1163_v11 }
 0x40f   :  { %1293 = vst.msk [vmem:[#allocation2 + $0x18] sm:$0xff] %vm537_vm6, %v1277_v32  ;;  %1328 = vrot.lane.b32.xlu1 %v1277_v32, %s5439_s8 }
 0x410   :  { %1292 = vst.msk [vmem:[#allocation2 + $0x10] sm:$0xff] %vm537_vm6, %v1276_v25  ;;  %1391 = vrot.lane.b32.xlu0 %v1276_v25, %s5440_s20 }
 0x412   :  { %v4612_v60 = vpop.f32.mrb[8].mxu1 }
 0x413   :  { %1393 = vrot.lane.b32.xlu1 %v1277_v32, %s5440_s20  ;;  %v1179_v61 = vpop.f32.mrb[9].mxu1 }
 0x414   :  { %v4613_v22 = vpop.f32.mrb[10].mxu1 }
 0x415   :  { %v1279_v39 = vpack.c.bf16 %v4613_v22, %v4612_v60  ;;  %v1182_v45 = vpop.f32.mrb[11].mxu1 }
 0x416   :  { %v1278_v28 = vpack.c.bf16 %v1182_v45, %v1179_v61 }
 0x417   :  { %1295 = vst.msk [vmem:[#allocation2 + $0x28] sm:$0xff] %vm537_vm6, %v1279_v39  ;;  %1326 = vrot.lane.b32.xlu1 %v1276_v25, %s5439_s8 }
 0x418   :  { %1294 = vst.msk [vmem:[#allocation2 + $0x20] sm:$0xff] %vm537_vm6, %v1278_v28  ;;  %1330 = vrot.lane.b32.xlu0 %v1278_v28, %s5439_s8 }
 0x41a   :  { %v4616_v29 = vpop.f32.mrb[12].mxu1 }
 0x41b   :  { %1332 = vrot.lane.b32.xlu1 %v1279_v39, %s5439_s8  ;;  %v1195_v24 = vpop.f32.mrb[13].mxu1 }
 0x41c   :  { %1395 = vrot.lane.b32.xlu0 %v1278_v28, %s5440_s20  ;;  %v4617_v13 = vpop.f32.mrb[14].mxu1 }
 0x41d   :  { %v1281_v14 = vpack.c.bf16 %v4617_v13, %v4616_v29  ;;  %v1198_v9 = vpop.f32.mrb[15].mxu1 }
 0x41e   :  { %v1280_v12 = vpack.c.bf16 %v1198_v9, %v1195_v24 }
 0x41f   :  { %1297 = vst.msk [vmem:[#allocation2 + $0x38] sm:$0xff] %vm537_vm6, %v1281_v14  ;;  %1397 = vrot.lane.b32.xlu1 %v1279_v39, %s5440_s20 }
 0x420   :  { %1296 = vst.msk [vmem:[#allocation2 + $0x30] sm:$0xff] %vm537_vm6, %v1280_v12  ;;  %1334 = vrot.lane.b32.xlu0 %v1280_v12, %s5439_s8 }
 0x422   :  { %v4620_v52 = vpop.f32.mrb[16].mxu1 }
 0x423   :  { %1336 = vrot.lane.b32.xlu1 %v1281_v14, %s5439_s8  ;;  %v1211_v36 = vpop.f32.mrb[17].mxu1 }
 0x424   :  { %1399 = vrot.lane.b32.xlu0 %v1280_v12, %s5440_s20  ;;  %v4621_v41 = vpop.f32.mrb[18].mxu1 }
 0x425   :  { %v1283_v40 = vpack.c.bf16 %v4621_v41, %v4620_v52  ;;  %v1214_v59 = vpop.f32.mrb[19].mxu1 }
 0x426   :  { %v1282_v51 = vpack.c.bf16 %v1214_v59, %v1211_v36 }
 0x427   :  { %1299 = vst.msk [vmem:[#allocation2 + $0x48] sm:$0xff] %vm537_vm6, %v1283_v40  ;;  %1401 = vrot.lane.b32.xlu1 %v1281_v14, %s5440_s20 }
 0x428   :  { %1298 = vst.msk [vmem:[#allocation2 + $0x40] sm:$0xff] %vm537_vm6, %v1282_v51  ;;  %1338 = vrot.lane.b32.xlu0 %v1282_v51, %s5439_s8 }
 0x42a   :  { %v4624_v37 = vpop.f32.mrb[20].mxu1 }
 0x42b   :  { %1340 = vrot.lane.b32.xlu1 %v1283_v40, %s5439_s8  ;;  %v1227_v15 = vpop.f32.mrb[21].mxu1 }
 0x42c   :  { %1403 = vrot.lane.b32.xlu0 %v1282_v51, %s5440_s20  ;;  %v4625_v50 = vpop.f32.mrb[22].mxu1 }
 0x42d   :  { %v1285_v30 = vpack.c.bf16 %v4625_v50, %v4624_v37  ;;  %v1230_v54 = vpop.f32.mrb[23].mxu1 }
 0x42e   :  { %v1284_v63 = vpack.c.bf16 %v1230_v54, %v1227_v15 }
 0x42f   :  { %1301 = vst.msk [vmem:[#allocation2 + $0x58] sm:$0xff] %vm537_vm6, %v1285_v30  ;;  %1405 = vrot.lane.b32.xlu1 %v1283_v40, %s5440_s20 }
 0x430   :  { %1300 = vst.msk [vmem:[#allocation2 + $0x50] sm:$0xff] %vm537_vm6, %v1284_v63  ;;  %1342 = vrot.lane.b32.xlu0 %v1284_v63, %s5439_s8 }
 0x432   :  { %v4628_v8 = vpop.f32.mrb[24].mxu1 }
 0x433   :  { %1344 = vrot.lane.b32.xlu1 %v1285_v30, %s5439_s8  ;;  %v1243_v62 = vpop.f32.mrb[25].mxu1 }
 0x434   :  { %1407 = vrot.lane.b32.xlu0 %v1284_v63, %s5440_s20  ;;  %v4629_v47 = vpop.f32.mrb[26].mxu1 }
 0x435   :  { %v1287_v44 = vpack.c.bf16 %v4629_v47, %v4628_v8  ;;  %v1246_v49 = vpop.f32.mrb[27].mxu1 }
 0x436   :  { %v1286_v23 = vpack.c.bf16 %v1246_v49, %v1243_v62 }
 0x437   :  { %1303 = vst.msk [vmem:[#allocation2 + $0x68] sm:$0xff] %vm537_vm6, %v1287_v44  ;;  %1409 = vrot.lane.b32.xlu1 %v1285_v30, %s5440_s20 }
 0x438   :  { %1302 = vst.msk [vmem:[#allocation2 + $0x60] sm:$0xff] %vm537_vm6, %v1286_v23  ;;  %1346 = vrot.lane.b32.xlu0 %v1286_v23, %s5439_s8 }
 0x43a   :  { %v4632_v4 = vpop.f32.mrb[28].mxu1 }
 0x43b   :  { %1348 = vrot.lane.b32.xlu1 %v1287_v44, %s5439_s8  ;;  %v1259_v31 = vpop.f32.mrb[29].mxu1 }
 0x43c   :  { %1411 = vrot.lane.b32.xlu0 %v1286_v23, %s5440_s20  ;;  %v4633_v38 = vpop.f32.mrb[30].mxu1 }
 0x43d   :  { %v1289_v0 = vpack.c.bf16 %v4633_v38, %v4632_v4  ;;  %v1262_v34 = vpop.f32.mrb[31].mxu1 }
 0x43e   :  { %v1288_v53 = vpack.c.bf16 %v1262_v34, %v1259_v31 }
 0x43f   :  { %1305 = vst.msk [vmem:[#allocation2 + $0x78] sm:$0xff] %vm537_vm6, %v1289_v0  ;;  %1413 = vrot.lane.b32.xlu1 %v1287_v44, %s5440_s20 }
 0x440   :  { %1304 = vst.msk [vmem:[#allocation2 + $0x70] sm:$0xff] %vm537_vm6, %v1288_v53  ;;  %1350 = vrot.lane.b32.xlu0 %v1288_v53, %s5439_s8 }
 0x443   :  { %1352 = vrot.lane.b32.xlu1 %v1289_v0, %s5439_s8 }
 0x444   :  { %1415 = vrot.lane.b32.xlu0 %v1288_v53, %s5440_s20 }
 0x447   :  { %1417 = vrot.lane.b32.xlu1 %v1289_v0, %s5440_s20 }
 0x479   :  { %v1325_v55 = vpop.permute.xlu1 %1324 }
 0x47a   :  { %1372 = vst.msk [vmem:[#allocation2 + $0x88] sm:$0xff] %vm537_vm6, %v1325_v55  ;;  %v1323_v27 = vpop.permute.xlu0 %1322 }
 0x47b   :  { %1371 = vst.msk [vmem:[#allocation2 + $0x80] sm:$0xff] %vm537_vm6, %v1323_v27 }
 0x47d   :  { %v1390_v10 = vpop.permute.xlu1 %1389 }
 0x47e   :  { %1437 = vst.msk [vmem:[#allocation2 + $0x108] sm:$0xff] %vm537_vm6, %v1390_v10  ;;  %v1388_v48 = vpop.permute.xlu0 %1387 }
 0x47f   :  { %1436 = vst.msk [vmem:[#allocation2 + $0x100] sm:$0xff] %vm537_vm6, %v1388_v48 }
 0x481   :  { %v1329_v58 = vpop.permute.xlu1 %1328 }
 0x482   :  { %1374 = vst.msk [vmem:[#allocation2 + $0x98] sm:$0xff] %vm537_vm6, %v1329_v58  ;;  %v1392_v43 = vpop.permute.xlu0 %1391 }
 0x483   :  { %1438 = vst.msk [vmem:[#allocation2 + $0x110] sm:$0xff] %vm537_vm6, %v1392_v43 }
 0x485   :  { %v1394_v56 = vpop.permute.xlu1 %1393 }
 0x486   :  { %1439 = vst.msk [vmem:[#allocation2 + $0x118] sm:$0xff] %vm537_vm6, %v1394_v56 }
 0x489   :  { %v1327_v35 = vpop.permute.xlu1 %1326 }
 0x48a   :  { %1373 = vst.msk [vmem:[#allocation2 + $0x90] sm:$0xff] %vm537_vm6, %v1327_v35  ;;  %v1331_v26 = vpop.permute.xlu0 %1330 }
 0x48b   :  { %1375 = vst.msk [vmem:[#allocation2 + $0xa0] sm:$0xff] %vm537_vm6, %v1331_v26 }
 0x48d   :  { %v1333_v42 = vpop.permute.xlu1 %1332 }
 0x48e   :  { %1376 = vst.msk [vmem:[#allocation2 + $0xa8] sm:$0xff] %vm537_vm6, %v1333_v42  ;;  %v1396_v11 = vpop.permute.xlu0 %1395 }
 0x48f   :  { %1440 = vst.msk [vmem:[#allocation2 + $0x120] sm:$0xff] %vm537_vm6, %v1396_v11 }
 0x491   :  { %v1398_v46 = vpop.permute.xlu1 %1397 }
 0x492   :  { %1441 = vst.msk [vmem:[#allocation2 + $0x128] sm:$0xff] %vm537_vm6, %v1398_v46  ;;  %v1335_v32 = vpop.permute.xlu0 %1334 }
 0x493   :  { %1377 = vst.msk [vmem:[#allocation2 + $0xb0] sm:$0xff] %vm537_vm6, %v1335_v32 }
 0x495   :  { %v1337_v57 = vpop.permute.xlu1 %1336 }
 0x496   :  { %1378 = vst.msk [vmem:[#allocation2 + $0xb8] sm:$0xff] %vm537_vm6, %v1337_v57  ;;  %v1400_v25 = vpop.permute.xlu0 %1399 }
 0x497   :  { %1442 = vst.msk [vmem:[#allocation2 + $0x130] sm:$0xff] %vm537_vm6, %v1400_v25 }
 0x499   :  { %v1402_v60 = vpop.permute.xlu1 %1401 }
 0x49a   :  { %1443 = vst.msk [vmem:[#allocation2 + $0x138] sm:$0xff] %vm537_vm6, %v1402_v60  ;;  %v1339_v61 = vpop.permute.xlu0 %1338 }
 0x49b   :  { %1379 = vst.msk [vmem:[#allocation2 + $0xc0] sm:$0xff] %vm537_vm6, %v1339_v61 }
 0x49d   :  { %v1341_v22 = vpop.permute.xlu1 %1340 }
 0x49e   :  { %1380 = vst.msk [vmem:[#allocation2 + $0xc8] sm:$0xff] %vm537_vm6, %v1341_v22  ;;  %v1404_v39 = vpop.permute.xlu0 %1403 }
 0x49f   :  { %1444 = vst.msk [vmem:[#allocation2 + $0x140] sm:$0xff] %vm537_vm6, %v1404_v39 }
 0x4a1   :  { %v1406_v45 = vpop.permute.xlu1 %1405 }
 0x4a2   :  { %1445 = vst.msk [vmem:[#allocation2 + $0x148] sm:$0xff] %vm537_vm6, %v1406_v45  ;;  %v1343_v28 = vpop.permute.xlu0 %1342 }
 0x4a3   :  { %1381 = vst.msk [vmem:[#allocation2 + $0xd0] sm:$0xff] %vm537_vm6, %v1343_v28 }
 0x4a5   :  { %v1345_v29 = vpop.permute.xlu1 %1344 }
 0x4a6   :  { %1382 = vst.msk [vmem:[#allocation2 + $0xd8] sm:$0xff] %vm537_vm6, %v1345_v29  ;;  %v1408_v24 = vpop.permute.xlu0 %1407 }
 0x4a7   :  { %1446 = vst.msk [vmem:[#allocation2 + $0x150] sm:$0xff] %vm537_vm6, %v1408_v24 }
 0x4a9   :  { %v1410_v13 = vpop.permute.xlu1 %1409 }
 0x4aa   :  { %1447 = vst.msk [vmem:[#allocation2 + $0x158] sm:$0xff] %vm537_vm6, %v1410_v13  ;;  %v1347_v14 = vpop.permute.xlu0 %1346 }
 0x4ab   :  { %1383 = vst.msk [vmem:[#allocation2 + $0xe0] sm:$0xff] %vm537_vm6, %v1347_v14 }
 0x4ad   :  { %v1349_v9 = vpop.permute.xlu1 %1348 }
 0x4ae   :  { %1384 = vst.msk [vmem:[#allocation2 + $0xe8] sm:$0xff] %vm537_vm6, %v1349_v9  ;;  %v1412_v12 = vpop.permute.xlu0 %1411 }
 0x4af   :  { %1448 = vst.msk [vmem:[#allocation2 + $0x160] sm:$0xff] %vm537_vm6, %v1412_v12 }
 0x4b1   :  { %v1414_v52 = vpop.permute.xlu1 %1413 }
 0x4b2   :  { %1449 = vst.msk [vmem:[#allocation2 + $0x168] sm:$0xff] %vm537_vm6, %v1414_v52  ;;  %v1351_v36 = vpop.permute.xlu0 %1350 }
 0x4b3   :  { %1385 = vst.msk [vmem:[#allocation2 + $0xf0] sm:$0xff] %vm537_vm6, %v1351_v36 }
 0x4b5   :  { %v1353_v41 = vpop.permute.xlu1 %1352 }
 0x4b6   :  { %1386 = vst.msk [vmem:[#allocation2 + $0xf8] sm:$0xff] %vm537_vm6, %v1353_v41  ;;  %v1416_v40 = vpop.permute.xlu0 %1415 }
 0x4b7   :  { %1450 = vst.msk [vmem:[#allocation2 + $0x170] sm:$0xff] %vm537_vm6, %v1416_v40 }
 0x4b9   :  { %v1418_v59 = vpop.permute.xlu1 %1417 }
 0x4ba   :  { %1451 = vst.msk [vmem:[#allocation2 + $0x178] sm:$0xff] %vm537_vm6, %v1418_v59 }
 0x4bb LB: > { %s4302_s2 = sshll.u32 %s5422_s22, 7  ;;  %vm8037_vm8 = vcmp.ge.s32.totalorder %v5737_v33, %v5633_v2  ;;  %vm8038_vm3 = vcmp.ge.s32.totalorder %v5640_v5, %v5633_v2  ;;  %vm8039_vm4 = vcmp.ge.s32.totalorder %v5643_v6, %v5633_v2  ;;  %vm8040_vm5 = vcmp.ge.s32.totalorder %v5646_v7, %v5633_v2  ;;  %s1482_s22 = sadd.s32 1, %s5422_s22   ;;  %s5422_s22 = sphi %s6377_s22, %s1482_s22  }
 0x4bc   : > { %s1484_s29 = sshra.s32 %s4302_s2, 4  ;;  %s6589_s13 = scalar_lea.vmem [#allocation3], %s4302_s2 }
 0x4bd   : > { %s4303_s11 = sshll.u32 %s1484_s29, 3  ;;  %p1479_p2 = scmp.ge.s32.totalorder %s1482_s22, 2  }
 0x4be   : > { %s6385_s12 = scalar_lea.vmem [#allocation2], %s4303_s11  ;;  %s5441_s1 = smov (%p1479_p2), [#allocation19]  }
 0x4bf   :  { %s4214_s10 = sshll.u32 (%p1479_p2), %s5441_s1, 4  ;;  %s4215_s10 = int_to_ptr.vmem [resolvable:$true] %s4214_s10 }
 0x4c0   :  { %s5382_s14 = scalar_lea.vmem (%p1479_p2), %s4215_s10, 2304  ;;  %p5387_p4 = scmp.lt.s32.totalorder (%p1479_p2), %s4215_s10, %s4215_s10 }
 0x4c1   : > { %v4305_v51 = vld [vmem:[%s6385_s12 + $0x80] sm:$0xff]  ;;  %v4306_v37 = vld [vmem:[%s6385_s12 + $0x88] sm:$0xff]  ;;  %v4307_v54 = vld [vmem:[%s6385_s12 + $0x90] sm:$0xff]  ;;  %p5383_p3 = scmp.ne.s32.totalorder (%p1479_p2), %s4215_s10, %s5382_s14  ;;  %p5388_p5 = scmp.lt.s32.totalorder (%p1479_p2), %s5382_s14, %s5382_s14 }
 0x4c2   : > { %4821 = vmatprep.subr.msk.bf16.mxu0 %vm537_vm6, %v4305_v51  ;;  %v1543_v15 = vsel %vm537_vm6, %v4305_v51, 0  ;;  %v1488_v50 = vld [vmem:[%s6385_s12] sm:$0xff]  ;;  %v1546_v30 = vsel %vm537_vm6, %v4306_v37, 0  ;;  %v1549_v63 = vsel %vm537_vm6, %v4307_v54, 0  ;;  %v4308_v8 = vld [vmem:[%s6385_s12 + $0x98] sm:$0xff]  ;;  %v4310_v49 = vld [vmem:[%s6385_s12 + $0xa8] sm:$0xff] }
 0x4c3   : > { %4635 = vmatpush3.bf16.xpose.msra.mxu0 %v1543_v15  ;;  %4650 = vmatprep.mubr.msk.bf16.mxu0 %vm537_vm6, %v1488_v50  ;;  %v1552_v62 = vsel %vm537_vm6, %v4308_v8, 0  ;;  %v4309_v47 = vld [vmem:[%s6385_s12 + $0xa0] sm:$0xff]  ;;  %v1558_v23 = vsel %vm537_vm6, %v4310_v49, 0  ;;  %v4311_v4 = vld [vmem:[%s6385_s12 + $0xb0] sm:$0xff]  ;;  %v4312_v38 = vld [vmem:[%s6385_s12 + $0xb8] sm:$0xff]  ;;  %p5389_p6 = por (%p1479_p2), %p5388_p5, %p5387_p4 }
 0x4c4   : > { %4822 = vmatprep.subr.msk.bf16.mxu0 %vm537_vm6, %v4306_v37  ;;  %v1555_v44 = vsel %vm537_vm6, %v4309_v47, 0  ;;  %v1561_v31 = vsel %vm537_vm6, %v4311_v4, 0  ;;  %v1564_v0 = vsel %vm537_vm6, %v4312_v38, 0  ;;  %v1489_v34 = vld [vmem:[%s6385_s12 + $0x8] sm:$0xff]  ;;  %v1490_v53 = vld [vmem:[%s6385_s12 + $0x10] sm:$0xff]  ;;  %v1491_v55 = vld [vmem:[%s6385_s12 + $0x18] sm:$0xff] }
 0x4c5   : > { %v1492_v27 = vld [vmem:[%s6385_s12 + $0x20] sm:$0xff]  ;;  %v1493_v10 = vld [vmem:[%s6385_s12 + $0x28] sm:$0xff]  ;;  %v1494_v48 = vld [vmem:[%s6385_s12 + $0x30] sm:$0xff]  ;;  %p5390_p7 = pnand (%p1479_p2), %p5389_p6, %p5383_p3 }
 0x4c6   : > { %v1495_v58 = vld [vmem:[%s6385_s12 + $0x38] sm:$0xff] }
 0x4c7   : > { %v8041_v51 = vld [vmem:[#allocation26_spill] sm:$0xff]  ;;  %v8043_v50 = vld [vmem:[#allocation27_spill] sm:$0xff] }
 0x4c8   : > { %vm8042_vm2 = vcmp.ge.s32.totalorder %v8041_v51, %v5633_v2  ;;  %vm8044_vm9 = vcmp.ge.s32.totalorder %v8043_v50, %v5633_v2 }
 0x4cb   : > { %4637 = vmatpush3.bf16.xpose.msra.mxu0 %v1546_v30 }
 0x4cc   : > { %4823 = vmatprep.subr.msk.bf16.mxu0 %vm537_vm6, %v4307_v54  ;;  %v8045_v54 = vld [vmem:[#allocation28_spill] sm:$0xff] }
 0x4d3   : > { %4639 = vmatpush3.bf16.xpose.msra.mxu0 %v1549_v63 }
 0x4d4   : > { %4824 = vmatprep.subr.msk.bf16.mxu0 %vm537_vm6, %v4308_v8  ;;  %v8047_v8 = vld [vmem:[#allocation29_spill] sm:$0xff] }
 0x4db   : > { %4641 = vmatpush3.bf16.xpose.msra.mxu0 %v1552_v62 }
 0x4dc   : > { %4825 = vmatprep.subr.msk.bf16.mxu0 %vm537_vm6, %v4309_v47  ;;  %v4314_v47 = vld [vmem:[%s6385_s12 + $0x100] sm:$0xff] }
 0x4dd   : > { %4666 = vmatprep.subr.bf16.mxu1 %v4314_v47 }
 0x4de   : > { %4667 = vmatpush3.bf16.msra.mxu1 %v4314_v47 }
 0x4e3   : > { %4643 = vmatpush3.bf16.xpose.msra.mxu0 %v1555_v44  ;;  %v4315_v44 = vld [vmem:[%s6385_s12 + $0x108] sm:$0xff] }
 0x4e4   : > { %4826 = vmatprep.subr.msk.bf16.mxu0 %vm537_vm6, %v4310_v49  ;;  %4668 = vmatprep.subr.bf16.mxu1 %v4315_v44  ;;  %v4316_v49 = vld [vmem:[%s6385_s12 + $0x110] sm:$0xff] }
 0x4e5   : > { %4669 = vmatpush3.bf16.msra.mxu1 %v4315_v44 }
 0x4e6   : > { %4670 = vmatprep.subr.bf16.mxu1 %v4316_v49 }
 0x4e9   : > { %4671 = vmatpush3.bf16.msra.mxu1 %v4316_v49 }
 0x4eb   : > { %4645 = vmatpush3.bf16.xpose.msra.mxu0 %v1558_v23 }
 0x4ec   : > { %4827 = vmatprep.subr.msk.bf16.mxu0 %vm537_vm6, %v4311_v4 }
 0x4f3   : > { %4647 = vmatpush3.bf16.xpose.msra.mxu0 %v1561_v31 }
 0x4f4   : > { %4828 = vmatprep.subr.msk.bf16.mxu0 %vm537_vm6, %v4312_v38 }
 0x4fb   : > { %4649 = vmatpush3.bf16.xpose.msra.mxu0 %v1564_v0 }
 0x502   : > { %4651 = vmatmul.mubr.msk.bf16.vlgmr.msra.gmra.mrb[0].mxu0 %vm537_vm6, %v1489_v34 }
 0x503   : > { %4654 = vmatprep.mubr.msk.bf16.mxu0 %vm537_vm6, %v1490_v53 }
 0x50a   : > { %4655 = vmatmul.mubr.msk.bf16.gmra.mrb[4].mxu0 %vm537_vm6, %v1491_v55 }
 0x50b   : > { %4658 = vmatprep.mubr.msk.bf16.mxu0 %vm537_vm6, %v1492_v27 }
 0x512   : > { %4659 = vmatmul.mubr.msk.bf16.gmra.mrb[8].mxu0 %vm537_vm6, %v1493_v10 }
 0x513   : > { %4662 = vmatprep.mubr.msk.bf16.mxu0 %vm537_vm6, %v1494_v48 }
 0x51a   : > { %4663 = vmatmul.mubr.msk.bf16.gmra.mrb[12].mxu0 %vm537_vm6, %v1495_v58 }
 0x5d5   : > { %v4652_v43 = vpop.f32.mrb[0].mxu0 }
 0x5d6   : > { %v1600_v56 = vpop.f32.mrb[1].mxu0  ;;  %v1665_v35 = vsel %vm1463_vm13, %v4652_v43, -1e+30 }
 0x5d7   : > { %1683 = vmax.xlane.f32.xlu1 %v1665_v35  ;;  %v4653_v26 = vpop.f32.mrb[2].mxu0  ;;  %v1663_v42 = vsel %vm1461_vm0, %v1600_v56, -1e+30  ;;  %vm3098_vm0 = vcmask (%p1479_p2), 883712  }
 0x5d8   : > { %1679 = vmax.xlane.f32.xlu0 %v1663_v42  ;;  %v1603_v11 = vpop.f32.mrb[3].mxu0  ;;  %v1666_v46 = vsel %vm1464_vm14, %v4653_v26, -1e+30 }
 0x5d9   : > { %v1664_v32 = vsel %vm1462_vm1, %v1603_v11, -1e+30  ;;  %vm3911_vm1 = vcmask (%p1479_p2), 228352  }
 0x5db   : > { %1685 = vmax.xlane.f32.xlu1 %v1666_v46 }
 0x5dc   : > { %1681 = vmax.xlane.f32.xlu0 %v1664_v32 }
 0x5dd   : > { %v4656_v57 = vpop.f32.mrb[4].mxu0 }
 0x5de   : > { %v1616_v25 = vpop.f32.mrb[5].mxu0  ;;  %v6448_v45 = vsel %vm1467_vm7, %v4656_v57, -1e+30 }
 0x5df   : > { %v4657_v60 = vpop.f32.mrb[6].mxu0  ;;  %v1667_v61 = vsel %vm1465_vm10, %v1616_v25, -1e+30 }
 0x5e0   : > { %1687 = vmax.xlane.f32.xlu0 %v1667_v61  ;;  %v1619_v22 = vpop.f32.mrb[7].mxu0  ;;  %v6454_v29 = vsel %vm1468_vm15, %v4657_v60, -1e+30 }
 0x5e1   : > { %v1668_v39 = vsel %vm1466_vm11, %v1619_v22, -1e+30 }
 0x5e2   : > { %1689 = vmax.xlane.f32.xlu1 %v1668_v39 }
 0x5e4   : > { %1691 = vmax.xlane.f32.xlu0 %v6448_v45 }
 0x5e5   : > { %v4660_v28 = vpop.f32.mrb[8].mxu0 }
 0x5e6   : > { %1693 = vmax.xlane.f32.xlu1 %v6454_v29  ;;  %v1632_v24 = vpop.f32.mrb[9].mxu0  ;;  %v6472_v52 = vsel %vm8039_vm4, %v4660_v28, -1e+30 }
 0x5e7   : > { %v4661_v13 = vpop.f32.mrb[10].mxu0  ;;  %v6460_v14 = vsel %vm8037_vm8, %v1632_v24, -1e+30  ;;  %vm8046_vm8 = vcmp.ge.s32.totalorder %v8045_v54, %v5633_v2 }
 0x5e8   : > { %1695 = vmax.xlane.f32.xlu0 %v6460_v14  ;;  %v1635_v9 = vpop.f32.mrb[11].mxu0  ;;  %v6478_v41 = vsel %vm8040_vm5, %v4661_v13, -1e+30 }
 0x5e9   : > { %v6466_v12 = vsel %vm8038_vm3, %v1635_v9, -1e+30  ;;  %vm8048_vm3 = vcmp.ge.s32.totalorder %v8047_v8, %v5633_v2 }
 0x5ea   : > { %1697 = vmax.xlane.f32.xlu1 %v6466_v12 }
 0x5ec   : > { %1699 = vmax.xlane.f32.xlu0 %v6472_v52 }
 0x5ed   : > { %v4664_v36 = vpop.f32.mrb[12].mxu0 }
 0x5ee   : > { %1701 = vmax.xlane.f32.xlu1 %v6478_v41  ;;  %v1648_v40 = vpop.f32.mrb[13].mxu0  ;;  %v6496_v63 = vsel %vm8046_vm8, %v4664_v36, -1e+30 }
 0x5ef   : > { %v4665_v59 = vpop.f32.mrb[14].mxu0  ;;  %v6484_v37 = vsel %vm8042_vm2, %v1648_v40, -1e+30 }
 0x5f0   : > { %1703 = vmax.xlane.f32.xlu0 %v6484_v37  ;;  %v1651_v15 = vpop.f32.mrb[15].mxu0  ;;  %v6502_v62 = vsel %vm8048_vm3, %v4665_v59, -1e+30 }
 0x5f1   : > { %v6490_v30 = vsel %vm8044_vm9, %v1651_v15, -1e+30 }
 0x5f2   : > { %1705 = vmax.xlane.f32.xlu1 %v6490_v30 }
 0x5f4   : > { %1707 = vmax.xlane.f32.xlu0 %v6496_v63 }
 0x5f6   : > { %1709 = vmax.xlane.f32.xlu1 %v6502_v62 }
 0x664   : > { %v1684_v23 = vpop.xlane.xlu1 %1683 }
 0x665   : > { %v1713_v4 = vsub.f32 %v1665_v35, %v1684_v23  ;;  %v1680_v31 = vpop.xlane.xlu0 %1679 }
 0x666   : > { %v1711_v38 = vsub.f32 %v1663_v42, %v1680_v31 }
 0x667   : > { %v1731_v53 = vmul.f32 1.442695, %v1713_v4 }
 0x668   : > { %v1727_v0 = vmul.f32 1.442695, %v1711_v38  ;;  %v1686_v34 = vpop.xlane.xlu1 %1685 }
 0x669   : > { %v1714_v55 = vsub.f32 %v1666_v46, %v1686_v34  ;;  %v1682_v27 = vpop.xlane.xlu0 %1681  ;;  %v4317_v34 = vld [vmem:[%s6385_s12 + $0x118] sm:$0xff] }
 0x66a   : > { %4936 = vpow2.f32 %v1727_v0  ;;  %v1712_v10 = vsub.f32 %v1664_v32, %v1682_v27  ;;  %4672 = vmatprep.subr.bf16.mxu1 %v4317_v34 }
 0x66b   : > { %4938 = vpow2.f32 %v1731_v53  ;;  %v1733_v58 = vmul.f32 1.442695, %v1714_v55  ;;  %4673 = vmatpush3.bf16.msra.mxu1 %v4317_v34 }
 0x66c   : > { %v1729_v48 = vmul.f32 1.442695, %v1712_v10 }
 0x66d   : > { %v1688_v43 = vpop.xlane.xlu0 %1687 }
 0x66e   : > { %4940 = vpow2.f32 %v1729_v48  ;;  %v1715_v56 = vsub.f32 %v1667_v61, %v1688_v43  ;;  %v4318_v48 = vld [vmem:[%s6385_s12 + $0x120] sm:$0xff]  ;;  %v4319_v43 = vld [vmem:[%s6385_s12 + $0x128] sm:$0xff] }
 0x66f   : > { %v1690_v26 = vpop.xlane.xlu1 %1689  ;;  %4942 = vpow2.f32 %v1733_v58  ;;  %4674 = vmatprep.subr.bf16.mxu1 %v4318_v48 }
 0x670   : > { %v1735_v11 = vmul.f32 1.442695, %v1715_v56  ;;  %v1716_v57 = vsub.f32 %v1668_v39, %v1690_v26  ;;  %4675 = vmatpush3.bf16.msra.mxu1 %v4318_v48 }
 0x671   : > { %v1692_v35 = vpop.xlane.xlu0 %1691  ;;  %4676 = vmatprep.subr.bf16.mxu1 %v4319_v43 }
 0x672   : > { %4944 = vpow2.f32 %v1735_v11  ;;  %v1737_v42 = vmul.f32 1.442695, %v1716_v57  ;;  %v1717_v25 = vsub.f32 %v6448_v45, %v1692_v35  ;;  %v4320_v11 = vld [vmem:[%s6385_s12 + $0x130] sm:$0xff]  ;;  %v4321_v35 = vld [vmem:[%s6385_s12 + $0x138] sm:$0xff] }
 0x673   : > { %v1694_v60 = vpop.xlane.xlu1 %1693 }
 0x674   : > { %v6509_v46 = vpop.eup %4936  ;;  %v1739_v22 = vmul.f32 1.442695, %v1717_v25  ;;  %v1718_v32 = vsub.f32 %v6454_v29, %v1694_v60  ;;  %4946 = vpow2.f32 %v1737_v42  ;;  %4677 = vmatpush3.bf16.msra.mxu1 %v4319_v43 }
 0x675   : > { %v1696_v28 = vpop.xlane.xlu0 %1695  ;;  %1759 = vadd.xlane.f32.xlu0 %v6509_v46  ;;  %v6514_v24 = vpop.eup %4938  ;;  %4678 = vmatprep.subr.bf16.mxu1 %v4320_v11 }
 0x676   : > { %4948 = vpow2.f32 %v1739_v22  ;;  %v1741_v61 = vmul.f32 1.442695, %v1718_v32  ;;  %v1719_v39 = vsub.f32 %v6460_v14, %v1696_v28 }
 0x677   : > { %v1698_v13 = vpop.xlane.xlu1 %1697 }
 0x678   : > { %v6516_v9 = vpop.eup %4940  ;;  %v1743_v45 = vmul.f32 1.442695, %v1719_v39  ;;  %v1720_v36 = vsub.f32 %v6466_v12, %v1698_v13  ;;  %4950 = vpow2.f32 %v1741_v61  ;;  %4679 = vmatpush3.bf16.msra.mxu1 %v4320_v11 }
 0x679   : > { %v1700_v40 = vpop.xlane.xlu0 %1699  ;;  %1763 = vadd.xlane.f32.xlu0 %v6514_v24  ;;  %1761 = vadd.xlane.f32.xlu1 %v6516_v9  ;;  %v6522_v51 = vpop.eup %4942 }
 0x67a   : > { %4952 = vpow2.f32 %v1743_v45  ;;  %v1745_v29 = vmul.f32 1.442695, %v1720_v36  ;;  %v1721_v59 = vsub.f32 %v6472_v52, %v1700_v40  ;;  %4680 = vmatprep.subr.bf16.mxu1 %v4321_v35 }
 0x67b   : > { %v1702_v14 = vpop.xlane.xlu1 %1701 }
 0x67c   : > { %v6524_v15 = vpop.eup %4944  ;;  %v1747_v50 = vmul.f32 1.442695, %v1721_v59  ;;  %v1722_v54 = vsub.f32 %v6478_v41, %v1702_v14  ;;  %4954 = vpow2.f32 %v1745_v29  ;;  %4681 = vmatpush3.bf16.msra.mxu1 %v4321_v35 }
 0x67d   : > { %1767 = vadd.xlane.f32.xlu0 %v6524_v15  ;;  %v1704_v12 = vpop.xlane.xlu0 %1703  ;;  %1765 = vadd.xlane.f32.xlu1 %v6522_v51 }
 0x67e   : > { %4956 = vpow2.f32 %v1747_v50  ;;  %v1749_v8 = vmul.f32 1.442695, %v1722_v54  ;;  %v1723_v47 = vsub.f32 %v6484_v37, %v1704_v12  ;;  %v6530_v52 = vpop.eup %4946 }
 0x67f   : > { %v1706_v44 = vpop.xlane.xlu1 %1705 }
 0x680   : > { %v6532_v49 = vpop.eup %4948  ;;  %v1751_v23 = vmul.f32 1.442695, %v1723_v47  ;;  %v1724_v4 = vsub.f32 %v6490_v30, %v1706_v44  ;;  %4958 = vpow2.f32 %v1749_v8 }
 0x681   : > { %1771 = vadd.xlane.f32.xlu0 %v6532_v49  ;;  %v1708_v41 = vpop.xlane.xlu0 %1707  ;;  %1769 = vadd.xlane.f32.xlu1 %v6530_v52 }
 0x682   : > { %4960 = vpow2.f32 %v1751_v23  ;;  %v1753_v31 = vmul.f32 1.442695, %v1724_v4  ;;  %v1725_v38 = vsub.f32 %v6496_v63, %v1708_v41  ;;  %v6538_v37 = vpop.eup %4950 }
 0x683   : > { %v1710_v0 = vpop.xlane.xlu1 %1709 }
 0x684   : > { %v6541_v53 = vpop.eup %4952  ;;  %v1755_v55 = vmul.f32 1.442695, %v1725_v38  ;;  %v1726_v30 = vsub.f32 %v6502_v62, %v1710_v0  ;;  %4962 = vpow2.f32 %v1753_v31 }
 0x685   : > { %1775 = vadd.xlane.f32.xlu0 %v6541_v53  ;;  %1773 = vadd.xlane.f32.xlu1 %v6538_v37 }
 0x686   : > { %4964 = vpow2.f32 %v1755_v55  ;;  %v1757_v27 = vmul.f32 1.442695, %v1726_v30  ;;  %v6546_v63 = vpop.eup %4954 }
 0x688   : > { %v6548_v10 = vpop.eup %4956  ;;  %4966 = vpow2.f32 %v1757_v27 }
 0x689   : > { %1779 = vadd.xlane.f32.xlu0 %v6548_v10  ;;  %1777 = vadd.xlane.f32.xlu1 %v6546_v63 }
 0x68a   : > { %v6553_v62 = vpop.eup %4958 }
 0x68c   : > { %v6555_v58 = vpop.eup %4960 }
 0x68d   : > { %1783 = vadd.xlane.f32.xlu0 %v6555_v58  ;;  %1781 = vadd.xlane.f32.xlu1 %v6553_v62 }
 0x68e   : > { %v6560_v56 = vpop.eup %4962 }
 0x690   : > { %v6562_v26 = vpop.eup %4964 }
 0x691   : > { %1787 = vadd.xlane.f32.xlu0 %v6562_v26  ;;  %1785 = vadd.xlane.f32.xlu1 %v6560_v56 }
 0x692   : > { %v6567_v57 = vpop.eup %4966 }
 0x695   : > { %1789 = vadd.xlane.f32.xlu1 %v6567_v57 }
 0x702   : > { %v1760_v42 = vpop.xlane.xlu0 %1759 }
 0x703   : > { %4968 = vrcp.f32 %v1760_v42 }
 0x706   : > { %v1764_v25 = vpop.xlane.xlu0 %1763  ;;  %v1762_v60 = vpop.xlane.xlu1 %1761 }
 0x707   : > { %4970 = vrcp.f32 %v1762_v60 }
 0x708   : > { %4972 = vrcp.f32 %v1764_v25 }
 0x70a   : > { %v1768_v22 = vpop.xlane.xlu0 %1767  ;;  %v1766_v32 = vpop.xlane.xlu1 %1765 }
 0x70b   : > { %4974 = vrcp.f32 %v1766_v32 }
 0x70c   : > { %4976 = vrcp.f32 %v1768_v22 }
 0x70d   : > { %v4969_v39 = vpop.eup %4968 }
 0x70e   : > { %v1772_v28 = vpop.xlane.xlu0 %1771  ;;  %v1770_v61 = vpop.xlane.xlu1 %1769  ;;  %v1807_v40 = vmul.f32 %v4969_v39, %v6509_v46 }
 0x70f   : > { %4978 = vrcp.f32 %v1770_v61 }
 0x710   : > { %4980 = vrcp.f32 %v1772_v28 }
 0x711   : > { %v4971_v13 = vpop.eup %4970 }
 0x712   : > { %v1776_v45 = vpop.xlane.xlu0 %1775  ;;  %v1774_v36 = vpop.xlane.xlu1 %1773  ;;  %v1808_v29 = vmul.f32 %v4971_v13, %v6516_v9 }
 0x713   : > { %v4973_v59 = vpop.eup %4972  ;;  %4982 = vrcp.f32 %v1774_v36 }
 0x714   : > { %v1823_v14 = vpack.c.bf16 %v1808_v29, %v1807_v40  ;;  %4984 = vrcp.f32 %v1776_v45  ;;  %v1809_v8 = vmul.f32 %v4973_v59, %v6514_v24 }
 0x715   : > { %v4975_v50 = vpop.eup %4974 }
 0x716   : > { %v1780_v54 = vpop.xlane.xlu0 %1779  ;;  %v1778_v12 = vpop.xlane.xlu1 %1777  ;;  %4682 = vmatprep.mubr.bf16.mxu1 %v1823_v14  ;;  %v1810_v47 = vmul.f32 %v4975_v50, %v6522_v51 }
 0x717   : > { %v4977_v44 = vpop.eup %4976  ;;  %4986 = vrcp.f32 %v1778_v12 }
 0x718   : > { %v1824_v23 = vpack.c.bf16 %v1810_v47, %v1809_v8  ;;  %4988 = vrcp.f32 %v1780_v54  ;;  %v1811_v9 = vmul.f32 %v4977_v44, %v6524_v15 }
 0x719   : > { %v4979_v4 = vpop.eup %4978 }
 0x71a   : > { %v1784_v46 = vpop.xlane.xlu0 %1783  ;;  %v1782_v41 = vpop.xlane.xlu1 %1781  ;;  %4683 = vmatmul.mubr.bf16.vlgmr.msra.gmra.mrb[0].mxu1 %v1824_v23  ;;  %v1812_v31 = vmul.f32 %v4979_v4, %v6530_v52  ;;  %v5000_v23 = vld [vmem:[#allocation12] sm:$0xff] (%p1479_p2)   ;;  %v5001_v4 = vld [vmem:[#allocation12 + $0x8] sm:$0x3f] (%p1479_p2)  }
 0x71b   : > { %v4981_v38 = vpop.eup %4980  ;;  %4990 = vrcp.f32 %v1782_v41  ;;  %4698 = vmatprep.subr.bf16.mxu0 (%p1479_p2), %v5000_v23  ;;  %4816 = vmatprep.subr.bf16.mxu1 (%p1479_p2), %v5000_v23 }
 0x71c   : > { %v1825_v0 = vpack.c.bf16 %v1812_v31, %v1811_v9  ;;  %4992 = vrcp.f32 %v1784_v46  ;;  %v1813_v51 = vmul.f32 %v4981_v38, %v6532_v49  ;;  %4699 = vmatpush3.bf16.msra.mxu0 (%p1479_p2), %v5000_v23  ;;  %v8049_v9 = vld [vmem:[#allocation63_spill] sm:$0xff] (%p1479_p2)  ;;  %4818 = vmatpush3.bf16.msra.mxu1 (%p1479_p2), %v5000_v23 }
 0x71d   : > { %v4983_v34 = vpop.eup %4982  ;;  %v2061_v31 = vand.u32 (%p1479_p2), %v5001_v4, %v8049_v9  ;;  %v8052_v4 = vld [vmem:[#allocation31_spill] sm:$0xff] (%p1479_p2) }
 0x71e   : > { %v1788_v24 = vpop.xlane.xlu0 %1787  ;;  %v1786_v55 = vpop.xlane.xlu1 %1785  ;;  %4686 = vmatprep.mubr.bf16.mxu1 %v1825_v0  ;;  %v1814_v30 = vmul.f32 %v4983_v34, %v6538_v37 }
 0x71f   : > { %v4985_v27 = vpop.eup %4984  ;;  %4994 = vrcp.f32 %v1786_v55  ;;  %4700 = vmatprep.subr.bf16.mxu0 (%p1479_p2), %v2061_v31  ;;  %4817 = vmatprep.subr.bf16.mxu1 (%p1479_p2), %v2061_v31 }
 0x720   : > { %4996 = vrcp.f32 %v1788_v24  ;;  %v1826_v48 = vpack.c.bf16 %v1814_v30, %v1813_v51  ;;  %v1815_v52 = vmul.f32 %v4985_v27, %v6541_v53  ;;  %4701 = vmatpush3.bf16.msra.mxu0 (%p1479_p2), %v2061_v31  ;;  %4819 = vmatpush3.bf16.msra.mxu1 (%p1479_p2), %v2061_v31  ;;  %v8053_v31 = vld [vmem:[#allocation34_spill] sm:$0xff] (%p1479_p2) }
 0x721   : > { %v4987_v43 = vpop.eup %4986 }
 0x722   : > { %v1790_v15 = vpop.xlane.xlu1 %1789  ;;  %4687 = vmatmul.mubr.bf16.gmra.mrb[4].mxu1 %v1826_v48  ;;  %v1816_v11 = vmul.f32 %v4987_v43, %v6546_v63  ;;  %v4989_v35 = vpop.eup %4988 }
 0x723   : > { %4998 = vrcp.f32 %v1790_v15  ;;  %v1817_v49 = vmul.f32 %v4989_v35, %v6548_v10 }
 0x724   : > { %v1827_v42 = vpack.c.bf16 %v1816_v11, %v1815_v52 }
 0x725   : > { %v4991_v25 = vpop.eup %4990 }
 0x726   : > { %4690 = vmatprep.mubr.bf16.mxu1 %v1827_v42  ;;  %v1818_v37 = vmul.f32 %v4991_v25, %v6553_v62  ;;  %v4993_v60 = vpop.eup %4992 }
 0x727   : > { %v1819_v61 = vmul.f32 %v4993_v60, %v6555_v58 }
 0x728   : > { %v1828_v22 = vpack.c.bf16 %v1818_v37, %v1817_v49 }
 0x729   : > { %v4995_v32 = vpop.eup %4994 }
 0x72a   : > { %v4997_v28 = vpop.eup %4996  ;;  %4691 = vmatmul.mubr.bf16.gmra.mrb[8].mxu1 %v1828_v22  ;;  %v1820_v53 = vmul.f32 %v4995_v32, %v6560_v56 }
 0x72b   : > { %v1821_v13 = vmul.f32 %v4997_v28, %v6562_v26 }
 0x72c   : > { %v1829_v63 = vpack.c.bf16 %v1820_v53, %v1819_v61 }
 0x72d   : > { %v4999_v39 = vpop.eup %4998 }
 0x72e   : > { %v1822_v45 = vmul.f32 %v4999_v39, %v6567_v57  ;;  %4694 = vmatprep.mubr.bf16.mxu1 %v1829_v63 }
 0x730   : > { %v1830_v10 = vpack.c.bf16 %v1822_v45, %v1821_v13 }
 0x732   : > { %4695 = vmatmul.mubr.bf16.gmra.mrb[12].mxu1 %v1830_v10 }
 0x7ed   : > { %v4684_v62 = vpop.f32.mrb[0].mxu1 }
 0x7ee   : > { %1931 = vst.msk [vmem:[%s6589_s13 + $0x10] sm:$0xff] %vm537_vm6, %v4684_v62  ;;  %v1865_v58 = vpop.f32.mrb[1].mxu1 }
 0x7ef   : > { %1929 = vst.msk [vmem:[%s6589_s13] sm:$0xff] %vm537_vm6, %v1865_v58  ;;  %v4685_v56 = vpop.f32.mrb[2].mxu1 }
 0x7f0   : > { %1932 = vst.msk [vmem:[%s6589_s13 + $0x18] sm:$0xff] %vm537_vm6, %v4685_v56  ;;  %v1868_v26 = vpop.f32.mrb[3].mxu1 }
 0x7f1   : > { %1930 = vst.msk [vmem:[%s6589_s13 + $0x8] sm:$0xff] %vm537_vm6, %v1868_v26 }
 0x7f5   : > { %v4688_v57 = vpop.f32.mrb[4].mxu1 }
 0x7f6   : > { %1935 = vst.msk [vmem:[%s6589_s13 + $0x30] sm:$0xff] %vm537_vm6, %v4688_v57  ;;  %v1881_v36 = vpop.f32.mrb[5].mxu1 }
 0x7f7   : > { %1933 = vst.msk [vmem:[%s6589_s13 + $0x20] sm:$0xff] %vm537_vm6, %v1881_v36  ;;  %v4689_v40 = vpop.f32.mrb[6].mxu1  ;;  %v1999_v36 = vsub.s32 (%p1479_p2), 6, %v5631_v1 }
 0x7f8   : > { %1936 = vst.msk [vmem:[%s6589_s13 + $0x38] sm:$0xff] %vm537_vm6, %v4689_v40  ;;  %v1884_v29 = vpop.f32.mrb[7].mxu1  ;;  %v8050_v40 = vld [vmem:[#allocation64_spill] sm:$0xff] (%p1479_p2) }
 0x7f9   : > { %1934 = vst.msk [vmem:[%s6589_s13 + $0x28] sm:$0xff] %vm537_vm6, %v1884_v29  ;;  %v6645_v29 = vrot.slane (%p1479_p2), %v8050_v40, %v1999_v36 }
 0x7fd   : > { %v4692_v59 = vpop.f32.mrb[8].mxu1 }
 0x7fe   : > { %1939 = vst.msk [vmem:[%s6589_s13 + $0x50] sm:$0xff] %vm537_vm6, %v4692_v59  ;;  %v1897_v14 = vpop.f32.mrb[9].mxu1 }
 0x7ff   : > { %1937 = vst.msk [vmem:[%s6589_s13 + $0x40] sm:$0xff] %vm537_vm6, %v1897_v14  ;;  %v4693_v50 = vpop.f32.mrb[10].mxu1 }
 0x800   : > { %1940 = vst.msk [vmem:[%s6589_s13 + $0x58] sm:$0xff] %vm537_vm6, %v4693_v50  ;;  %v1900_v54 = vpop.f32.mrb[11].mxu1 }
 0x801   : > { %1938 = vst.msk [vmem:[%s6589_s13 + $0x48] sm:$0xff] %vm537_vm6, %v1900_v54 }
 0x803   :  { %1481 = sbr.rel (!%p1479_p2) target bundleno = 1211 (0x4bb), region = 106 }
 0x805   : > { %v4696_v12 = vpop.f32.mrb[12].mxu1 }
 0x806   : > { %1943 = vst.msk [vmem:[%s6589_s13 + $0x70] sm:$0xff] %vm537_vm6, %v4696_v12  ;;  %v1913_v8 = vpop.f32.mrb[13].mxu1 }
 0x807   : > { %1941 = vst.msk [vmem:[%s6589_s13 + $0x60] sm:$0xff] %vm537_vm6, %v1913_v8  ;;  %v4697_v47 = vpop.f32.mrb[14].mxu1  ;;  %v8051_v8 = vld [vmem:[#allocation32_spill] sm:$0xff] (%p1479_p2) }
 0x808   : > { %1944 = vst.msk [vmem:[%s6589_s13 + $0x78] sm:$0xff] %vm537_vm6, %v4697_v47  ;;  %v1916_v44 = vpop.f32.mrb[15].mxu1 }
 0x809   : > { %1942 = vst.msk [vmem:[%s6589_s13 + $0x68] sm:$0xff] %vm537_vm6, %v1916_v44 }
 0x810   :  { %v1945_v46 = vld [vmem:[#allocation3] sm:$0xff]  ;;  %v1946_v41 = vld [vmem:[#allocation3 + $0x8] sm:$0xff]  ;;  %v1947_v0 = vld [vmem:[#allocation3 + $0x10] sm:$0xff] }
 0x811   :  { %v1977_v38 = vpack.c.bf16 %v1946_v41, %v1945_v46  ;;  %v1948_v34 = vld [vmem:[#allocation3 + $0x18] sm:$0xff]  ;;  %v1949_v24 = vld [vmem:[#allocation3 + $0x20] sm:$0xff]  ;;  %v1950_v55 = vld [vmem:[#allocation3 + $0x28] sm:$0xff] }
 0x812   :  { %v1978_v51 = vpack.c.bf16 %v1948_v34, %v1947_v0  ;;  %v1979_v2 = vpack.c.bf16 %v1950_v55, %v1949_v24  ;;  %v1951_v3 = vld [vmem:[#allocation3 + $0x30] sm:$0xff]  ;;  %v1952_v5 = vld [vmem:[#allocation3 + $0x38] sm:$0xff]  ;;  %v1953_v6 = vld [vmem:[#allocation3 + $0x40] sm:$0xff] }
 0x813   :  { %4702 = vmatprep.mubr.msk.bf16.mxu0 %vm537_vm6, %v1977_v38  ;;  %v1954_v7 = vld [vmem:[#allocation3 + $0x48] sm:$0xff]  ;;  %v1973_v16 = vld [vmem:[#allocation3 + $0xe0] sm:$0xff]  ;;  %v1975_v19 = vld [vmem:[#allocation3 + $0xf0] sm:$0xff]  ;;  %v1980_v33 = vpack.c.bf16 %v1952_v5, %v1951_v3 }
 0x814   :  { %4703 = vmatmul.mubr.msk.bf16.vlgmr.msra.gmra.mrb[0].mxu0 %vm537_vm6, %v1978_v51  ;;  %v1974_v17 = vld [vmem:[#allocation3 + $0xe8] sm:$0xff]  ;;  %v1976_v20 = vld [vmem:[#allocation3 + $0xf8] sm:$0xff]  ;;  %v1981_v30 = vpack.c.bf16 %v1954_v7, %v1953_v6  ;;  %v1955_v27 = vld [vmem:[#allocation3 + $0x50] sm:$0xff] }
 0x815   :  { %4706 = vmatprep.mubr.msk.bf16.mxu0 %vm537_vm6, %v1979_v2  ;;  %v1991_v18 = vpack.c.bf16 %v1974_v17, %v1973_v16  ;;  %v1992_v21 = vpack.c.bf16 %v1976_v20, %v1975_v19  ;;  %v1956_v48 = vld [vmem:[#allocation3 + $0x58] sm:$0xff]  ;;  %v1957_v43 = vld [vmem:[#allocation3 + $0x60] sm:$0xff]  ;;  %v1958_v15 = vld [vmem:[#allocation3 + $0x68] sm:$0xff] }
 0x816   :  { %v1982_v52 = vpack.c.bf16 %v1956_v48, %v1955_v27  ;;  %v1983_v11 = vpack.c.bf16 %v1958_v15, %v1957_v43  ;;  %v1959_v35 = vld [vmem:[#allocation3 + $0x70] sm:$0xff]  ;;  %v1960_v42 = vld [vmem:[#allocation3 + $0x78] sm:$0xff]  ;;  %v1961_v25 = vld [vmem:[#allocation3 + $0x80] sm:$0xff] }
 0x817   :  { %4730 = vmatprep.mubr.msk.bf16.mxu1 %vm537_vm6, %v1991_v18  ;;  %v1962_v49 = vld [vmem:[#allocation3 + $0x88] sm:$0xff]  ;;  %v1984_v37 = vpack.c.bf16 %v1960_v42, %v1959_v35  ;;  %v1963_v22 = vld [vmem:[#allocation3 + $0x90] sm:$0xff]  ;;  %v1964_v32 = vld [vmem:[#allocation3 + $0x98] sm:$0xff] }
 0x818   :  { %4731 = vmatmul.mubr.msk.bf16.vlgmr.msra.gmra.mrb[0].mxu1 %vm537_vm6, %v1992_v21  ;;  %v1985_v60 = vpack.c.bf16 %v1962_v49, %v1961_v25  ;;  %v1965_v28 = vld [vmem:[#allocation3 + $0xa0] sm:$0xff]  ;;  %v1966_v61 = vld [vmem:[#allocation3 + $0xa8] sm:$0xff]  ;;  %v1986_v53 = vpack.c.bf16 %v1964_v32, %v1963_v22  ;;  %v1967_v63 = vld [vmem:[#allocation3 + $0xb0] sm:$0xff] }
 0x819   :  { %v1987_v39 = vpack.c.bf16 %v1966_v61, %v1965_v28  ;;  %v1968_v13 = vld [vmem:[#allocation3 + $0xb8] sm:$0xff]  ;;  %v1969_v45 = vld [vmem:[#allocation3 + $0xc0] sm:$0xff]  ;;  %v1970_v10 = vld [vmem:[#allocation3 + $0xc8] sm:$0xff] }
 0x81a   :  { %v1988_v62 = vpack.c.bf16 %v1968_v13, %v1967_v63  ;;  %v1989_v58 = vpack.c.bf16 %v1970_v10, %v1969_v45  ;;  %v1971_v56 = vld [vmem:[#allocation3 + $0xd0] sm:$0xff]  ;;  %v1972_v26 = vld [vmem:[#allocation3 + $0xd8] sm:$0xff]  ;;  %v8055_v48 = vld [vmem:[#allocation36_spill] sm:$0xff] }
 0x81b   :  { %v1990_v57 = vpack.c.bf16 %v1972_v26, %v1971_v56  ;;  %v8054_v24 = vld [vmem:[#allocation33_spill] sm:$0xff]  ;;  %v8057_v15 = vld [vmem:[#allocation35_spill] sm:$0xff]  ;;  %v8058_v35 = vld [vmem:[#allocation38_spill] sm:$0xff] }
 0x81c   :  { %4707 = vmatmul.mubr.msk.bf16.gmra.mrb[4].mxu0 %vm537_vm6, %v1980_v33  ;;  %v8060_v25 = vld [vmem:[#allocation37_spill] sm:$0xff]  ;;  %v8061_v10 = vld [vmem:[#allocation40_spill] sm:$0xff] }
 0x81d   :  { %4710 = vmatprep.mubr.msk.bf16.mxu0 %vm537_vm6, %v1981_v30 }
 0x824   :  { %4711 = vmatmul.mubr.msk.bf16.gmra.mrb[8].mxu0 %vm537_vm6, %v1982_v52 }
 0x825   :  { %4714 = vmatprep.mubr.msk.bf16.mxu0 %vm537_vm6, %v1983_v11 }
 0x82c   :  { %4715 = vmatmul.mubr.msk.bf16.gmra.mrb[12].mxu0 %vm537_vm6, %v1984_v37 }
 0x82d   :  { %4718 = vmatprep.mubr.msk.bf16.mxu0 %vm537_vm6, %v1985_v60 }
 0x834   :  { %4719 = vmatmul.mubr.msk.bf16.gmra.mrb[16].mxu0 %vm537_vm6, %v1986_v53 }
 0x835   :  { %4722 = vmatprep.mubr.msk.bf16.mxu0 %vm537_vm6, %v1987_v39 }
 0x83c   :  { %4723 = vmatmul.mubr.msk.bf16.gmra.mrb[20].mxu0 %vm537_vm6, %v1988_v62 }
 0x83d   :  { %4726 = vmatprep.mubr.msk.bf16.mxu0 %vm537_vm6, %v1989_v58  ;;  %v8063_v58 = vld [vmem:[#allocation39_spill] sm:$0xff] }
 0x844   :  { %4727 = vmatmul.mubr.msk.bf16.gmra.mrb[24].mxu0 %vm537_vm6, %v1990_v57  ;;  %v8065_v57 = vld [vmem:[#allocation42_spill] sm:$0xff] }
 0x8e7   :  { %v4704_v59 = vpop.f32.mrb[0].mxu0 }
 0x8e8   :  { %v2106_v14 = vadd.f32 %v4704_v59, %v6645_v29  ;;  %v2097_v50 = vpop.f32.mrb[1].mxu0  ;;  %v8067_v59 = vld [vmem:[#allocation41_spill] sm:$0xff] }
 0x8e9   :  { %v2098_v54 = vadd.f32 %v2097_v50, %v6645_v29  ;;  %v4705_v12 = vpop.f32.mrb[2].mxu0 }
 0x8ea   :  { %v6650_v47 = vadd.f32 %v2106_v14, %v8051_v8  ;;  %v2109_v44 = vadd.f32 %v4705_v12, %v6645_v29  ;;  %v2100_v23 = vpop.f32.mrb[3].mxu0 }
 0x8eb   :  { %v6654_v46 = vadd.f32 %v2098_v54, %v8052_v4  ;;  %v2101_v41 = vadd.f32 %v2100_v23, %v6645_v29  ;;  %v4732_v34 = vpop.f32.mrb[0].mxu1 }
 0x8ec   :  { %v6658_v38 = vadd.f32 %v2109_v44, %v8053_v31  ;;  %v2262_v0 = vsel %vm537_vm6, %v6650_v47, 0.0  ;;  %v6668_v2 = vadd.f32 %v4732_v34, %v6645_v29  ;;  %v6670_v3 = vpop.f32.mrb[1].mxu1 }
 0x8ed   :  { %v6663_v55 = vadd.f32 %v2101_v41, %v8054_v24  ;;  %2263 = vadd.xlane.f32.xlu1 %v2262_v0  ;;  %v2256_v51 = vsel %vm537_vm6, %v6654_v46, 0.0  ;;  %v4733_v5 = vpop.f32.mrb[2].mxu1  ;;  %v8069_v24 = vld [vmem:[#allocation44_spill] sm:$0xff] }
 0x8ee   :  { %2257 = vadd.xlane.f32.xlu0 %v2256_v51  ;;  %v6673_v7 = vadd.f32 %v4733_v5, %v6645_v29  ;;  %v6675_v16 = vpop.f32.mrb[3].mxu1  ;;  %v2265_v19 = vsel %vm537_vm6, %v6658_v38, 0.0  ;;  %v8071_v5 = vld [vmem:[#allocation43_spill] sm:$0xff] }
 0x8ef   :  { %v4708_v6 = vpop.f32.mrb[4].mxu0  ;;  %v2259_v33 = vsel %vm537_vm6, %v6663_v55, 0.0 }
 0x8f0   :  { %v2122_v17 = vadd.f32 %v4708_v6, %v6645_v29  ;;  %v2113_v18 = vpop.f32.mrb[5].mxu0 }
 0x8f1   :  { %v2114_v20 = vadd.f32 %v2113_v18, %v6645_v29  ;;  %2266 = vadd.xlane.f32.xlu1 %v2265_v19  ;;  %v4709_v21 = vpop.f32.mrb[6].mxu0  ;;  %v8073_v18 = vld [vmem:[#allocation46_spill] sm:$0xff] }
 0x8f2   :  { %v2125_v30 = vadd.f32 %v4709_v21, %v6645_v29  ;;  %v2116_v27 = vpop.f32.mrb[7].mxu0  ;;  %2260 = vadd.xlane.f32.xlu0 %v2259_v33  ;;  %v6685_v43 = vadd.f32 %v2122_v17, %v8055_v48 }
 0x8f3   :  { %v6688_v52 = vadd.f32 %v2114_v20, %v8057_v15  ;;  %v2117_v11 = vadd.f32 %v2116_v27, %v6645_v29  ;;  %v8075_v20 = vld [vmem:[#allocation45_spill] sm:$0xff] }
 0x8f4   :  { %8056 = vst [vmem:[#allocation26_spill] sm:$0xff] %v6685_v43  ;;  %v6692_v42 = vadd.f32 %v2125_v30, %v8058_v35  ;;  %v2274_v32 = vsel %vm537_vm6, %v6685_v43, 0.0 }
 0x8f5   :  { %v6695_v49 = vadd.f32 %v2117_v11, %v8060_v25  ;;  %v2268_v37 = vsel %vm537_vm6, %v6688_v52, 0.0 }
 0x8f6   :  { %8059 = vst [vmem:[#allocation27_spill] sm:$0xff] %v6692_v42  ;;  %2269 = vadd.xlane.f32.xlu0 %v2268_v37  ;;  %v2277_v63 = vsel %vm537_vm6, %v6692_v42, 0.0 }
 0x8f7   :  { %v4712_v60 = vpop.f32.mrb[8].mxu0  ;;  %v2271_v22 = vsel %vm537_vm6, %v6695_v49, 0.0 }
 0x8f8   :  { %v2138_v28 = vadd.f32 %v4712_v60, %v6645_v29  ;;  %v2129_v61 = vpop.f32.mrb[9].mxu0  ;;  %2272 = vadd.xlane.f32.xlu1 %v2271_v22 }
 0x8f9   :  { %v2130_v53 = vadd.f32 %v2129_v61, %v6645_v29  ;;  %v4713_v39 = vpop.f32.mrb[10].mxu0  ;;  %v8078_v61 = vld [vmem:[#allocation47_spill] sm:$0xff] }
 0x8fa   :  { %v2141_v13 = vadd.f32 %v4713_v39, %v6645_v29  ;;  %v2132_v45 = vpop.f32.mrb[11].mxu0  ;;  %2275 = vadd.xlane.f32.xlu0 %v2274_v32  ;;  %v6709_v62 = vadd.f32 %v2138_v28, %v8061_v10  ;;  %v8077_v32 = vld [vmem:[#allocation48_spill] sm:$0xff] }
 0x8fb   :  { %v6712_v56 = vadd.f32 %v2130_v53, %v8063_v58  ;;  %v2133_v26 = vadd.f32 %v2132_v45, %v6645_v29  ;;  %v8080_v45 = vld [vmem:[#allocation49_spill] sm:$0xff] }
 0x8fc   :  { %8062 = vst [vmem:[#allocation28_spill] sm:$0xff] %v6709_v62  ;;  %2278 = vadd.xlane.f32.xlu1 %v2277_v63  ;;  %v6716_v36 = vadd.f32 %v2141_v13, %v8065_v57  ;;  %v2286_v8 = vsel %vm537_vm6, %v6709_v62, 0.0  ;;  %v8079_v63 = vld [vmem:[#allocation50_spill] sm:$0xff] }
 0x8fd   :  { %8064 = vst [vmem:[#allocation29_spill] sm:$0xff] %v6712_v56  ;;  %v6719_v14 = vadd.f32 %v2133_v26, %v8067_v59  ;;  %v2280_v50 = vsel %vm537_vm6, %v6712_v56, 0.0 }
 0x8fe   :  { %8066 = vst [vmem:[#allocation63_spill] sm:$0xff] %v6716_v36  ;;  %2281 = vadd.xlane.f32.xlu0 %v2280_v50  ;;  %v2289_v31 = vsel %vm537_vm6, %v6716_v36, 0.0 }
 0x8ff   :  { %8068 = vst [vmem:[#allocation64_spill] sm:$0xff] %v6719_v14  ;;  %v4716_v54 = vpop.f32.mrb[12].mxu0  ;;  %v2283_v12 = vsel %vm537_vm6, %v6719_v14, 0.0 }
 0x900   :  { %v2154_v44 = vadd.f32 %v4716_v54, %v6645_v29  ;;  %v2145_v23 = vpop.f32.mrb[13].mxu0  ;;  %2284 = vadd.xlane.f32.xlu1 %v2283_v12 }
 0x901   :  { %v2146_v4 = vadd.f32 %v2145_v23, %v6645_v29  ;;  %v4717_v41 = vpop.f32.mrb[14].mxu0 }
 0x902   :  { %v2157_v0 = vadd.f32 %v4717_v41, %v6645_v29  ;;  %v2148_v34 = vpop.f32.mrb[15].mxu0  ;;  %2287 = vadd.xlane.f32.xlu0 %v2286_v8  ;;  %v6733_v51 = vadd.f32 %v2154_v44, %v8069_v24  ;;  %v8081_v41 = vld [vmem:[#allocation52_spill] sm:$0xff] }
 0x903   :  { %v6736_v6 = vadd.f32 %v2146_v4, %v8071_v5  ;;  %v2149_v17 = vadd.f32 %v2148_v34, %v6645_v29  ;;  %v8085_v5 = vld [vmem:[#allocation54_spill] sm:$0xff] }
 0x904   :  { %8070 = vst [vmem:[#allocation32_spill] sm:$0xff] %v6733_v51  ;;  %2290 = vadd.xlane.f32.xlu1 %v2289_v31  ;;  %v6740_v19 = vadd.f32 %v2157_v0, %v8073_v18  ;;  %v2298_v48 = vsel %vm537_vm6, %v6733_v51, 0.0  ;;  %v8083_v0 = vld [vmem:[#allocation51_spill] sm:$0xff]  ;;  %v8087_v18 = vld [vmem:[#allocation53_spill] sm:$0xff] }
 0x905   :  { %8072 = vst [vmem:[#allocation31_spill] sm:$0xff] %v6736_v6  ;;  %v6743_v21 = vadd.f32 %v2149_v17, %v8075_v20  ;;  %v2292_v33 = vsel %vm537_vm6, %v6736_v6, 0.0 }
 0x906   :  { %8074 = vst [vmem:[#allocation34_spill] sm:$0xff] %v6740_v19  ;;  %2293 = vadd.xlane.f32.xlu0 %v2292_v33  ;;  %v2301_v37 = vsel %vm537_vm6, %v6740_v19, 0.0 }
 0x907   :  { %8076 = vst [vmem:[#allocation33_spill] sm:$0xff] %v6743_v21  ;;  %v4720_v30 = vpop.f32.mrb[16].mxu0  ;;  %v2295_v27 = vsel %vm537_vm6, %v6743_v21, 0.0 }
 0x908   :  { %v2170_v15 = vadd.f32 %v4720_v30, %v6645_v29  ;;  %v2161_v11 = vpop.f32.mrb[17].mxu0  ;;  %2296 = vadd.xlane.f32.xlu1 %v2295_v27 }
 0x909   :  { %v2162_v35 = vadd.f32 %v2161_v11, %v6645_v29  ;;  %v4721_v25 = vpop.f32.mrb[18].mxu0 }
 0x90a   :  { %v2173_v60 = vadd.f32 %v4721_v25, %v6645_v29  ;;  %v2164_v22 = vpop.f32.mrb[19].mxu0  ;;  %2299 = vadd.xlane.f32.xlu0 %v2298_v48  ;;  %v6757_v28 = vadd.f32 %v2170_v15, %v8077_v32 }
 0x90b   :  { %v6760_v53 = vadd.f32 %v2162_v35, %v8078_v61  ;;  %v2165_v39 = vadd.f32 %v2164_v22, %v6645_v29 }
 0x90c   :  { %2302 = vadd.xlane.f32.xlu1 %v2301_v37  ;;  %v6764_v13 = vadd.f32 %v2173_v60, %v8079_v63  ;;  %v2310_v59 = vsel %vm537_vm6, %v6757_v28, 0.0  ;;  %v8089_v60 = vld [vmem:[#allocation56_spill] sm:$0xff] }
 0x90d   :  { %v6767_v10 = vadd.f32 %v2165_v39, %v8080_v45  ;;  %v2304_v58 = vsel %vm537_vm6, %v6760_v53, 0.0  ;;  %v8091_v39 = vld [vmem:[#allocation55_spill] sm:$0xff] }
 0x90e   :  { %2305 = vadd.xlane.f32.xlu0 %v2304_v58  ;;  %v2313_v44 = vsel %vm537_vm6, %v6764_v13, 0.0  ;;  %v2210_v58 = vadd.f32 %v6670_v3, %v6645_v29 }
 0x90f   :  { %v4724_v26 = vpop.f32.mrb[20].mxu0  ;;  %v2307_v57 = vsel %vm537_vm6, %v6767_v10, 0.0 }
 0x910   :  { %v2186_v50 = vadd.f32 %v4724_v26, %v6645_v29  ;;  %v2177_v54 = vpop.f32.mrb[21].mxu0  ;;  %2308 = vadd.xlane.f32.xlu1 %v2307_v57  ;;  %v8093_v26 = vld [vmem:[#allocation58_spill] sm:$0xff] }
 0x911   :  { %v2178_v12 = vadd.f32 %v2177_v54, %v6645_v29  ;;  %v4725_v8 = vpop.f32.mrb[22].mxu0 }
 0x912   :  { %v2189_v23 = vadd.f32 %v4725_v8, %v6645_v29  ;;  %v2180_v4 = vpop.f32.mrb[23].mxu0  ;;  %2311 = vadd.xlane.f32.xlu0 %v2310_v59  ;;  %v6781_v31 = vadd.f32 %v2186_v50, %v8081_v41  ;;  %v8095_v50 = vld [vmem:[#allocation57_spill] sm:$0xff] }
 0x913   :  { %v6784_v34 = vadd.f32 %v2178_v12, %v8083_v0  ;;  %v2181_v24 = vadd.f32 %v2180_v4, %v6645_v29  ;;  %v2213_v12 = vadd.f32 %v6675_v16, %v6645_v29  ;;  %v8099_v4 = vld [vmem:[#allocation61_spill] sm:$0xff] }
 0x914   :  { %8082 = vst [vmem:[#allocation36_spill] sm:$0xff] %v6781_v31  ;;  %2314 = vadd.xlane.f32.xlu1 %v2313_v44  ;;  %v6788_v17 = vadd.f32 %v2189_v23, %v8085_v5  ;;  %v2322_v48 = vsel %vm537_vm6, %v6781_v31, 0.0  ;;  %v8097_v44 = vld [vmem:[#allocation59_spill] sm:$0xff] }
 0x915   :  { %8084 = vst [vmem:[#allocation35_spill] sm:$0xff] %v6784_v34  ;;  %v6791_v20 = vadd.f32 %v2181_v24, %v8087_v18  ;;  %v2316_v33 = vsel %vm537_vm6, %v6784_v34, 0.0  ;;  %v6826_v23 = vadd.f32 %v2210_v58, %v8097_v44  ;;  %v6831_v41 = vadd.f32 %v2213_v12, %v8099_v4 }
 0x916   :  { %8086 = vst [vmem:[#allocation38_spill] sm:$0xff] %v6788_v17  ;;  %2317 = vadd.xlane.f32.xlu0 %v2316_v33  ;;  %v2325_v37 = vsel %vm537_vm6, %v6788_v17, 0.0 }
 0x917   :  { %8088 = vst [vmem:[#allocation37_spill] sm:$0xff] %v6791_v20  ;;  %v4728_v30 = vpop.f32.mrb[24].mxu0  ;;  %v2319_v27 = vsel %vm537_vm6, %v6791_v20, 0.0  ;;  %8098 = vst [vmem:[#allocation44_spill] sm:$0xff] %v6826_v23  ;;  %v2343_v16 = vsel %vm537_vm6, %v6831_v41, 0.0 }
 0x918   :  { %v2202_v15 = vadd.f32 %v4728_v30, %v6645_v29  ;;  %2320 = vadd.xlane.f32.xlu1 %v2319_v27  ;;  %v2193_v11 = vpop.f32.mrb[25].mxu0  ;;  %8100 = vst [vmem:[#allocation43_spill] sm:$0xff] %v6831_v41 }
 0x919   :  { %v2194_v35 = vadd.f32 %v2193_v11, %v6645_v29  ;;  %v4729_v25 = vpop.f32.mrb[26].mxu0 }
 0x91a   :  { %v6804_v22 = vadd.f32 %v2202_v15, %v8089_v60  ;;  %v2205_v32 = vadd.f32 %v4729_v25, %v6645_v29  ;;  %2323 = vadd.xlane.f32.xlu0 %v2322_v48  ;;  %v2196_v61 = vpop.f32.mrb[27].mxu0 }
 0x91b   :  { %v6808_v63 = vadd.f32 %v2194_v35, %v8091_v39  ;;  %v2197_v45 = vadd.f32 %v2196_v61, %v6645_v29  ;;  %v2340_v29 = vsel %vm537_vm6, %v6826_v23, 0.0 }
 0x91c   :  { %8090 = vst [vmem:[#allocation40_spill] sm:$0xff] %v6804_v22  ;;  %v6814_v57 = vadd.f32 %v2205_v32, %v8093_v26  ;;  %2326 = vadd.xlane.f32.xlu1 %v2325_v37  ;;  %v2334_v59 = vsel %vm537_vm6, %v6804_v22, 0.0  ;;  %v8101_v26 = vld [vmem:[#allocation60_spill] sm:$0xff] }
 0x91d   :  { %8092 = vst [vmem:[#allocation39_spill] sm:$0xff] %v6808_v63  ;;  %v6819_v54 = vadd.f32 %v2197_v45, %v8095_v50  ;;  %v2328_v3 = vsel %vm537_vm6, %v6808_v63, 0.0 }
 0x91e   :  { %8094 = vst [vmem:[#allocation42_spill] sm:$0xff] %v6814_v57  ;;  %2335 = vadd.xlane.f32.xlu0 %v2334_v59  ;;  %v2337_v8 = vsel %vm537_vm6, %v6814_v57, 0.0  ;;  %v6860_v59 = vadd.f32 %v6668_v2, %v8101_v26 }
 0x91f   :  { %8096 = vst [vmem:[#allocation41_spill] sm:$0xff] %v6819_v54  ;;  %v2331_v0 = vsel %vm537_vm6, %v6819_v54, 0.0 }
 0x920   :  { %2338 = vadd.xlane.f32.xlu1 %v2337_v8  ;;  %8102 = vst [vmem:[#allocation46_spill] sm:$0xff] %v6860_v59 }
 0x922   :  { %2329 = vadd.xlane.f32.xlu0 %v2328_v3 }
 0x924   :  { %2332 = vadd.xlane.f32.xlu1 %v2331_v0 }
 0x926   :  { %2341 = vadd.xlane.f32.xlu0 %v2340_v29  ;;  %v8103_v29 = vld [vmem:[#allocation62_spill] sm:$0xff] }
 0x928   :  { %2344 = vadd.xlane.f32.xlu1 %v2343_v16  ;;  %v6871_v16 = vadd.f32 %v6673_v7, %v8103_v29 }
 0x92a   :  { %8104 = vst [vmem:[#allocation45_spill] sm:$0xff] %v6871_v16 }
 0x97a   :  { %v2264_v24 = vpop.xlane.xlu1 %2263 }
 0x97b   :  { %v2354_v5 = vmul.f32 0.037037037, %v2264_v24  ;;  %v2258_v18 = vpop.xlane.xlu0 %2257 }
 0x97c   :  { %v2352_v33 = vmul.f32 0.037037037, %v2258_v18 }
 0x97d   :  { %v6840_v30 = vsub.f32 %v6650_v47, %v2354_v5  ;;  %v2346_v5 = vsel %vm537_vm6, %v6860_v59, 0.0 }
 0x97e   :  { %v2267_v27 = vpop.xlane.xlu1 %2266  ;;  %v6843_v48 = vsub.f32 %v6654_v46, %v2352_v33 }
 0x97f   :  { %v2355_v15 = vmul.f32 0.037037037, %v2267_v27  ;;  %v2261_v11 = vpop.xlane.xlu0 %2260  ;;  %v2418_v35 = vmul.f32 %v6840_v30, %v6840_v30 }
 0x980   :  { %v2353_v25 = vmul.f32 0.037037037, %v2261_v11  ;;  %v2416_v32 = vmul.f32 %v6843_v48, %v6843_v48 }
 0x981   :  { %v2454_v37 = vsel %vm537_vm6, %v2418_v35, 0.0  ;;  %v6849_v60 = vsub.f32 %v6658_v38, %v2355_v15 }
 0x982   :  { %2455 = vadd.xlane.f32.xlu0 %v2454_v37  ;;  %v6854_v61 = vsub.f32 %v6663_v55, %v2353_v25  ;;  %v2448_v8 = vsel %vm537_vm6, %v2416_v32, 0.0  ;;  %v2349_v32 = vsel %vm537_vm6, %v6871_v16, 0.0 }
 0x983   :  { %v2270_v39 = vpop.xlane.xlu0 %2269  ;;  %v2419_v45 = vmul.f32 %v6849_v60, %v6849_v60 }
 0x984   :  { %v2356_v58 = vmul.f32 0.037037037, %v2270_v39  ;;  %v2417_v44 = vmul.f32 %v6854_v61, %v6854_v61 }
 0x985   :  { %v2273_v50 = vpop.xlane.xlu1 %2272  ;;  %v2457_v12 = vsel %vm537_vm6, %v2419_v45, 0.0 }
 0x986   :  { %v2357_v3 = vmul.f32 0.037037037, %v2273_v50  ;;  %2458 = vadd.xlane.f32.xlu1 %v2457_v12  ;;  %2449 = vadd.xlane.f32.xlu0 %v2448_v8  ;;  %v6867_v4 = vsub.f32 %v6688_v52, %v2356_v58  ;;  %v2451_v18 = vsel %vm537_vm6, %v2417_v44, 0.0 }
 0x987   :  { %v2276_v0 = vpop.xlane.xlu0 %2275 }
 0x988   :  { %v2358_v2 = vmul.f32 0.037037037, %v2276_v0  ;;  %v2420_v33 = vmul.f32 %v6867_v4, %v6867_v4  ;;  %v6879_v27 = vsub.f32 %v6695_v49, %v2357_v3 }
 0x989   :  { %v2279_v24 = vpop.xlane.xlu1 %2278 }
 0x98a   :  { %v2359_v15 = vmul.f32 0.037037037, %v2279_v24  ;;  %2347 = vadd.xlane.f32.xlu0 %v2346_v5  ;;  %2452 = vadd.xlane.f32.xlu1 %v2451_v18  ;;  %v6882_v11 = vsub.f32 %v6685_v43, %v2358_v2  ;;  %v2460_v39 = vsel %vm537_vm6, %v2420_v33, 0.0  ;;  %v2421_v45 = vmul.f32 %v6879_v27, %v6879_v27 }
 0x98b   :  { %v2282_v7 = vpop.xlane.xlu0 %2281 }
 0x98c   :  { %v2360_v35 = vmul.f32 0.037037037, %v2282_v7  ;;  %v6885_v25 = vsub.f32 %v6692_v42, %v2359_v15  ;;  %v2422_v58 = vmul.f32 %v6882_v11, %v6882_v11  ;;  %v2463_v0 = vsel %vm537_vm6, %v2421_v45, 0.0 }
 0x98d   :  { %v2285_v37 = vpop.xlane.xlu1 %2284 }
 0x98e   :  { %v2361_v26 = vmul.f32 0.037037037, %v2285_v37  ;;  %2350 = vadd.xlane.f32.xlu1 %v2349_v32  ;;  %2461 = vadd.xlane.f32.xlu0 %v2460_v39  ;;  %v6895_v50 = vsub.f32 %v6712_v56, %v2360_v35  ;;  %v2423_v44 = vmul.f32 %v6885_v25, %v6885_v25  ;;  %v2466_v29 = vsel %vm537_vm6, %v2422_v58, 0.0 }
 0x98f   :  { %v2288_v12 = vpop.xlane.xlu0 %2287 }
 0x990   :  { %v2362_v8 = vmul.f32 0.037037037, %v2288_v12  ;;  %v2424_v2 = vmul.f32 %v6895_v50, %v6895_v50  ;;  %v6904_v24 = vsub.f32 %v6719_v14, %v2361_v26  ;;  %v2469_v7 = vsel %vm537_vm6, %v2423_v44, 0.0 }
 0x991   :  { %v2291_v3 = vpop.xlane.xlu1 %2290 }
 0x992   :  { %v2363_v5 = vmul.f32 0.037037037, %v2291_v3  ;;  %2464 = vadd.xlane.f32.xlu1 %v2463_v0  ;;  %2467 = vadd.xlane.f32.xlu0 %v2466_v29  ;;  %v6907_v18 = vsub.f32 %v6709_v62, %v2362_v8  ;;  %v2472_v37 = vsel %vm537_vm6, %v2424_v2, 0.0  ;;  %v2425_v32 = vmul.f32 %v6904_v24, %v6904_v24 }
 0x993   :  { %v2294_v33 = vpop.xlane.xlu0 %2293 }
 0x994   :  { %v2364_v15 = vmul.f32 0.037037037, %v2294_v33  ;;  %v2426_v39 = vmul.f32 %v6907_v18, %v6907_v18  ;;  %v6916_v45 = vsub.f32 %v6716_v36, %v2363_v5  ;;  %v2475_v0 = vsel %vm537_vm6, %v2425_v32, 0.0 }
 0x995   :  { %v2297_v35 = vpop.xlane.xlu1 %2296 }
 0x996   :  { %v2365_v58 = vmul.f32 0.037037037, %v2297_v35  ;;  %2470 = vadd.xlane.f32.xlu1 %v2469_v7  ;;  %2473 = vadd.xlane.f32.xlu0 %v2472_v37  ;;  %v6919_v26 = vsub.f32 %v6736_v6, %v2364_v15  ;;  %v2478_v29 = vsel %vm537_vm6, %v2426_v39, 0.0  ;;  %v2427_v2 = vmul.f32 %v6916_v45, %v6916_v45 }
 0x997   :  { %v2300_v12 = vpop.xlane.xlu0 %2299 }
 0x998   :  { %v2366_v8 = vmul.f32 0.037037037, %v2300_v12  ;;  %v6922_v44 = vsub.f32 %v6743_v21, %v2365_v58  ;;  %v2428_v5 = vmul.f32 %v6919_v26, %v6919_v26  ;;  %v2481_v39 = vsel %vm537_vm6, %v2427_v2, 0.0 }
 0x999   :  { %v2303_v3 = vpop.xlane.xlu1 %2302 }
 0x99a   :  { %v2367_v33 = vmul.f32 0.037037037, %v2303_v3  ;;  %2476 = vadd.xlane.f32.xlu1 %v2475_v0  ;;  %2479 = vadd.xlane.f32.xlu0 %v2478_v29  ;;  %v6931_v15 = vsub.f32 %v6733_v51, %v2366_v8  ;;  %v2429_v37 = vmul.f32 %v6922_v44, %v6922_v44  ;;  %v2484_v58 = vsel %vm537_vm6, %v2428_v5, 0.0 }
 0x99b   :  { %v2306_v7 = vpop.xlane.xlu0 %2305 }
 0x99c   :  { %v2368_v35 = vmul.f32 0.037037037, %v2306_v7  ;;  %v2430_v12 = vmul.f32 %v6931_v15, %v6931_v15  ;;  %v6940_v3 = vsub.f32 %v6740_v19, %v2367_v33  ;;  %v2487_v51 = vsel %vm537_vm6, %v2429_v37, 0.0 }
 0x99d   :  { %v2309_v32 = vpop.xlane.xlu1 %2308 }
 0x99e   :  { %v2369_v0 = vmul.f32 0.037037037, %v2309_v32  ;;  %2482 = vadd.xlane.f32.xlu1 %v2481_v39  ;;  %2485 = vadd.xlane.f32.xlu0 %v2484_v58  ;;  %v6943_v8 = vsub.f32 %v6760_v53, %v2368_v35  ;;  %v2490_v2 = vsel %vm537_vm6, %v2430_v12, 0.0  ;;  %v2431_v5 = vmul.f32 %v6940_v3, %v6940_v3 }
 0x99f   :  { %v2312_v29 = vpop.xlane.xlu0 %2311 }
 0x9a0   :  { %v2370_v7 = vmul.f32 0.037037037, %v2312_v29  ;;  %v2432_v33 = vmul.f32 %v6943_v8, %v6943_v8  ;;  %v6952_v32 = vsub.f32 %v6767_v10, %v2369_v0  ;;  %v2493_v19 = vsel %vm537_vm6, %v2431_v5, 0.0 }
 0x9a1   :  { %v2315_v21 = vpop.xlane.xlu1 %2314 }
 0x9a2   :  { %v2371_v39 = vmul.f32 0.037037037, %v2315_v21  ;;  %2488 = vadd.xlane.f32.xlu1 %v2487_v51  ;;  %2491 = vadd.xlane.f32.xlu0 %v2490_v2  ;;  %v6955_v35 = vsub.f32 %v6757_v28, %v2370_v7  ;;  %v2496_v6 = vsel %vm537_vm6, %v2432_v33, 0.0  ;;  %v2433_v0 = vmul.f32 %v6952_v32, %v6952_v32 }
 0x9a3   :  { %v2318_v58 = vpop.xlane.xlu0 %2317 }
 0x9a4   :  { %v2372_v37 = vmul.f32 0.037037037, %v2318_v58  ;;  %v6958_v29 = vsub.f32 %v6764_v13, %v2371_v39  ;;  %v2434_v51 = vmul.f32 %v6955_v35, %v6955_v35  ;;  %v5002_v39 = vld [vmem:[#allocation13] sm:$0xff]   ;;  %v2499_v62 = vsel %vm537_vm6, %v2433_v0, 0.0 }
 0x9a5   :  { %v2321_v12 = vpop.xlane.xlu1 %2320  ;;  %4734 = vmatprep.subr.bf16.mxu1 %v5002_v39 }
 0x9a6   :  { %v2373_v21 = vmul.f32 0.037037037, %v2321_v12  ;;  %2494 = vadd.xlane.f32.xlu1 %v2493_v19  ;;  %2497 = vadd.xlane.f32.xlu0 %v2496_v6  ;;  %v6967_v7 = vsub.f32 %v6784_v34, %v2372_v37  ;;  %v2435_v5 = vmul.f32 %v6958_v29, %v6958_v29  ;;  %v2502_v14 = vsel %vm537_vm6, %v2434_v51, 0.0  ;;  %v5003_v19 = vld [vmem:[#allocation13 + $0x8] sm:$0x3f]  }
 0x9a7   :  { %v2324_v2 = vpop.xlane.xlu0 %2323  ;;  %4735 = vmatpush3.bf16.msra.mxu1 %v5002_v39 }
 0x9a8   :  { %v2374_v58 = vmul.f32 0.037037037, %v2324_v2  ;;  %v6972_v33 = vsub.f32 %v6791_v20, %v2373_v21  ;;  %v2436_v6 = vmul.f32 %v6967_v7, %v6967_v7  ;;  %v2828_v21 = vand.u32 %v5003_v19, %v8049_v9 }
 0x9a9   :  { %v2327_v36 = vpop.xlane.xlu1 %2326  ;;  %v2505_v56 = vsel %vm537_vm6, %v2435_v5, 0.0 }
 0x9aa   :  { %v2375_v37 = vmul.f32 0.037037037, %v2327_v36  ;;  %2500 = vadd.xlane.f32.xlu1 %v2499_v62  ;;  %2503 = vadd.xlane.f32.xlu0 %v2502_v14  ;;  %v6979_v12 = vsub.f32 %v6781_v31, %v2374_v58  ;;  %v2437_v0 = vmul.f32 %v6972_v33, %v6972_v33  ;;  %v2508_v43 = vsel %vm537_vm6, %v2436_v6, 0.0 }
 0x9ab   :  { %v2336_v2 = vpop.xlane.xlu0 %2335  ;;  %4736 = vmatprep.subr.bf16.mxu1 %v2828_v21 }
 0x9ac   :  { %v2378_v51 = vmul.f32 0.037037037, %v2336_v2  ;;  %v2438_v62 = vmul.f32 %v6979_v12, %v6979_v12  ;;  %v6989_v36 = vsub.f32 %v6788_v17, %v2375_v37  ;;  %4737 = vmatpush3.bf16.msra.mxu1 %v2828_v21  ;;  %v2511_v39 = vsel %vm537_vm6, %v2437_v0, 0.0 }
 0x9ad   :  { %v2339_v42 = vpop.xlane.xlu1 %2338 }
 0x9ae   :  { %2506 = vadd.xlane.f32.xlu1 %v2505_v56  ;;  %2509 = vadd.xlane.f32.xlu0 %v2508_v43  ;;  %v2379_v58 = vmul.f32 0.037037037, %v2339_v42  ;;  %v2514_v19 = vsel %vm537_vm6, %v2438_v62, 0.0  ;;  %v2439_v6 = vmul.f32 %v6989_v36, %v6989_v36  ;;  %v6996_v2 = vsub.f32 %v6804_v22, %v2378_v51 }
 0x9af   :  { %v2330_v14 = vpop.xlane.xlu0 %2329 }
 0x9b0   :  { %v2376_v9 = vmul.f32 0.037037037, %v2330_v14  ;;  %v2517_v14 = vsel %vm537_vm6, %v2439_v6, 0.0  ;;  %v2442_v51 = vmul.f32 %v6996_v2, %v6996_v2 }
 0x9b1   :  { %v2333_v5 = vpop.xlane.xlu1 %2332 }
 0x9b2   :  { %v2377_v37 = vmul.f32 0.037037037, %v2333_v5  ;;  %2512 = vadd.xlane.f32.xlu1 %v2511_v39  ;;  %2515 = vadd.xlane.f32.xlu0 %v2514_v19  ;;  %v6999_v43 = vsub.f32 %v6808_v63, %v2376_v9  ;;  %v7010_v39 = vsub.f32 %v6814_v57, %v2379_v58  ;;  %v2526_v58 = vsel %vm537_vm6, %v2442_v51, 0.0 }
 0x9b3   :  { %v2342_v56 = vpop.xlane.xlu0 %2341 }
 0x9b4   :  { %v2380_v21 = vmul.f32 0.037037037, %v2342_v56  ;;  %v2440_v42 = vmul.f32 %v6999_v43, %v6999_v43  ;;  %v7004_v0 = vsub.f32 %v6819_v54, %v2377_v37  ;;  %v2443_v6 = vmul.f32 %v7010_v39, %v7010_v39 }
 0x9b5   :  { %v2345_v62 = vpop.xlane.xlu1 %2344 }
 0x9b6   :  { %v2381_v5 = vmul.f32 0.037037037, %v2345_v62  ;;  %2518 = vadd.xlane.f32.xlu1 %v2517_v14  ;;  %v2520_v9 = vsel %vm537_vm6, %v2440_v42, 0.0  ;;  %v2441_v19 = vmul.f32 %v7004_v0, %v7004_v0  ;;  %v7016_v56 = vsub.f32 %v6826_v23, %v2380_v21 }
 0x9b7   :  { %2521 = vadd.xlane.f32.xlu0 %v2520_v9  ;;  %v2529_v62 = vsel %vm537_vm6, %v2443_v6, 0.0 }
 0x9b8   :  { %v2523_v37 = vsel %vm537_vm6, %v2441_v19, 0.0  ;;  %v7022_v22 = vsub.f32 %v6831_v41, %v2381_v5  ;;  %v2444_v42 = vmul.f32 %v7016_v56, %v7016_v56 }
 0x9ba   :  { %2524 = vadd.xlane.f32.xlu1 %v2523_v37  ;;  %v2445_v21 = vmul.f32 %v7022_v22, %v7022_v22  ;;  %v2532_v14 = vsel %vm537_vm6, %v2444_v42, 0.0 }
 0x9bb   :  { %2527 = vadd.xlane.f32.xlu0 %v2526_v58 }
 0x9bc   :  { %v2535_v9 = vsel %vm537_vm6, %v2445_v21, 0.0 }
 0x9be   :  { %2530 = vadd.xlane.f32.xlu1 %v2529_v62 }
 0x9bf   :  { %2533 = vadd.xlane.f32.xlu0 %v2532_v14 }
 0x9c2   :  { %2536 = vadd.xlane.f32.xlu1 %v2535_v9 }
 0xa0f   :  { %v2456_v5 = vpop.xlane.xlu0 %2455 }
 0xa10   :  { %v2546_v19 = vmul.f32 0.037037037, %v2456_v5 }
 0xa12   :  { %v2578_v37 = vadd.f32 1e-05, %v2546_v19 }
 0xa13   :  { %v2459_v51 = vpop.xlane.xlu1 %2458  ;;  %v2450_v41 = vpop.xlane.xlu0 %2449 }
 0xa14   :  { %v2547_v23 = vmul.f32 0.037037037, %v2459_v51  ;;  %v2544_v57 = vmul.f32 0.037037037, %v2450_v41  ;;  %5016 = vrsqrt.f32 %v2578_v37 }
 0xa16   :  { %v2579_v58 = vadd.f32 1e-05, %v2547_v23  ;;  %v2576_v6 = vadd.f32 1e-05, %v2544_v57 }
 0xa17   :  { %v2453_v54 = vpop.xlane.xlu1 %2452  ;;  %v2348_v63 = vpop.xlane.xlu0 %2347 }
 0xa18   :  { %5018 = vrsqrt.f32 %v2579_v58  ;;  %v2545_v62 = vmul.f32 0.037037037, %v2453_v54  ;;  %v2382_v17 = vmul.f32 0.037037037, %v2348_v63 }
 0xa19   :  { %5020 = vrsqrt.f32 %v2576_v6 }
 0xa1a   :  { %v2577_v42 = vadd.f32 1e-05, %v2545_v62  ;;  %v7033_v21 = vsub.f32 %v6860_v59, %v2382_v17  ;;  %v2674_v17 = vsub.s32 2, %v5631_v1 }
 0xa1b   :  { %v2351_v14 = vpop.xlane.xlu1 %2350  ;;  %v2462_v9 = vpop.xlane.xlu0 %2461 }
 0xa1c   :  { %5022 = vrsqrt.f32 %v2577_v42  ;;  %v2383_v5 = vmul.f32 0.037037037, %v2351_v14  ;;  %v2548_v19 = vmul.f32 0.037037037, %v2462_v9  ;;  %v2446_v41 = vmul.f32 %v7033_v21, %v7033_v21 }
 0xa1e   :  { %v7038_v57 = vsub.f32 %v6871_v16, %v2383_v5  ;;  %v2580_v23 = vadd.f32 1e-05, %v2548_v19  ;;  %v2538_v54 = vsel %vm537_vm6, %v2446_v41, 0.0  ;;  %v5017_v51 = vpop.eup %5016 }
 0xa1f   :  { %v2465_v63 = vpop.xlane.xlu1 %2464  ;;  %2539 = vadd.xlane.f32.xlu0 %v2538_v54  ;;  %v2468_v37 = vpop.xlane.xlu0 %2467  ;;  %v2642_v41 = vmul.f32 %v5017_v51, %v6840_v30 }
 0xa20   :  { %5024 = vrsqrt.f32 %v2580_v23  ;;  %v2549_v58 = vmul.f32 0.037037037, %v2465_v63  ;;  %v2550_v6 = vmul.f32 0.037037037, %v2468_v37  ;;  %v2447_v62 = vmul.f32 %v7038_v57, %v7038_v57 }
 0xa21   :  { %v7048_v23 = vrot.slane %v8050_v40, %v2674_v17  ;;  %v2710_v63 = vsub.s32 3, %v5631_v1 }
 0xa22   :  { %v5019_v42 = vpop.eup %5018  ;;  %v2581_v14 = vadd.f32 1e-05, %v2549_v58  ;;  %v2582_v9 = vadd.f32 1e-05, %v2550_v6  ;;  %v2541_v5 = vsel %vm537_vm6, %v2447_v62, 0.0 }
 0xa23   :  { %v5021_v19 = vpop.eup %5020  ;;  %v2643_v54 = vmul.f32 %v5019_v42, %v6849_v60  ;;  %2542 = vadd.xlane.f32.xlu1 %v2541_v5  ;;  %v2471_v16 = vpop.xlane.xlu1 %2470  ;;  %v7056_v5 = vrot.slane %v8050_v40, %v2710_v63 }
 0xa24   :  { %v2474_v59 = vpop.xlane.xlu0 %2473  ;;  %5026 = vrsqrt.f32 %v2581_v14  ;;  %v2551_v37 = vmul.f32 0.037037037, %v2471_v16  ;;  %v2640_v58 = vmul.f32 %v5021_v19, %v6843_v48  ;;  %v2678_v48 = vmul.f32 %v7048_v23, %v2642_v41 }
 0xa25   :  { %v2552_v31 = vmul.f32 0.037037037, %v2474_v59  ;;  %5028 = vrsqrt.f32 %v2582_v9  ;;  %v2679_v30 = vmul.f32 %v7048_v23, %v2643_v54 }
 0xa26   :  { %v5023_v6 = vpop.eup %5022  ;;  %v2583_v62 = vadd.f32 1e-05, %v2551_v37  ;;  %v2676_v17 = vmul.f32 %v7048_v23, %v2640_v58 }
 0xa27   :  { %v2584_v20 = vadd.f32 1e-05, %v2552_v31  ;;  %v2477_v60 = vpop.xlane.xlu1 %2476  ;;  %v2641_v42 = vmul.f32 %v5023_v6, %v6854_v61  ;;  %v2715_v54 = vadd.f32 %v7056_v5, %v2679_v30 }
 0xa28   :  { %v2480_v51 = vpop.xlane.xlu0 %2479  ;;  %5030 = vrsqrt.f32 %v2583_v62  ;;  %v2553_v16 = vmul.f32 0.037037037, %v2477_v60  ;;  %v2712_v58 = vadd.f32 %v7056_v5, %v2676_v17 }
 0xa29   :  { %v2554_v59 = vmul.f32 0.037037037, %v2480_v51  ;;  %5032 = vrsqrt.f32 %v2584_v20  ;;  %v2677_v14 = vmul.f32 %v7048_v23, %v2641_v42  ;;  %v2714_v20 = vadd.f32 %v7056_v5, %v2678_v48 }
 0xa2a   :  { %v5025_v31 = vpop.eup %5024  ;;  %v2585_v9 = vadd.f32 1e-05, %v2553_v16 }
 0xa2b   :  { %v2586_v19 = vadd.f32 1e-05, %v2554_v59  ;;  %v2483_v37 = vpop.xlane.xlu1 %2482  ;;  %v2713_v63 = vadd.f32 %v7056_v5, %v2677_v14  ;;  %v2644_v6 = vmul.f32 %v5025_v31, %v6867_v4  ;;  %v2745_v59 = vpack.c.bf16 %v2715_v54, %v2714_v20 }
 0xa2c   :  { %v2486_v61 = vpop.xlane.xlu0 %2485  ;;  %5034 = vrsqrt.f32 %v2585_v9  ;;  %v2555_v62 = vmul.f32 0.037037037, %v2483_v37 }
 0xa2d   :  { %v2556_v60 = vmul.f32 0.037037037, %v2486_v61  ;;  %5036 = vrsqrt.f32 %v2586_v19  ;;  %v2744_v41 = vpack.c.bf16 %v2713_v63, %v2712_v58  ;;  %v2680_v4 = vmul.f32 %v7048_v23, %v2644_v6 }
 0xa2e   :  { %v5027_v51 = vpop.eup %5026  ;;  %v2587_v42 = vadd.f32 1e-05, %v2555_v62 }
 0xa2f   :  { %v2588_v16 = vadd.f32 1e-05, %v2556_v60  ;;  %v5029_v30 = vpop.eup %5028  ;;  %v2489_v34 = vpop.xlane.xlu1 %2488  ;;  %4738 = vmatprep.mubr.msk.bf16.mxu1 %vm537_vm6, %v2744_v41  ;;  %v2645_v14 = vmul.f32 %v5027_v51, %v6879_v27  ;;  %v2716_v27 = vadd.f32 %v7056_v5, %v2680_v4 }
 0xa30   :  { %v2492_v17 = vpop.xlane.xlu0 %2491  ;;  %5038 = vrsqrt.f32 %v2587_v42  ;;  %v2557_v31 = vmul.f32 0.037037037, %v2489_v34  ;;  %4739 = vmatmul.mubr.msk.bf16.vlgmr.msra.gmra.mrb[4].mxu1 %vm537_vm6, %v2745_v59  ;;  %v2646_v48 = vmul.f32 %v5029_v30, %v6882_v11 }
 0xa31   :  { %v2558_v9 = vmul.f32 0.037037037, %v2492_v17  ;;  %5040 = vrsqrt.f32 %v2588_v16  ;;  %v2681_v19 = vmul.f32 %v7048_v23, %v2645_v14 }
 0xa32   :  { %v5031_v54 = vpop.eup %5030  ;;  %v2589_v37 = vadd.f32 1e-05, %v2557_v31  ;;  %v2682_v60 = vmul.f32 %v7048_v23, %v2646_v48 }
 0xa33   :  { %v2590_v61 = vadd.f32 1e-05, %v2558_v9  ;;  %v5033_v58 = vpop.eup %5032  ;;  %v2495_v63 = vpop.xlane.xlu1 %2494  ;;  %v2717_v6 = vadd.f32 %v7056_v5, %v2681_v19  ;;  %v2647_v34 = vmul.f32 %v5031_v54, %v6885_v25 }
 0xa34   :  { %v2498_v62 = vpop.xlane.xlu0 %2497  ;;  %5042 = vrsqrt.f32 %v2589_v37  ;;  %v2559_v20 = vmul.f32 0.037037037, %v2495_v63  ;;  %v2648_v42 = vmul.f32 %v5033_v58, %v6895_v50  ;;  %v2718_v25 = vadd.f32 %v7056_v5, %v2682_v60 }
 0xa35   :  { %v2560_v11 = vmul.f32 0.037037037, %v2498_v62  ;;  %5044 = vrsqrt.f32 %v2590_v61  ;;  %v2746_v41 = vpack.c.bf16 %v2717_v6, %v2716_v27  ;;  %v2683_v51 = vmul.f32 %v7048_v23, %v2647_v34 }
 0xa36   :  { %v5035_v16 = vpop.eup %5034  ;;  %v2591_v59 = vadd.f32 1e-05, %v2559_v20  ;;  %v2684_v48 = vmul.f32 %v7048_v23, %v2648_v42 }
 0xa37   :  { %v2592_v30 = vadd.f32 1e-05, %v2560_v11  ;;  %v5037_v17 = vpop.eup %5036  ;;  %v2501_v14 = vpop.xlane.xlu1 %2500  ;;  %4742 = vmatprep.mubr.msk.bf16.mxu1 %vm537_vm6, %v2746_v41  ;;  %v2719_v31 = vadd.f32 %v7056_v5, %v2683_v51  ;;  %v2649_v9 = vmul.f32 %v5035_v16, %v6904_v24 }
 0xa38   :  { %v2504_v4 = vpop.xlane.xlu0 %2503  ;;  %5046 = vrsqrt.f32 %v2591_v59  ;;  %v2561_v19 = vmul.f32 0.037037037, %v2501_v14  ;;  %v2650_v50 = vmul.f32 %v5037_v17, %v6907_v18  ;;  %v2720_v24 = vadd.f32 %v7056_v5, %v2684_v48 }
 0xa39   :  { %v2562_v54 = vmul.f32 0.037037037, %v2504_v4  ;;  %5048 = vrsqrt.f32 %v2592_v30  ;;  %v2747_v37 = vpack.c.bf16 %v2719_v31, %v2718_v25  ;;  %v2685_v61 = vmul.f32 %v7048_v23, %v2649_v9 }
 0xa3a   :  { %v5039_v58 = vpop.eup %5038  ;;  %v2593_v63 = vadd.f32 1e-05, %v2561_v19  ;;  %v2686_v18 = vmul.f32 %v7048_v23, %v2650_v50 }
 0xa3b   :  { %v2594_v62 = vadd.f32 1e-05, %v2562_v54  ;;  %v5041_v27 = vpop.eup %5040  ;;  %v2507_v6 = vpop.xlane.xlu1 %2506  ;;  %4743 = vmatmul.mubr.msk.bf16.gmra.mrb[8].mxu1 %vm537_vm6, %v2747_v37  ;;  %v2721_v60 = vadd.f32 %v7056_v5, %v2685_v61  ;;  %v2651_v20 = vmul.f32 %v5039_v58, %v6916_v45 }
 0xa3c   :  { %v2510_v34 = vpop.xlane.xlu0 %2509  ;;  %5050 = vrsqrt.f32 %v2593_v63  ;;  %v2563_v11 = vmul.f32 0.037037037, %v2507_v6  ;;  %v2652_v16 = vmul.f32 %v5041_v27, %v6919_v26  ;;  %v2722_v45 = vadd.f32 %v7056_v5, %v2686_v18 }
 0xa3d   :  { %v2564_v41 = vmul.f32 0.037037037, %v2510_v34  ;;  %5052 = vrsqrt.f32 %v2594_v62  ;;  %v2748_v51 = vpack.c.bf16 %v2721_v60, %v2720_v24  ;;  %v2687_v42 = vmul.f32 %v7048_v23, %v2651_v20 }
 0xa3e   :  { %v5043_v59 = vpop.eup %5042  ;;  %v2595_v30 = vadd.f32 1e-05, %v2563_v11  ;;  %v2688_v48 = vmul.f32 %v7048_v23, %v2652_v16 }
 0xa3f   :  { %v2596_v17 = vadd.f32 1e-05, %v2564_v41  ;;  %v5045_v14 = vpop.eup %5044  ;;  %v2513_v4 = vpop.xlane.xlu1 %2512  ;;  %4746 = vmatprep.mubr.msk.bf16.mxu1 %vm537_vm6, %v2748_v51  ;;  %v2723_v31 = vadd.f32 %v7056_v5, %v2687_v42  ;;  %v2653_v9 = vmul.f32 %v5043_v59, %v6922_v44 }
 0xa40   :  { %v2516_v25 = vpop.xlane.xlu0 %2515  ;;  %5054 = vrsqrt.f32 %v2595_v30  ;;  %v2565_v19 = vmul.f32 0.037037037, %v2513_v4  ;;  %v2654_v26 = vmul.f32 %v5045_v14, %v6931_v15  ;;  %v2724_v44 = vadd.f32 %v7056_v5, %v2688_v48 }
 0xa41   :  { %v2566_v54 = vmul.f32 0.037037037, %v2516_v25  ;;  %5056 = vrsqrt.f32 %v2596_v17  ;;  %v2749_v50 = vpack.c.bf16 %v2723_v31, %v2722_v45  ;;  %v2689_v37 = vmul.f32 %v7048_v23, %v2653_v9  ;;  %v5004_v31 = vld [vmem:[#allocation15] sm:$0xff]   ;;  %v5005_v9 = vld [vmem:[#allocation15 + $0x8] sm:$0xff]  }
 0xa42   :  { %v5047_v61 = vpop.eup %5046  ;;  %v2597_v58 = vadd.f32 1e-05, %v2565_v19  ;;  %v2690_v24 = vmul.f32 %v7048_v23, %v2654_v26  ;;  %4770 = vmatprep.subr.bf16.mxu0 %v5004_v31 }
 0xa43   :  { %v2598_v63 = vadd.f32 1e-05, %v2566_v54  ;;  %v5049_v62 = vpop.eup %5048  ;;  %v2519_v27 = vpop.xlane.xlu1 %2518  ;;  %4747 = vmatmul.mubr.msk.bf16.gmra.mrb[12].mxu1 %vm537_vm6, %v2749_v50  ;;  %v2725_v6 = vadd.f32 %v7056_v5, %v2689_v37  ;;  %v2655_v34 = vmul.f32 %v5047_v61, %v6940_v3  ;;  %4771 = vmatpush3.bf16.msra.mxu0 %v5004_v31 }
 0xa44   :  { %5058 = vrsqrt.f32 %v2597_v58  ;;  %v2567_v15 = vmul.f32 0.037037037, %v2519_v27  ;;  %v2522_v60 = vpop.xlane.xlu0 %2521  ;;  %v2656_v20 = vmul.f32 %v5049_v62, %v6943_v8  ;;  %v2726_v3 = vadd.f32 %v7056_v5, %v2690_v24  ;;  %4772 = vmatprep.subr.bf16.mxu0 %v5005_v9 }
 0xa45   :  { %5060 = vrsqrt.f32 %v2598_v63  ;;  %v2568_v18 = vmul.f32 0.037037037, %v2522_v60  ;;  %v2750_v11 = vpack.c.bf16 %v2725_v6, %v2724_v44  ;;  %v2691_v41 = vmul.f32 %v7048_v23, %v2655_v34  ;;  %v5006_v34 = vld [vmem:[#allocation15 + $0x10] sm:$0xff]  }
 0xa46   :  { %v5051_v51 = vpop.eup %5050  ;;  %v2599_v42 = vadd.f32 1e-05, %v2567_v15  ;;  %v2692_v16 = vmul.f32 %v7048_v23, %v2656_v20 }
 0xa47   :  { %v5053_v59 = vpop.eup %5052  ;;  %v2600_v30 = vadd.f32 1e-05, %v2568_v18  ;;  %v2525_v17 = vpop.xlane.xlu1 %2524  ;;  %4750 = vmatprep.mubr.msk.bf16.mxu1 %vm537_vm6, %v2750_v11  ;;  %v2727_v14 = vadd.f32 %v7056_v5, %v2691_v41  ;;  %v2657_v8 = vmul.f32 %v5051_v51, %v6952_v32  ;;  %4773 = vmatpush3.bf16.msra.mxu0 %v5005_v9 }
 0xa48   :  { %5062 = vrsqrt.f32 %v2599_v42  ;;  %v2569_v4 = vmul.f32 0.037037037, %v2525_v17  ;;  %v2528_v25 = vpop.xlane.xlu0 %2527  ;;  %v2658_v45 = vmul.f32 %v5053_v59, %v6955_v35  ;;  %v2728_v37 = vadd.f32 %v7056_v5, %v2692_v16  ;;  %4774 = vmatprep.subr.bf16.mxu0 %v5006_v34  ;;  %v5007_v17 = vld [vmem:[#allocation15 + $0x18] sm:$0xff]  }
 0xa49   :  { %5064 = vrsqrt.f32 %v2600_v30  ;;  %v2570_v48 = vmul.f32 0.037037037, %v2528_v25  ;;  %v2751_v19 = vpack.c.bf16 %v2727_v14, %v2726_v3  ;;  %v2693_v54 = vmul.f32 %v7048_v23, %v2657_v8 }
 0xa4a   :  { %v5055_v26 = vpop.eup %5054  ;;  %v2601_v50 = vadd.f32 1e-05, %v2569_v4  ;;  %v2694_v62 = vmul.f32 %v7048_v23, %v2658_v45 }
 0xa4b   :  { %v5057_v61 = vpop.eup %5056  ;;  %v2602_v58 = vadd.f32 1e-05, %v2570_v48  ;;  %v2531_v32 = vpop.xlane.xlu1 %2530  ;;  %4751 = vmatmul.mubr.msk.bf16.gmra.mrb[16].mxu1 %vm537_vm6, %v2751_v19  ;;  %v2729_v63 = vadd.f32 %v7056_v5, %v2693_v54  ;;  %v2659_v35 = vmul.f32 %v5055_v26, %v6958_v29  ;;  %4775 = vmatpush3.bf16.msra.mxu0 %v5006_v34  ;;  %v5008_v48 = vld [vmem:[#allocation15 + $0x20] sm:$0xff]  }
 0xa4c   :  { %5066 = vrsqrt.f32 %v2601_v50  ;;  %v2571_v27 = vmul.f32 0.037037037, %v2531_v32  ;;  %v2534_v44 = vpop.xlane.xlu0 %2533  ;;  %v2660_v6 = vmul.f32 %v5057_v61, %v6967_v7  ;;  %v2730_v42 = vadd.f32 %v7056_v5, %v2694_v62  ;;  %4776 = vmatprep.subr.bf16.mxu0 %v5007_v17 }
 0xa4d   :  { %5068 = vrsqrt.f32 %v2602_v58  ;;  %v2572_v24 = vmul.f32 0.037037037, %v2534_v44  ;;  %v2752_v15 = vpack.c.bf16 %v2729_v63, %v2728_v37  ;;  %v2695_v60 = vmul.f32 %v7048_v23, %v2659_v35 }
 0xa4e   :  { %v5059_v20 = vpop.eup %5058  ;;  %v2603_v18 = vadd.f32 1e-05, %v2571_v27  ;;  %v2696_v11 = vmul.f32 %v7048_v23, %v2660_v6 }
 0xa4f   :  { %v5061_v29 = vpop.eup %5060  ;;  %v2604_v41 = vadd.f32 1e-05, %v2572_v24  ;;  %v2537_v51 = vpop.xlane.xlu1 %2536  ;;  %4754 = vmatprep.mubr.msk.bf16.mxu1 %vm537_vm6, %v2752_v15  ;;  %v2731_v7 = vadd.f32 %v7056_v5, %v2695_v60  ;;  %v2661_v16 = vmul.f32 %v5059_v20, %v6972_v33  ;;  %4777 = vmatpush3.bf16.msra.mxu0 %v5007_v17 }
 0xa50   :  { %5070 = vrsqrt.f32 %v2603_v18  ;;  %v2573_v59 = vmul.f32 0.037037037, %v2537_v51  ;;  %v2662_v30 = vmul.f32 %v5061_v29, %v6979_v12  ;;  %v2732_v25 = vadd.f32 %v7056_v5, %v2696_v11  ;;  %4778 = vmatprep.subr.bf16.mxu0 %v5008_v48 }
 0xa51   :  { %5072 = vrsqrt.f32 %v2604_v41  ;;  %v2753_v3 = vpack.c.bf16 %v2731_v7, %v2730_v42  ;;  %v2697_v14 = vmul.f32 %v7048_v23, %v2661_v16  ;;  %v5009_v42 = vld [vmem:[#allocation15 + $0x28] sm:$0xff]   ;;  %v5010_v7 = vld [vmem:[#allocation15 + $0x30] sm:$0x3f]  }
 0xa52   :  { %v5063_v8 = vpop.eup %5062  ;;  %v2605_v4 = vadd.f32 1e-05, %v2573_v59  ;;  %v2698_v9 = vmul.f32 %v7048_v23, %v2662_v30 }
 0xa53   :  { %v5065_v45 = vpop.eup %5064  ;;  %4755 = vmatmul.mubr.msk.bf16.gmra.mrb[20].mxu1 %vm537_vm6, %v2753_v3  ;;  %v2733_v33 = vadd.f32 %v7056_v5, %v2697_v14  ;;  %v2663_v31 = vmul.f32 %v5063_v8, %v6989_v36  ;;  %4779 = vmatpush3.bf16.msra.mxu0 %v5008_v48 }
 0xa54   :  { %5074 = vrsqrt.f32 %v2605_v4  ;;  %v2664_v12 = vmul.f32 %v5065_v45, %v6999_v43  ;;  %v2734_v61 = vadd.f32 %v7056_v5, %v2698_v9  ;;  %4780 = vmatprep.subr.bf16.mxu0 %v5009_v42 }
 0xa55   :  { %v2754_v19 = vpack.c.bf16 %v2733_v33, %v2732_v25  ;;  %v2699_v54 = vmul.f32 %v7048_v23, %v2663_v31 }
 0xa56   :  { %v5067_v26 = vpop.eup %5066  ;;  %v2700_v50 = vmul.f32 %v7048_v23, %v2664_v12 }
 0xa57   :  { %v5069_v37 = vpop.eup %5068  ;;  %4758 = vmatprep.mubr.msk.bf16.mxu1 %vm537_vm6, %v2754_v19  ;;  %v2735_v36 = vadd.f32 %v7056_v5, %v2699_v54  ;;  %v2665_v58 = vmul.f32 %v5067_v26, %v7004_v0  ;;  %4781 = vmatpush3.bf16.msra.mxu0 %v5009_v42  ;;  %v2766_v19 = vsub.s32 7, %v5631_v1 }
 0xa58   :  { %v2666_v43 = vmul.f32 %v5069_v37, %v6996_v2  ;;  %v2736_v62 = vadd.f32 %v7056_v5, %v2700_v50  ;;  %4829 = vmatprep.subr.msk.bf16.mxu0 %vm1107_vm12, %v5010_v7 }
 0xa59   :  { %v2755_v32 = vpack.c.bf16 %v2735_v36, %v2734_v61  ;;  %v2701_v63 = vmul.f32 %v7048_v23, %v2665_v58  ;;  %v7168_v54 = vrot.slane %v8050_v40, %v2766_v19 }
 0xa5a   :  { %v5071_v35 = vpop.eup %5070  ;;  %v2702_v34 = vmul.f32 %v7048_v23, %v2666_v43 }
 0xa5b   :  { %v5073_v27 = vpop.eup %5072  ;;  %4759 = vmatmul.mubr.msk.bf16.gmra.mrb[24].mxu1 %vm537_vm6, %v2755_v32  ;;  %v2737_v44 = vadd.f32 %v7056_v5, %v2701_v63  ;;  %v2667_v6 = vmul.f32 %v5071_v35, %v7010_v39 }
 0xa5c   :  { %v2668_v0 = vmul.f32 %v5073_v27, %v7016_v56  ;;  %v2738_v60 = vadd.f32 %v7056_v5, %v2702_v34 }
 0xa5d   :  { %v2756_v2 = vpack.c.bf16 %v2737_v44, %v2736_v62  ;;  %v2703_v24 = vmul.f32 %v7048_v23, %v2667_v6 }
 0xa5e   :  { %v5075_v15 = vpop.eup %5074  ;;  %v2704_v11 = vmul.f32 %v7048_v23, %v2668_v0 }
 0xa5f   :  { %4762 = vmatprep.mubr.msk.bf16.mxu1 %vm537_vm6, %v2756_v2  ;;  %v2739_v20 = vadd.f32 %v7056_v5, %v2703_v24  ;;  %v2669_v18 = vmul.f32 %v5075_v15, %v7022_v22  ;;  %v3148_v22 = vsel %vm1107_vm12, %v5010_v7, 0 }
 0xa60   :  { %v2740_v56 = vadd.f32 %v7056_v5, %v2704_v11  ;;  %4783 = vmatpush3.bf16.msra.mxu0 %v3148_v22 }
 0xa61   :  { %v2757_v39 = vpack.c.bf16 %v2739_v20, %v2738_v60  ;;  %v2705_v29 = vmul.f32 %v7048_v23, %v2669_v18 }
 0xa63   :  { %4763 = vmatmul.mubr.msk.bf16.gmra.mrb[28].mxu1 %vm537_vm6, %v2757_v39  ;;  %v2741_v41 = vadd.f32 %v7056_v5, %v2705_v29 }
 0xa65   :  { %v2758_v51 = vpack.c.bf16 %v2741_v41, %v2740_v56 }
 0xa67   :  { %4766 = vmatprep.mubr.msk.bf16.mxu1 %vm537_vm6, %v2758_v51 }
 0xaac   :  { %v2540_v16 = vpop.xlane.xlu0 %2539 }
 0xaad   :  { %v2574_v59 = vmul.f32 0.037037037, %v2540_v16 }
 0xaaf   :  { %v2606_v30 = vadd.f32 1e-05, %v2574_v59 }
 0xab0   :  { %v2543_v17 = vpop.xlane.xlu1 %2542 }
 0xab1   :  { %5076 = vrsqrt.f32 %v2606_v30  ;;  %v2575_v3 = vmul.f32 0.037037037, %v2543_v17 }
 0xab3   :  { %v2607_v14 = vadd.f32 1e-05, %v2575_v3 }
 0xab5   :  { %5078 = vrsqrt.f32 %v2607_v14 }
 0xabb   :  { %v5077_v8 = vpop.eup %5076 }
 0xabc   :  { %v2670_v4 = vmul.f32 %v5077_v8, %v7033_v21 }
 0xabe   :  { %v2706_v33 = vmul.f32 %v7048_v23, %v2670_v4 }
 0xabf   :  { %v5079_v25 = vpop.eup %5078 }
 0xac0   :  { %v2671_v45 = vmul.f32 %v5079_v25, %v7038_v57  ;;  %v2742_v9 = vadd.f32 %v7056_v5, %v2706_v33 }
 0xac2   :  { %v2707_v31 = vmul.f32 %v7048_v23, %v2671_v45 }
 0xac4   :  { %v2743_v12 = vadd.f32 %v7056_v5, %v2707_v31 }
 0xac6   :  { %v2759_v48 = vpack.c.bf16 %v2743_v12, %v2742_v9 }
 0xac8   :  { %4767 = vmatmul.mubr.msk.bf16.gmra.mrb[32].mxu1 %vm537_vm6, %v2759_v48 }
 0xb03   :  { %v4740_v21 = vpop.f32.mrb[4].mxu1 }
 0xb04   :  { %v2873_v26 = vadd.f32 %v4740_v21, %v7168_v54  ;;  %v2864_v57 = vpop.f32.mrb[5].mxu1 }
 0xb05   :  { %v2865_v50 = vadd.f32 %v2864_v57, %v7168_v54  ;;  %v4741_v37 = vpop.f32.mrb[6].mxu1 }
 0xb06   :  { %v2876_v23 = vadd.f32 %v4741_v37, %v7168_v54  ;;  %v2867_v61 = vpop.f32.mrb[7].mxu1  ;;  %v2993_v36 = vmax.f32 %v2873_v26, 0.0 }
 0xb07   :  { %v2868_v5 = vadd.f32 %v2867_v61, %v7168_v54  ;;  %v2991_v43 = vmax.f32 %v2865_v50, 0.0 }
 0xb08   :  { %v2994_v58 = vmax.f32 %v2876_v23, 0.0 }
 0xb09   :  { %v2992_v32 = vmax.f32 %v2868_v5, 0.0 }
 0xb0a   :  { %v3024_v63 = vpack.c.bf16 %v2994_v58, %v2993_v36 }
 0xb0b   :  { %v3023_v35 = vpack.c.bf16 %v2992_v32, %v2991_v43 }
 0xb0d   :  { %4784 = vmatprep.mubr.msk.bf16.mxu0 %vm3098_vm0, %v3023_v35 }
 0xb0e   :  { %v4744_v62 = vpop.f32.mrb[8].mxu1  ;;  %4785 = vmatmul.mubr.msk.bf16.vlgmr.msra.gmra.mrb[28].mxu0 %vm3098_vm0, %v3024_v63 }
 0xb0f   :  { %v2889_v27 = vadd.f32 %v4744_v62, %v7168_v54  ;;  %v2880_v44 = vpop.f32.mrb[9].mxu1 }
 0xb10   :  { %v2881_v6 = vadd.f32 %v2880_v44, %v7168_v54  ;;  %v4745_v34 = vpop.f32.mrb[10].mxu1 }
 0xb11   :  { %v2892_v0 = vadd.f32 %v4745_v34, %v7168_v54  ;;  %v2883_v2 = vpop.f32.mrb[11].mxu1  ;;  %v2997_v15 = vmax.f32 %v2889_v27, 0.0 }
 0xb12   :  { %v2884_v24 = vadd.f32 %v2883_v2, %v7168_v54  ;;  %v2995_v20 = vmax.f32 %v2881_v6, 0.0 }
 0xb13   :  { %v2998_v60 = vmax.f32 %v2892_v0, 0.0 }
 0xb14   :  { %v2996_v18 = vmax.f32 %v2884_v24, 0.0 }
 0xb15   :  { %v3026_v11 = vpack.c.bf16 %v2998_v60, %v2997_v15 }
 0xb16   :  { %v3025_v39 = vpack.c.bf16 %v2996_v18, %v2995_v20  ;;  %v4748_v29 = vpop.f32.mrb[12].mxu1 }
 0xb17   :  { %v2905_v56 = vadd.f32 %v4748_v29, %v7168_v54  ;;  %v2896_v41 = vpop.f32.mrb[13].mxu1 }
 0xb18   :  { %v2897_v51 = vadd.f32 %v2896_v41, %v7168_v54  ;;  %v4749_v42 = vpop.f32.mrb[14].mxu1  ;;  %4788 = vmatprep.mubr.msk.bf16.mxu0 %vm3098_vm0, %v3025_v39 }
 0xb19   :  { %v2908_v7 = vadd.f32 %v4749_v42, %v7168_v54  ;;  %v2899_v22 = vpop.f32.mrb[15].mxu1  ;;  %4789 = vmatmul.mubr.msk.bf16.gmra.mrb[32].mxu0 %vm3098_vm0, %v3026_v11  ;;  %v3001_v59 = vmax.f32 %v2905_v56, 0.0 }
 0xb1a   :  { %v2900_v16 = vadd.f32 %v2899_v22, %v7168_v54  ;;  %v2999_v17 = vmax.f32 %v2897_v51, 0.0 }
 0xb1b   :  { %v3002_v30 = vmax.f32 %v2908_v7, 0.0 }
 0xb1c   :  { %v3000_v3 = vmax.f32 %v2900_v16, 0.0 }
 0xb1d   :  { %v3028_v14 = vpack.c.bf16 %v3002_v30, %v3001_v59 }
 0xb1e   :  { %v3027_v8 = vpack.c.bf16 %v3000_v3, %v2999_v17  ;;  %v4752_v4 = vpop.f32.mrb[16].mxu1 }
 0xb1f   :  { %v2921_v25 = vadd.f32 %v4752_v4, %v7168_v54  ;;  %v2912_v45 = vpop.f32.mrb[17].mxu1 }
 0xb20   :  { %v2913_v33 = vadd.f32 %v2912_v45, %v7168_v54  ;;  %v4753_v31 = vpop.f32.mrb[18].mxu1  ;;  %4792 = vmatprep.mubr.msk.bf16.mxu0 %vm3098_vm0, %v3027_v8 }
 0xb21   :  { %v2924_v9 = vadd.f32 %v4753_v31, %v7168_v54  ;;  %v2915_v12 = vpop.f32.mrb[19].mxu1  ;;  %4793 = vmatmul.mubr.msk.bf16.gmra.mrb[36].mxu0 %vm3098_vm0, %v3028_v14  ;;  %v3005_v19 = vmax.f32 %v2921_v25, 0.0 }
 0xb22   :  { %v2916_v48 = vadd.f32 %v2915_v12, %v7168_v54  ;;  %v3003_v26 = vmax.f32 %v2913_v33, 0.0 }
 0xb23   :  { %v3006_v21 = vmax.f32 %v2924_v9, 0.0 }
 0xb24   :  { %v3004_v57 = vmax.f32 %v2916_v48, 0.0 }
 0xb25   :  { %v3030_v50 = vpack.c.bf16 %v3006_v21, %v3005_v19 }
 0xb26   :  { %v3029_v37 = vpack.c.bf16 %v3004_v57, %v3003_v26  ;;  %v4756_v23 = vpop.f32.mrb[20].mxu1 }
 0xb27   :  { %v2937_v61 = vadd.f32 %v4756_v23, %v7168_v54  ;;  %v2928_v5 = vpop.f32.mrb[21].mxu1 }
 0xb28   :  { %v2929_v36 = vadd.f32 %v2928_v5, %v7168_v54  ;;  %v4757_v58 = vpop.f32.mrb[22].mxu1  ;;  %4796 = vmatprep.mubr.msk.bf16.mxu0 %vm3098_vm0, %v3029_v37 }
 0xb29   :  { %v2940_v43 = vadd.f32 %v4757_v58, %v7168_v54  ;;  %v2931_v32 = vpop.f32.mrb[23].mxu1  ;;  %4797 = vmatmul.mubr.msk.bf16.gmra.mrb[40].mxu0 %vm3098_vm0, %v3030_v50  ;;  %v3009_v35 = vmax.f32 %v2937_v61, 0.0 }
 0xb2a   :  { %v2932_v63 = vadd.f32 %v2931_v32, %v7168_v54  ;;  %v3007_v27 = vmax.f32 %v2929_v36, 0.0 }
 0xb2b   :  { %v3010_v62 = vmax.f32 %v2940_v43, 0.0 }
 0xb2c   :  { %v3008_v44 = vmax.f32 %v2932_v63, 0.0  ;;  %v8105_v63 = vld [vmem:[#allocation30_spill] sm:$0xff] }
 0xb2d   :  { %v3032_v6 = vpack.c.bf16 %v3010_v62, %v3009_v35 }
 0xb2e   :  { %v3031_v34 = vpack.c.bf16 %v3008_v44, %v3007_v27  ;;  %v4760_v0 = vpop.f32.mrb[24].mxu1 }
 0xb2f   :  { %v2953_v2 = vadd.f32 %v4760_v0, %v7168_v54  ;;  %v2944_v24 = vpop.f32.mrb[25].mxu1 }
 0xb30   :  { %v2945_v15 = vadd.f32 %v2944_v24, %v7168_v54  ;;  %v4761_v60 = vpop.f32.mrb[26].mxu1  ;;  %4800 = vmatprep.mubr.msk.bf16.mxu0 %vm3098_vm0, %v3031_v34 }
 0xb31   :  { %v2956_v20 = vadd.f32 %v4761_v60, %v7168_v54  ;;  %v2947_v18 = vpop.f32.mrb[27].mxu1  ;;  %4801 = vmatmul.mubr.msk.bf16.gmra.mrb[44].mxu0 %vm3098_vm0, %v3032_v6  ;;  %v3013_v39 = vmax.f32 %v2953_v2, 0.0 }
 0xb32   :  { %v2948_v11 = vadd.f32 %v2947_v18, %v7168_v54  ;;  %v3011_v56 = vmax.f32 %v2945_v15, 0.0 }
 0xb33   :  { %v3014_v29 = vmax.f32 %v2956_v20, 0.0 }
 0xb34   :  { %v3012_v41 = vmax.f32 %v2948_v11, 0.0 }
 0xb35   :  { %v3034_v51 = vpack.c.bf16 %v3014_v29, %v3013_v39 }
 0xb36   :  { %v3033_v42 = vpack.c.bf16 %v3012_v41, %v3011_v56  ;;  %v4764_v7 = vpop.f32.mrb[28].mxu1 }
 0xb37   :  { %v2969_v22 = vadd.f32 %v4764_v7, %v7168_v54  ;;  %v2960_v16 = vpop.f32.mrb[29].mxu1 }
 0xb38   :  { %v2961_v59 = vadd.f32 %v2960_v16, %v7168_v54  ;;  %v4765_v30 = vpop.f32.mrb[30].mxu1  ;;  %4804 = vmatprep.mubr.msk.bf16.mxu0 %vm3098_vm0, %v3033_v42 }
 0xb39   :  { %v2972_v17 = vadd.f32 %v4765_v30, %v7168_v54  ;;  %v2963_v3 = vpop.f32.mrb[31].mxu1  ;;  %4805 = vmatmul.mubr.msk.bf16.gmra.mrb[48].mxu0 %vm3098_vm0, %v3034_v51  ;;  %v3017_v8 = vmax.f32 %v2969_v22, 0.0 }
 0xb3a   :  { %v2964_v14 = vadd.f32 %v2963_v3, %v7168_v54  ;;  %v3015_v25 = vmax.f32 %v2961_v59, 0.0 }
 0xb3b   :  { %v3018_v4 = vmax.f32 %v2972_v17, 0.0 }
 0xb3c   :  { %v3016_v45 = vmax.f32 %v2964_v14, 0.0 }
 0xb3d   :  { %v3036_v33 = vpack.c.bf16 %v3018_v4, %v3017_v8 }
 0xb3e   :  { %v3035_v31 = vpack.c.bf16 %v3016_v45, %v3015_v25 }
 0xb40   :  { %4808 = vmatprep.mubr.msk.bf16.mxu0 %vm3098_vm0, %v3035_v31 }
 0xb41   :  { %4809 = vmatmul.mubr.msk.bf16.gmra.mrb[52].mxu0 %vm3098_vm0, %v3036_v33 }
 0xb9b   :  { %v4768_v9 = vpop.f32.mrb[32].mxu1 }
 0xb9c   :  { %v2985_v12 = vadd.f32 %v4768_v9, %v7168_v54  ;;  %v2976_v48 = vpop.f32.mrb[33].mxu1 }
 0xb9d   :  { %v2977_v19 = vadd.f32 %v2976_v48, %v7168_v54  ;;  %v4769_v21 = vpop.f32.mrb[34].mxu1 }
 0xb9e   :  { %v2988_v26 = vadd.f32 %v4769_v21, %v7168_v54  ;;  %v2979_v57 = vpop.f32.mrb[35].mxu1  ;;  %v3021_v37 = vmax.f32 %v2985_v12, 0.0 }
 0xb9f   :  { %v2980_v50 = vadd.f32 %v2979_v57, %v7168_v54  ;;  %v3019_v61 = vmax.f32 %v2977_v19, 0.0 }
 0xba0   :  { %v3022_v23 = vmax.f32 %v2988_v26, 0.0 }
 0xba1   :  { %v3020_v5 = vmax.f32 %v2980_v50, 0.0 }
 0xba2   :  { %v3038_v36 = vpack.c.bf16 %v3022_v23, %v3021_v37 }
 0xba3   :  { %v3037_v58 = vpack.c.bf16 %v3020_v5, %v3019_v61 }
 0xba5   :  { %4812 = vmatprep.mubr.msk.bf16.mxu0 %vm3098_vm0, %v3037_v58 }
 0xba6   :  { %4813 = vmatmul.mubr.msk.bf16.gmra.mrb[56].mxu0 %vm3098_vm0, %v3038_v36 }
 0xbe1   :  { %v4786_v43 = vpop.f32.mrb[28].mxu0 }
 0xbe2   :  { %v3184_v32 = vpop.f32.mrb[29].mxu0  ;;  %v3193_v42 = vadd.f32 %v4786_v43, %v8105_v63 }
 0xbe3   :  { %v3185_v35 = vadd.f32 %v8105_v63, %v3184_v32  ;;  %v4787_v62 = vpop.f32.mrb[30].mxu0 }
 0xbe4   :  { %v3187_v27 = vpop.f32.mrb[31].mxu0  ;;  %v3196_v59 = vadd.f32 %v4787_v62, %v8105_v63  ;;  %v7260_v4 = vadd.f32 %v3193_v42, %v6650_v47 }
 0xbe5   :  { %v3188_v44 = vadd.f32 %v8105_v63, %v3187_v27  ;;  %v7221_v54 = vadd.f32 %v3185_v35, %v6654_v46 }
 0xbe7   :  { %v3343_v6 = vsel %vm537_vm6, %v7221_v54, 0.0  ;;  %v7226_v34 = vadd.f32 %v3188_v44, %v6663_v55 }
 0xbe8   :  { %3344 = vadd.xlane.f32.xlu0 %v3343_v6 }
 0xbe9   :  { %v3346_v0 = vsel %vm537_vm6, %v7226_v34, 0.0 }
 0xbea   :  { %3347 = vadd.xlane.f32.xlu1 %v3346_v0  ;;  %v8108_v0 = vld [vmem:[#allocation26_spill] sm:$0xff] }
 0xbec   :  { %v4790_v2 = vpop.f32.mrb[32].mxu0 }
 0xbed   :  { %v3200_v24 = vpop.f32.mrb[33].mxu0  ;;  %v3209_v5 = vadd.f32 %v4790_v2, %v8105_v63 }
 0xbee   :  { %v4791_v15 = vpop.f32.mrb[34].mxu0  ;;  %v3201_v9 = vadd.f32 %v8105_v63, %v3200_v24 }
 0xbef   :  { %v3203_v60 = vpop.f32.mrb[35].mxu0  ;;  %v3212_v35 = vadd.f32 %v4791_v15, %v8105_v63  ;;  %v7308_v2 = vadd.f32 %v3209_v5, %v8108_v0 }
 0xbf0   :  { %v3204_v19 = vadd.f32 %v8105_v63, %v3203_v60  ;;  %v7284_v50 = vadd.f32 %v3201_v9, %v6688_v52  ;;  %v8106_v52 = vld [vmem:[#allocation35_spill] sm:$0xff] }
 0xbf1   :  { %v8109_v60 = vld [vmem:[#allocation27_spill] sm:$0xff]  ;;  %v3361_v42 = vsel %vm537_vm6, %v7308_v2, 0.0 }
 0xbf2   :  { %v7290_v61 = vadd.f32 %v3204_v19, %v6695_v49  ;;  %v3355_v58 = vsel %vm537_vm6, %v7284_v50, 0.0  ;;  %v8107_v49 = vld [vmem:[#allocation37_spill] sm:$0xff] }
 0xbf4   :  { %v7230_v20 = vpop.f32.mrb[36].mxu0  ;;  %v3358_v62 = vsel %vm537_vm6, %v7290_v61, 0.0 }
 0xbf5   :  { %v7232_v18 = vpop.f32.mrb[37].mxu0 }
 0xbf6   :  { %v7234_v46 = vpop.f32.mrb[38].mxu0 }
 0xbf7   :  { %v7236_v11 = vpop.f32.mrb[39].mxu0 }
 0xbfc   :  { %v7238_v39 = vpop.f32.mrb[40].mxu0 }
 0xbfd   :  { %v7240_v55 = vpop.f32.mrb[41].mxu0 }
 0xbfe   :  { %v7242_v29 = vpop.f32.mrb[42].mxu0 }
 0xbff   :  { %v7244_v56 = vpop.f32.mrb[43].mxu0 }
 0xc04   :  { %v4802_v41 = vpop.f32.mrb[44].mxu0 }
 0xc05   :  { %v3248_v51 = vpop.f32.mrb[45].mxu0  ;;  %v3257_v3 = vadd.f32 %v4802_v41, %v8105_v63  ;;  %v7314_v41 = vadd.f32 %v3212_v35, %v8109_v60  ;;  %v3233_v35 = vadd.f32 %v8105_v63, %v7240_v55 }
 0xc06   :  { %v3249_v7 = vadd.f32 %v8105_v63, %v3248_v51  ;;  %v4803_v22 = vpop.f32.mrb[46].mxu0  ;;  %v3217_v51 = vadd.f32 %v8105_v63, %v7232_v18 }
 0xc07   :  { %v3251_v16 = vpop.f32.mrb[47].mxu0  ;;  %v3260_v25 = vadd.f32 %v4803_v22, %v8105_v63  ;;  %v7272_v47 = vadd.f32 %v3257_v3, %v6757_v28 }
 0xc08   :  { %v3252_v30 = vadd.f32 %v8105_v63, %v3251_v16  ;;  %v7251_v17 = vadd.f32 %v3249_v7, %v6760_v53  ;;  %v7266_v53 = vadd.f32 %v3196_v59, %v6658_v38  ;;  %v8110_v7 = vld [vmem:[#allocation36_spill] sm:$0xff]  ;;  %v3220_v16 = vadd.f32 %v8105_v63, %v7236_v11 }
 0xc09   :  { %v7278_v38 = vadd.f32 %v3260_v25, %v6764_v13  ;;  %v3397_v57 = vsel %vm537_vm6, %v7272_v47, 0.0  ;;  %v3364_v59 = vsel %vm537_vm6, %v7314_v41, 0.0  ;;  %v8112_v25 = vld [vmem:[#allocation29_spill] sm:$0xff] }
 0xc0a   :  { %v3391_v14 = vsel %vm537_vm6, %v7251_v17, 0.0  ;;  %v7257_v8 = vadd.f32 %v3252_v30, %v6767_v10  ;;  %v3349_v10 = vsel %vm537_vm6, %v7260_v4, 0.0  ;;  %v3352_v21 = vsel %vm537_vm6, %v7266_v53, 0.0  ;;  %v8111_v30 = vld [vmem:[#allocation38_spill] sm:$0xff] }
 0xc0b   :  { %3392 = vadd.xlane.f32.xlu0 %v3391_v14  ;;  %v3400_v23 = vsel %vm537_vm6, %v7278_v38, 0.0 }
 0xc0c   :  { %v4806_v45 = vpop.f32.mrb[48].mxu0  ;;  %v3394_v33 = vsel %vm537_vm6, %v7257_v8, 0.0 }
 0xc0d   :  { %3395 = vadd.xlane.f32.xlu1 %v3394_v33  ;;  %v3264_v31 = vpop.f32.mrb[49].mxu0  ;;  %v3273_v44 = vadd.f32 %v4806_v45, %v8105_v63  ;;  %v7334_v45 = vadd.f32 %v3217_v51, %v8112_v25  ;;  %v8121_v51 = vld [vmem:[#allocation33_spill] sm:$0xff] }
 0xc0e   :  { %v4807_v12 = vpop.f32.mrb[50].mxu0  ;;  %v3265_v26 = vadd.f32 %v8105_v63, %v3264_v31  ;;  %v8113_v31 = vld [vmem:[#allocation64_spill] sm:$0xff] }
 0xc0f   :  { %3350 = vadd.xlane.f32.xlu0 %v3349_v10  ;;  %v3267_v48 = vpop.f32.mrb[51].mxu0  ;;  %v3276_v24 = vadd.f32 %v4807_v12, %v8105_v63  ;;  %v7321_v22 = vadd.f32 %v3273_v44, %v8110_v7  ;;  %v7340_v9 = vadd.f32 %v3220_v16, %v8113_v31  ;;  %v3225_v12 = vadd.f32 %v7230_v20, %v8105_v63 }
 0xc10   :  { %v3268_v28 = vadd.f32 %v8105_v63, %v3267_v48  ;;  %v7296_v43 = vadd.f32 %v3265_v26, %v8106_v52  ;;  %v3367_v10 = vsel %vm537_vm6, %v7334_v45, 0.0  ;;  %v8114_v48 = vld [vmem:[#allocation39_spill] sm:$0xff] }
 0xc11   :  { %3353 = vadd.xlane.f32.xlu1 %v3352_v21  ;;  %v7328_v3 = vadd.f32 %v3276_v24, %v8111_v30  ;;  %v3409_v18 = vsel %vm537_vm6, %v7321_v22, 0.0  ;;  %v3228_v21 = vadd.f32 %v7234_v46, %v8105_v63  ;;  %v3370_v26 = vsel %vm537_vm6, %v7340_v9, 0.0  ;;  %v8117_v52 = vld [vmem:[#allocation63_spill] sm:$0xff] }
 0xc12   :  { %v7302_v27 = vadd.f32 %v3268_v28, %v8107_v49  ;;  %v3403_v6 = vsel %vm537_vm6, %v7296_v43, 0.0  ;;  %v8120_v24 = vld [vmem:[#allocation31_spill] sm:$0xff] }
 0xc13   :  { %3398 = vadd.xlane.f32.xlu0 %v3397_v57  ;;  %v3412_v11 = vsel %vm537_vm6, %v7328_v3, 0.0  ;;  %v8115_v57 = vld [vmem:[#allocation41_spill] sm:$0xff] }
 0xc14   :  { %v4810_v37 = vpop.f32.mrb[52].mxu0  ;;  %v3406_v15 = vsel %vm537_vm6, %v7302_v27, 0.0 }
 0xc15   :  { %3401 = vadd.xlane.f32.xlu1 %v3400_v23  ;;  %v3280_v13 = vpop.f32.mrb[53].mxu0  ;;  %v3289_v23 = vadd.f32 %v4810_v37, %v8105_v63 }
 0xc16   :  { %v4811_v36 = vpop.f32.mrb[54].mxu0  ;;  %v3281_v14 = vadd.f32 %v8105_v63, %v3280_v13  ;;  %v8116_v13 = vld [vmem:[#allocation28_spill] sm:$0xff] }
 0xc17   :  { %3356 = vadd.xlane.f32.xlu0 %v3355_v58  ;;  %v3283_v32 = vpop.f32.mrb[55].mxu0  ;;  %v7360_v5 = vadd.f32 %v3225_v12, %v8116_v13  ;;  %v3292_v58 = vadd.f32 %v4811_v36, %v8105_v63  ;;  %v3236_v36 = vadd.f32 %v8105_v63, %v7244_v56  ;;  %v8122_v12 = vld [vmem:[#allocation44_spill] sm:$0xff] }
 0xc18   :  { %v3284_v33 = vadd.f32 %v8105_v63, %v3283_v32  ;;  %v7347_v19 = vadd.f32 %v3281_v14, %v8114_v48  ;;  %v7366_v32 = vadd.f32 %v3228_v21, %v8117_v52  ;;  %v8123_v21 = vld [vmem:[#allocation32_spill] sm:$0xff]  ;;  %v8125_v52 = vld [vmem:[#allocation34_spill] sm:$0xff] }
 0xc19   :  { %3359 = vadd.xlane.f32.xlu1 %v3358_v62  ;;  %v3373_v37 = vsel %vm537_vm6, %v7360_v5, 0.0  ;;  %v8118_v62 = vld [vmem:[#allocation40_spill] sm:$0xff] }
 0xc1a   :  { %v7354_v28 = vadd.f32 %v3284_v33, %v8115_v57  ;;  %v3415_v20 = vsel %vm537_vm6, %v7347_v19, 0.0  ;;  %v7373_v49 = vadd.f32 %v3289_v23, %v8118_v62  ;;  %v3376_v44 = vsel %vm537_vm6, %v7366_v32, 0.0  ;;  %v8124_v23 = vld [vmem:[#allocation43_spill] sm:$0xff] }
 0xc1b   :  { %3404 = vadd.xlane.f32.xlu0 %v3403_v6  ;;  %v8119_v6 = vld [vmem:[#allocation42_spill] sm:$0xff] }
 0xc1c   :  { %v3418_v46 = vsel %vm537_vm6, %v7354_v28, 0.0  ;;  %v7380_v0 = vadd.f32 %v3292_v58, %v8119_v6  ;;  %v3421_v55 = vsel %vm537_vm6, %v7373_v49, 0.0 }
 0xc1d   :  { %3407 = vadd.xlane.f32.xlu1 %v3406_v15  ;;  %v7385_v15 = vadd.f32 %v3233_v35, %v8120_v24 }
 0xc1e   :  { %v3424_v60 = vsel %vm537_vm6, %v7380_v0, 0.0 }
 0xc1f   :  { %3362 = vadd.xlane.f32.xlu0 %v3361_v42  ;;  %v7390_v42 = vadd.f32 %v3236_v36, %v8121_v51  ;;  %v3379_v56 = vsel %vm537_vm6, %v7385_v15, 0.0  ;;  %v8126_v36 = vld [vmem:[#allocation46_spill] sm:$0xff] }
 0xc21   :  { %3365 = vadd.xlane.f32.xlu1 %v3364_v59  ;;  %v3382_v7 = vsel %vm537_vm6, %v7390_v42, 0.0  ;;  %v3241_v59 = vadd.f32 %v7238_v39, %v8105_v63 }
 0xc23   :  { %3410 = vadd.xlane.f32.xlu0 %v3409_v18 }
 0xc25   :  { %3413 = vadd.xlane.f32.xlu1 %v3412_v11  ;;  %v3244_v11 = vadd.f32 %v7242_v29, %v8105_v63 }
 0xc27   :  { %3368 = vadd.xlane.f32.xlu0 %v3367_v10  ;;  %v7418_v35 = vadd.f32 %v3244_v11, %v8125_v52 }
 0xc29   :  { %3371 = vadd.xlane.f32.xlu1 %v3370_v26  ;;  %v7406_v26 = vadd.f32 %v3241_v59, %v8123_v21 }
 0xc2b   :  { %3416 = vadd.xlane.f32.xlu0 %v3415_v20  ;;  %v3385_v62 = vsel %vm537_vm6, %v7406_v26, 0.0 }
 0xc2d   :  { %3419 = vadd.xlane.f32.xlu1 %v3418_v46 }
 0xc2f   :  { %3374 = vadd.xlane.f32.xlu0 %v3373_v37 }
 0xc31   :  { %3377 = vadd.xlane.f32.xlu1 %v3376_v44 }
 0xc33   :  { %3422 = vadd.xlane.f32.xlu0 %v3421_v55  ;;  %v8127_v55 = vld [vmem:[#allocation45_spill] sm:$0xff] }
 0xc35   :  { %3425 = vadd.xlane.f32.xlu1 %v3424_v60 }
 0xc37   :  { %3380 = vadd.xlane.f32.xlu0 %v3379_v56 }
 0xc39   :  { %3383 = vadd.xlane.f32.xlu1 %v3382_v7 }
 0xc75   :  { %v3345_v25 = vpop.xlane.xlu0 %3344 }
 0xc76   :  { %v3439_v57 = vmul.f32 0.037037037, %v3345_v25 }
 0xc77   :  { %v3348_v48 = vpop.xlane.xlu1 %3347 }
 0xc78   :  { %v3440_v29 = vmul.f32 0.037037037, %v3348_v48  ;;  %v7421_v37 = vsub.f32 %v7221_v54, %v3439_v57 }
 0xc79   :  { %v4814_v16 = vpop.f32.mrb[56].mxu0 }
 0xc7a   :  { %v3296_v30 = vpop.f32.mrb[57].mxu0  ;;  %v3305_v39 = vadd.f32 %v4814_v16, %v8105_v63  ;;  %v7429_v6 = vsub.f32 %v7226_v34, %v3440_v29  ;;  %v3503_v60 = vmul.f32 %v7421_v37, %v7421_v37 }
 0xc7b   :  { %v3297_v14 = vadd.f32 %v8105_v63, %v3296_v30  ;;  %v4815_v18 = vpop.f32.mrb[58].mxu0 }
 0xc7c   :  { %v3299_v33 = vpop.f32.mrb[59].mxu0  ;;  %v3308_v58 = vadd.f32 %v4815_v18, %v8105_v63  ;;  %v7426_v44 = vadd.f32 %v3305_v39, %v8126_v36  ;;  %v3504_v34 = vmul.f32 %v7429_v6, %v7429_v6  ;;  %v3535_v56 = vsel %vm537_vm6, %v3503_v60, 0.0 }
 0xc7d   :  { %v3300_v31 = vadd.f32 %v8105_v63, %v3299_v33  ;;  %v7403_v10 = vadd.f32 %v3297_v14, %v8122_v12  ;;  %v3388_v63 = vsel %vm537_vm6, %v7418_v35, 0.0 }
 0xc7e   :  { %v7434_v24 = vadd.f32 %v3308_v58, %v8127_v55  ;;  %v3433_v54 = vsel %vm537_vm6, %v7426_v44, 0.0  ;;  %v3538_v7 = vsel %vm537_vm6, %v3504_v34, 0.0 }
 0xc7f   :  { %v7410_v20 = vadd.f32 %v3300_v31, %v8124_v23  ;;  %v3427_v13 = vsel %vm537_vm6, %v7403_v10, 0.0 }
 0xc80   :  { %3428 = vadd.xlane.f32.xlu0 %v3427_v13  ;;  %v3436_v51 = vsel %vm537_vm6, %v7434_v24, 0.0 }
 0xc81   :  { %v3430_v46 = vsel %vm537_vm6, %v7410_v20, 0.0 }
 0xc82   :  { %3431 = vadd.xlane.f32.xlu1 %v3430_v46 }
 0xc84   :  { %3386 = vadd.xlane.f32.xlu0 %v3385_v62 }
 0xc86   :  { %3389 = vadd.xlane.f32.xlu1 %v3388_v63 }
 0xc88   :  { %3434 = vadd.xlane.f32.xlu0 %v3433_v54 }
 0xc8a   :  { %3437 = vadd.xlane.f32.xlu1 %v3436_v51 }
 0xc8c   :  { %3536 = vadd.xlane.f32.xlu0 %v3535_v56 }
 0xc8e   :  { %3539 = vadd.xlane.f32.xlu1 %v3538_v7 }
 0xc98   :  { %v3393_v16 = vpop.xlane.xlu0 %3392 }
 0xc99   :  { %v3455_v59 = vmul.f32 0.037037037, %v3393_v16 }
 0xc9a   :  { %v3396_v30 = vpop.xlane.xlu1 %3395 }
 0xc9b   :  { %v7447_v14 = vsub.f32 %v7251_v17, %v3455_v59  ;;  %v3456_v18 = vmul.f32 0.037037037, %v3396_v30 }
 0xc9c   :  { %v3351_v25 = vpop.xlane.xlu0 %3350 }
 0xc9d   :  { %v7450_v33 = vsub.f32 %v7257_v8, %v3456_v18  ;;  %v3441_v11 = vmul.f32 0.037037037, %v3351_v25  ;;  %v3519_v31 = vmul.f32 %v7447_v14, %v7447_v14 }
 0xc9e   :  { %v3354_v12 = vpop.xlane.xlu1 %3353 }
 0xc9f   :  { %v7455_v48 = vsub.f32 %v7260_v4, %v3441_v11  ;;  %v3442_v21 = vmul.f32 0.037037037, %v3354_v12  ;;  %v3583_v57 = vsel %vm537_vm6, %v3519_v31, 0.0  ;;  %v3520_v17 = vmul.f32 %v7450_v33, %v7450_v33 }
 0xca0   :  { %3584 = vadd.xlane.f32.xlu0 %v3583_v57  ;;  %v3399_v39 = vpop.xlane.xlu0 %3398 }
 0xca1   :  { %v7461_v23 = vsub.f32 %v7266_v53, %v3442_v21  ;;  %v3457_v8 = vmul.f32 0.037037037, %v3399_v39  ;;  %v3586_v13 = vsel %vm537_vm6, %v3520_v17, 0.0  ;;  %v3505_v29 = vmul.f32 %v7455_v48, %v7455_v48 }
 0xca2   :  { %v3402_v58 = vpop.xlane.xlu1 %3401  ;;  %3587 = vadd.xlane.f32.xlu1 %v3586_v13 }
 0xca3   :  { %v7467_v4 = vsub.f32 %v7272_v47, %v3457_v8  ;;  %v3458_v46 = vmul.f32 0.037037037, %v3402_v58  ;;  %v3541_v52 = vsel %vm537_vm6, %v3505_v29, 0.0  ;;  %v3506_v62 = vmul.f32 %v7461_v23, %v7461_v23 }
 0xca4   :  { %3542 = vadd.xlane.f32.xlu0 %v3541_v52  ;;  %v3357_v53 = vpop.xlane.xlu0 %3356 }
 0xca5   :  { %v7473_v36 = vsub.f32 %v7278_v38, %v3458_v46  ;;  %v3443_v63 = vmul.f32 0.037037037, %v3357_v53  ;;  %v3544_v55 = vsel %vm537_vm6, %v3506_v62, 0.0  ;;  %v3521_v54 = vmul.f32 %v7467_v4, %v7467_v4 }
 0xca6   :  { %v3360_v60 = vpop.xlane.xlu1 %3359  ;;  %3545 = vadd.xlane.f32.xlu1 %v3544_v55 }
 0xca7   :  { %v7479_v47 = vsub.f32 %v7284_v50, %v3443_v63  ;;  %v3444_v51 = vmul.f32 0.037037037, %v3360_v60  ;;  %v3589_v34 = vsel %vm537_vm6, %v3521_v54, 0.0  ;;  %v3522_v56 = vmul.f32 %v7473_v36, %v7473_v36 }
 0xca8   :  { %3590 = vadd.xlane.f32.xlu0 %v3589_v34  ;;  %v3405_v38 = vpop.xlane.xlu0 %3404 }
 0xca9   :  { %v7485_v7 = vsub.f32 %v7290_v61, %v3444_v51  ;;  %v3459_v16 = vmul.f32 0.037037037, %v3405_v38  ;;  %v3592_v59 = vsel %vm537_vm6, %v3522_v56, 0.0  ;;  %v3507_v30 = vmul.f32 %v7479_v47, %v7479_v47 }
 0xcaa   :  { %v3408_v18 = vpop.xlane.xlu1 %3407  ;;  %3593 = vadd.xlane.f32.xlu1 %v3592_v59 }
 0xcab   :  { %v7491_v50 = vsub.f32 %v7296_v43, %v3459_v16  ;;  %v3460_v25 = vmul.f32 0.037037037, %v3408_v18  ;;  %v3547_v11 = vsel %vm537_vm6, %v3507_v30, 0.0  ;;  %v3508_v31 = vmul.f32 %v7485_v7, %v7485_v7 }
 0xcac   :  { %3548 = vadd.xlane.f32.xlu0 %v3547_v11  ;;  %v3363_v61 = vpop.xlane.xlu0 %3362 }
 0xcad   :  { %v7497_v12 = vsub.f32 %v7302_v27, %v3460_v25  ;;  %v3445_v21 = vmul.f32 0.037037037, %v3363_v61  ;;  %v3550_v57 = vsel %vm537_vm6, %v3508_v31, 0.0  ;;  %v3523_v17 = vmul.f32 %v7491_v50, %v7491_v50 }
 0xcae   :  { %v3366_v39 = vpop.xlane.xlu1 %3365  ;;  %3551 = vadd.xlane.f32.xlu1 %v3550_v57 }
 0xcaf   :  { %v7503_v43 = vsub.f32 %v7308_v2, %v3445_v21  ;;  %v3446_v8 = vmul.f32 0.037037037, %v3366_v39  ;;  %v3595_v13 = vsel %vm537_vm6, %v3523_v17, 0.0  ;;  %v3524_v29 = vmul.f32 %v7497_v12, %v7497_v12 }
 0xcb0   :  { %3596 = vadd.xlane.f32.xlu0 %v3595_v13  ;;  %v3411_v27 = vpop.xlane.xlu0 %3410 }
 0xcb1   :  { %v7509_v58 = vsub.f32 %v7314_v41, %v3446_v8  ;;  %v3461_v46 = vmul.f32 0.037037037, %v3411_v27  ;;  %v3598_v52 = vsel %vm537_vm6, %v3524_v29, 0.0  ;;  %v3509_v62 = vmul.f32 %v7503_v43, %v7503_v43 }
 0xcb2   :  { %v3414_v53 = vpop.xlane.xlu1 %3413  ;;  %3599 = vadd.xlane.f32.xlu1 %v3598_v52 }
 0xcb3   :  { %v7515_v2 = vsub.f32 %v7321_v22, %v3461_v46  ;;  %v3462_v63 = vmul.f32 0.037037037, %v3414_v53  ;;  %v3553_v55 = vsel %vm537_vm6, %v3509_v62, 0.0  ;;  %v3510_v54 = vmul.f32 %v7509_v58, %v7509_v58 }
 0xcb4   :  { %3554 = vadd.xlane.f32.xlu0 %v3553_v55  ;;  %v3369_v41 = vpop.xlane.xlu0 %3368 }
 0xcb5   :  { %v7521_v60 = vsub.f32 %v7328_v3, %v3462_v63  ;;  %v3447_v51 = vmul.f32 0.037037037, %v3369_v41  ;;  %v3556_v34 = vsel %vm537_vm6, %v3510_v54, 0.0  ;;  %v3525_v56 = vmul.f32 %v7515_v2, %v7515_v2 }
 0xcb6   :  { %v3372_v38 = vpop.xlane.xlu1 %3371  ;;  %3557 = vadd.xlane.f32.xlu1 %v3556_v34 }
 0xcb7   :  { %v7527_v22 = vsub.f32 %v7334_v45, %v3447_v51  ;;  %v3448_v16 = vmul.f32 0.037037037, %v3372_v38  ;;  %v3601_v59 = vsel %vm537_vm6, %v3525_v56, 0.0  ;;  %v3526_v30 = vmul.f32 %v7521_v60, %v7521_v60 }
 0xcb8   :  { %3602 = vadd.xlane.f32.xlu0 %v3601_v59  ;;  %v3417_v3 = vpop.xlane.xlu0 %3416 }
 0xcb9   :  { %v7533_v18 = vsub.f32 %v7340_v9, %v3448_v16  ;;  %v3463_v25 = vmul.f32 0.037037037, %v3417_v3  ;;  %v3604_v11 = vsel %vm537_vm6, %v3526_v30, 0.0  ;;  %v3511_v31 = vmul.f32 %v7527_v22, %v7527_v22 }
 0xcba   :  { %v3420_v61 = vpop.xlane.xlu1 %3419  ;;  %3605 = vadd.xlane.f32.xlu1 %v3604_v11 }
 0xcbb   :  { %v7539_v45 = vsub.f32 %v7347_v19, %v3463_v25  ;;  %v3464_v21 = vmul.f32 0.037037037, %v3420_v61  ;;  %v3559_v57 = vsel %vm537_vm6, %v3511_v31, 0.0  ;;  %v3512_v17 = vmul.f32 %v7533_v18, %v7533_v18 }
 0xcbc   :  { %3560 = vadd.xlane.f32.xlu0 %v3559_v57  ;;  %v3375_v9 = vpop.xlane.xlu0 %3374 }
 0xcbd   :  { %v7545_v39 = vsub.f32 %v7354_v28, %v3464_v21  ;;  %v3449_v8 = vmul.f32 0.037037037, %v3375_v9  ;;  %v3562_v13 = vsel %vm537_vm6, %v3512_v17, 0.0  ;;  %v3527_v29 = vmul.f32 %v7539_v45, %v7539_v45 }
 0xcbe   :  { %v3378_v27 = vpop.xlane.xlu1 %3377  ;;  %3563 = vadd.xlane.f32.xlu1 %v3562_v13 }
 0xcbf   :  { %v7551_v19 = vsub.f32 %v7360_v5, %v3449_v8  ;;  %v3450_v46 = vmul.f32 0.037037037, %v3378_v27  ;;  %v3607_v52 = vsel %vm537_vm6, %v3527_v29, 0.0  ;;  %v3528_v62 = vmul.f32 %v7545_v39, %v7545_v39 }
 0xcc0   :  { %3608 = vadd.xlane.f32.xlu0 %v3607_v52  ;;  %v3423_v28 = vpop.xlane.xlu0 %3422 }
 0xcc1   :  { %v7557_v53 = vsub.f32 %v7366_v32, %v3450_v46  ;;  %v3465_v63 = vmul.f32 0.037037037, %v3423_v28  ;;  %v3610_v55 = vsel %vm537_vm6, %v3528_v62, 0.0  ;;  %v3513_v54 = vmul.f32 %v7551_v19, %v7551_v19 }
 0xcc2   :  { %v3426_v41 = vpop.xlane.xlu1 %3425  ;;  %3611 = vadd.xlane.f32.xlu1 %v3610_v55 }
 0xcc3   :  { %v7563_v5 = vsub.f32 %v7373_v49, %v3465_v63  ;;  %v3466_v51 = vmul.f32 0.037037037, %v3426_v41  ;;  %v3565_v34 = vsel %vm537_vm6, %v3513_v54, 0.0  ;;  %v3514_v56 = vmul.f32 %v7557_v53, %v7557_v53 }
 0xcc4   :  { %3566 = vadd.xlane.f32.xlu0 %v3565_v34  ;;  %v3381_v32 = vpop.xlane.xlu0 %3380 }
 0xcc5   :  { %v7569_v38 = vsub.f32 %v7380_v0, %v3466_v51  ;;  %v3451_v16 = vmul.f32 0.037037037, %v3381_v32  ;;  %v3568_v59 = vsel %vm537_vm6, %v3514_v56, 0.0  ;;  %v3529_v30 = vmul.f32 %v7563_v5, %v7563_v5 }
 0xcc6   :  { %v3384_v3 = vpop.xlane.xlu1 %3383  ;;  %3569 = vadd.xlane.f32.xlu1 %v3568_v59 }
 0xcc7   :  { %v7575_v49 = vsub.f32 %v7385_v15, %v3451_v16  ;;  %v3452_v25 = vmul.f32 0.037037037, %v3384_v3  ;;  %v3613_v11 = vsel %vm537_vm6, %v3529_v30, 0.0  ;;  %v3530_v31 = vmul.f32 %v7569_v38, %v7569_v38 }
 0xcc8   :  { %3614 = vadd.xlane.f32.xlu0 %v3613_v11 }
 0xcc9   :  { %v7581_v0 = vsub.f32 %v7390_v42, %v3452_v25  ;;  %v3616_v61 = vsel %vm537_vm6, %v3530_v31, 0.0  ;;  %v3515_v21 = vmul.f32 %v7575_v49, %v7575_v49 }
 0xcca   :  { %3617 = vadd.xlane.f32.xlu1 %v3616_v61 }
 0xccb   :  { %v3571_v57 = vsel %vm537_vm6, %v3515_v21, 0.0  ;;  %v3516_v15 = vmul.f32 %v7581_v0, %v7581_v0 }
 0xccc   :  { %3572 = vadd.xlane.f32.xlu0 %v3571_v57 }
 0xccd   :  { %v3574_v17 = vsel %vm537_vm6, %v3516_v15, 0.0 }
 0xcce   :  { %3575 = vadd.xlane.f32.xlu1 %v3574_v17 }
 0xd0d   :  { %v3429_v9 = vpop.xlane.xlu0 %3428 }
 0xd0e   :  { %v3467_v8 = vmul.f32 0.037037037, %v3429_v9 }
 0xd0f   :  { %v3432_v13 = vpop.xlane.xlu1 %3431 }
 0xd10   :  { %v7591_v42 = vsub.f32 %v7403_v10, %v3467_v8  ;;  %v3468_v29 = vmul.f32 0.037037037, %v3432_v13 }
 0xd11   :  { %v3387_v27 = vpop.xlane.xlu0 %3386 }
 0xd12   :  { %v7594_v46 = vsub.f32 %v7410_v20, %v3468_v29  ;;  %v3453_v52 = vmul.f32 0.037037037, %v3387_v27  ;;  %v3531_v62 = vmul.f32 %v7591_v42, %v7591_v42 }
 0xd13   :  { %v3390_v28 = vpop.xlane.xlu1 %3389 }
 0xd14   :  { %v7599_v63 = vsub.f32 %v7406_v26, %v3453_v52  ;;  %v3454_v55 = vmul.f32 0.037037037, %v3390_v28  ;;  %v3619_v54 = vsel %vm537_vm6, %v3531_v62, 0.0  ;;  %v3532_v10 = vmul.f32 %v7594_v46, %v7594_v46 }
 0xd15   :  { %3620 = vadd.xlane.f32.xlu0 %v3619_v54  ;;  %v3435_v41 = vpop.xlane.xlu0 %3434 }
 0xd16   :  { %v7605_v51 = vsub.f32 %v7418_v35, %v3454_v55  ;;  %v3469_v20 = vmul.f32 0.037037037, %v3435_v41  ;;  %v3622_v34 = vsel %vm537_vm6, %v3532_v10, 0.0  ;;  %v3517_v56 = vmul.f32 %v7599_v63, %v7599_v63 }
 0xd17   :  { %3623 = vadd.xlane.f32.xlu1 %v3622_v34  ;;  %v3438_v26 = vpop.xlane.xlu1 %3437  ;;  %v3761_v10 = vsub.s32 4, %v5631_v1 }
 0xd18   :  { %v7611_v32 = vsub.f32 %v7426_v44, %v3469_v20  ;;  %v3470_v16 = vmul.f32 0.037037037, %v3438_v26  ;;  %v3577_v59 = vsel %vm537_vm6, %v3517_v56, 0.0  ;;  %v3518_v30 = vmul.f32 %v7605_v51, %v7605_v51 }
 0xd19   :  { %3578 = vadd.xlane.f32.xlu0 %v3577_v59  ;;  %v3537_v21 = vpop.xlane.xlu0 %3536 }
 0xd1a   :  { %v7617_v35 = vsub.f32 %v7434_v24, %v3470_v16  ;;  %v3580_v3 = vsel %vm537_vm6, %v3518_v30, 0.0  ;;  %v3533_v25 = vmul.f32 %v7611_v32, %v7611_v32  ;;  %v3631_v24 = vmul.f32 0.037037037, %v3537_v21 }
 0xd1b   :  { %3581 = vadd.xlane.f32.xlu1 %v3580_v3  ;;  %v3540_v31 = vpop.xlane.xlu1 %3539  ;;  %v7629_v3 = vrot.slane %v8050_v40, %v3761_v10 }
 0xd1c   :  { %v3625_v11 = vsel %vm537_vm6, %v3533_v25, 0.0  ;;  %v3534_v44 = vmul.f32 %v7617_v35, %v7617_v35  ;;  %v3632_v57 = vmul.f32 0.037037037, %v3540_v31  ;;  %v3663_v17 = vadd.f32 1e-05, %v3631_v24 }
 0xd1d   :  { %3626 = vadd.xlane.f32.xlu0 %v3625_v11  ;;  %v3797_v25 = vsub.s32 5, %v5631_v1 }
 0xd1e   :  { %v3628_v61 = vsel %vm537_vm6, %v3534_v44, 0.0  ;;  %v3664_v15 = vadd.f32 1e-05, %v3632_v57 }
 0xd1f   :  { %3629 = vadd.xlane.f32.xlu1 %v3628_v61 }
 0xd20   :  { %5080 = vrsqrt.f32 %v3664_v15  ;;  %v7635_v15 = vrot.slane %v8050_v40, %v3797_v25 }
 0xd21   :  { %5082 = vrsqrt.f32 %v3663_v17 }
 0xd2a   :  { %v5081_v62 = vpop.eup %5080 }
 0xd2b   :  { %v5083_v41 = vpop.eup %5082  ;;  %v3728_v26 = vmul.f32 %v5081_v62, %v7429_v6 }
 0xd2c   :  { %v3727_v11 = vmul.f32 %v5083_v41, %v7421_v37 }
 0xd2d   :  { %v3585_v9 = vpop.xlane.xlu0 %3584  ;;  %v3764_v21 = vmul.f32 %v7629_v3, %v3728_v26 }
 0xd2e   :  { %v3647_v8 = vmul.f32 0.037037037, %v3585_v9  ;;  %v3763_v17 = vmul.f32 %v7629_v3, %v3727_v11 }
 0xd2f   :  { %v3588_v13 = vpop.xlane.xlu1 %3587 }
 0xd30   :  { %v3679_v29 = vadd.f32 1e-05, %v3647_v8  ;;  %v3648_v27 = vmul.f32 0.037037037, %v3588_v13 }
 0xd31   :  { %v3543_v52 = vpop.xlane.xlu0 %3542 }
 0xd32   :  { %5084 = vrsqrt.f32 %v3679_v29  ;;  %v3680_v28 = vadd.f32 1e-05, %v3648_v27  ;;  %v3633_v55 = vmul.f32 0.037037037, %v3543_v52  ;;  %v3800_v29 = vadd.f32 %v7635_v15, %v3764_v21 }
 0xd33   :  { %v3546_v54 = vpop.xlane.xlu1 %3545 }
 0xd34   :  { %5086 = vrsqrt.f32 %v3680_v28  ;;  %v3665_v20 = vadd.f32 1e-05, %v3633_v55  ;;  %v3634_v34 = vmul.f32 0.037037037, %v3546_v54  ;;  %v3799_v54 = vadd.f32 %v7635_v15, %v3763_v17 }
 0xd35   :  { %v3591_v56 = vpop.xlane.xlu0 %3590  ;;  %v3832_v26 = vsel %vm537_vm6, %v3800_v29, 1.0 }
 0xd36   :  { %5088 = vrsqrt.f32 %v3665_v20  ;;  %v3666_v16 = vadd.f32 1e-05, %v3634_v34  ;;  %v3649_v59 = vmul.f32 0.037037037, %v3591_v56 }
 0xd37   :  { %v3594_v30 = vpop.xlane.xlu1 %3593 }
 0xd38   :  { %5090 = vrsqrt.f32 %v3666_v16  ;;  %v3681_v44 = vadd.f32 1e-05, %v3649_v59  ;;  %v3650_v31 = vmul.f32 0.037037037, %v3594_v30 }
 0xd39   :  { %v3549_v61 = vpop.xlane.xlu0 %3548 }
 0xd3a   :  { %5092 = vrsqrt.f32 %v3681_v44  ;;  %v3682_v57 = vadd.f32 1e-05, %v3650_v31  ;;  %v3635_v6 = vmul.f32 0.037037037, %v3549_v61  ;;  %v3831_v44 = vsel %vm537_vm6, %v3799_v54, 1.0 }
 0xd3b   :  { %v3552_v24 = vpop.xlane.xlu1 %3551 }
 0xd3c   :  { %v5085_v9 = vpop.eup %5084  ;;  %5094 = vrsqrt.f32 %v3682_v57  ;;  %v3667_v1 = vadd.f32 1e-05, %v3635_v6  ;;  %v3636_v8 = vmul.f32 0.037037037, %v3552_v24  ;;  %v3863_v24 = vpack.c.bf16 %v3832_v26, %v3831_v44 }
 0xd3d   :  { %v3743_v37 = vmul.f32 %v5085_v9, %v7447_v14  ;;  %v3597_v13 = vpop.xlane.xlu0 %3596 }
 0xd3e   :  { %v5087_v27 = vpop.eup %5086  ;;  %5096 = vrsqrt.f32 %v3667_v1  ;;  %v3668_v52 = vadd.f32 1e-05, %v3636_v8  ;;  %v3651_v62 = vmul.f32 0.037037037, %v3597_v13 }
 0xd3f   :  { %v3744_v28 = vmul.f32 %v5087_v27, %v7450_v33  ;;  %v3600_v55 = vpop.xlane.xlu1 %3599  ;;  %v3779_v40 = vmul.f32 %v7629_v3, %v3743_v37  ;;  %v7655_v27 = vld [vmem:[#allocation16] sm:$0xff]  }
 0xd40   :  { %v5089_v10 = vpop.eup %5088  ;;  %5098 = vrsqrt.f32 %v3668_v52  ;;  %v3683_v41 = vadd.f32 1e-05, %v3651_v62  ;;  %v3652_v20 = vmul.f32 0.037037037, %v3600_v55  ;;  %4546 = vmatprep.mubr.msk.bf16.mxu1 %vm3911_vm1, %v7655_v27 }
 0xd41   :  { %v3555_v34 = vpop.xlane.xlu0 %3554  ;;  %v3780_v14 = vmul.f32 %v7629_v3, %v3744_v28  ;;  %v3815_v56 = vadd.f32 %v7635_v15, %v3779_v40  ;;  %v3729_v16 = vmul.f32 %v5089_v10, %v7455_v48 }
 0xd42   :  { %v5091_v59 = vpop.eup %5090  ;;  %5100 = vrsqrt.f32 %v3683_v41  ;;  %v3684_v33 = vadd.f32 1e-05, %v3652_v20  ;;  %v3637_v30 = vmul.f32 0.037037037, %v3555_v34  ;;  %v3928_v41 = vsel %vm3911_vm1, %v3863_v24, 0 }
 0xd43   :  { %v3558_v25 = vpop.xlane.xlu1 %3557  ;;  %v3816_v11 = vadd.f32 %v7635_v15, %v3780_v14  ;;  %v3730_v31 = vmul.f32 %v5091_v59, %v7461_v23  ;;  %v3765_v61 = vmul.f32 %v7629_v3, %v3729_v16  ;;  %v3847_v9 = vsel %vm537_vm6, %v3815_v56, 1.0 }
 0xd44   :  { %v5093_v21 = vpop.eup %5092  ;;  %5102 = vrsqrt.f32 %v3684_v33  ;;  %v3669_v57 = vadd.f32 1e-05, %v3637_v30  ;;  %v3638_v6 = vmul.f32 0.037037037, %v3558_v25 }
 0xd45   :  { %v3745_v48 = vmul.f32 %v5093_v21, %v7467_v4  ;;  %v3603_v17 = vpop.xlane.xlu0 %3602  ;;  %v3848_v1 = vsel %vm537_vm6, %v3816_v11, 1.0  ;;  %v3766_v8 = vmul.f32 %v7629_v3, %v3730_v31  ;;  %v3801_v4 = vadd.f32 %v7635_v15, %v3765_v61 }
 0xd46   :  { %v5095_v37 = vpop.eup %5094  ;;  %5104 = vrsqrt.f32 %v3669_v57  ;;  %v3670_v13 = vadd.f32 1e-05, %v3638_v6  ;;  %v3653_v23 = vmul.f32 0.037037037, %v3603_v17  ;;  %v3871_v29 = vpack.c.bf16 %v3848_v1, %v3847_v9 }
 0xd47   :  { %v3746_v52 = vmul.f32 %v5095_v37, %v7473_v36  ;;  %v3606_v62 = vpop.xlane.xlu1 %3605  ;;  %v3781_v28 = vmul.f32 %v7629_v3, %v3745_v48  ;;  %v3802_v55 = vadd.f32 %v7635_v15, %v3766_v8  ;;  %v3833_v25 = vsel %vm537_vm6, %v3801_v4, 1.0 }
 0xd48   :  { %v5097_v40 = vpop.eup %5096  ;;  %5106 = vrsqrt.f32 %v3670_v13  ;;  %v3685_v54 = vadd.f32 1e-05, %v3653_v23  ;;  %v3654_v10 = vmul.f32 0.037037037, %v3606_v62  ;;  %4830 = vmatprep.subr.msk.bf16.mxu1 %vm3911_vm1, %v3871_v29 }
 0xd49   :  { %4531 = vmatpush3.bf16.xpose.msra.mxu1 %v3928_v41  ;;  %v3561_v36 = vpop.xlane.xlu0 %3560  ;;  %v3782_v20 = vmul.f32 %v7629_v3, %v3746_v52  ;;  %v3817_v34 = vadd.f32 %v7635_v15, %v3781_v28  ;;  %v3834_v14 = vsel %vm537_vm6, %v3802_v55, 1.0  ;;  %v3731_v56 = vmul.f32 %v5097_v40, %v7479_v47 }
 0xd4a   :  { %v5099_v26 = vpop.eup %5098  ;;  %5108 = vrsqrt.f32 %v3685_v54  ;;  %v3686_v16 = vadd.f32 1e-05, %v3654_v10  ;;  %v3639_v59 = vmul.f32 0.037037037, %v3561_v36  ;;  %v3864_v57 = vpack.c.bf16 %v3834_v14, %v3833_v25 }
 0xd4b   :  { %v3564_v33 = vpop.xlane.xlu1 %3563  ;;  %v3818_v30 = vadd.f32 %v7635_v15, %v3782_v20  ;;  %v3732_v11 = vmul.f32 %v5099_v26, %v7485_v7  ;;  %v3767_v44 = vmul.f32 %v7629_v3, %v3731_v56  ;;  %v3849_v24 = vsel %vm537_vm6, %v3817_v34, 1.0 }
 0xd4c   :  { %v5101_v31 = vpop.eup %5100  ;;  %5110 = vrsqrt.f32 %v3686_v16  ;;  %v3671_v61 = vadd.f32 1e-05, %v3639_v59  ;;  %v3640_v21 = vmul.f32 0.037037037, %v3564_v33  ;;  %v3931_v4 = vsel %vm3911_vm1, %v3864_v57, 0 }
 0xd4d   :  { %v3747_v47 = vmul.f32 %v5101_v31, %v7491_v50  ;;  %v3609_v6 = vpop.xlane.xlu0 %3608  ;;  %v3850_v48 = vsel %vm537_vm6, %v3818_v30, 1.0  ;;  %v3768_v17 = vmul.f32 %v7629_v3, %v3732_v11  ;;  %v3803_v29 = vadd.f32 %v7635_v15, %v3767_v44 }
 0xd4e   :  { %v5103_v9 = vpop.eup %5102  ;;  %5112 = vrsqrt.f32 %v3671_v61  ;;  %v3672_v1 = vadd.f32 1e-05, %v3640_v21  ;;  %v3655_v7 = vmul.f32 0.037037037, %v3609_v6  ;;  %v3872_v8 = vpack.c.bf16 %v3850_v48, %v3849_v24 }
 0xd4f   :  { %v3748_v37 = vmul.f32 %v5103_v9, %v7497_v12  ;;  %v3612_v13 = vpop.xlane.xlu1 %3611  ;;  %v3783_v23 = vmul.f32 %v7629_v3, %v3747_v47  ;;  %v3804_v50 = vadd.f32 %v7635_v15, %v3768_v17  ;;  %v3835_v56 = vsel %vm537_vm6, %v3803_v29, 1.0 }
 0xd50   :  { %v5105_v52 = vpop.eup %5104  ;;  %5114 = vrsqrt.f32 %v3672_v1  ;;  %v3687_v62 = vadd.f32 1e-05, %v3655_v7  ;;  %v3656_v28 = vmul.f32 0.037037037, %v3612_v13  ;;  %4831 = vmatprep.subr.msk.bf16.mxu1 %vm3911_vm1, %v3872_v8 }
 0xd51   :  { %4533 = vmatpush3.bf16.xpose.msra.mxu1 %v3931_v4  ;;  %v3567_v55 = vpop.xlane.xlu0 %3566  ;;  %v3784_v40 = vmul.f32 %v7629_v3, %v3748_v37  ;;  %v3819_v12 = vadd.f32 %v7635_v15, %v3783_v23  ;;  %v3836_v54 = vsel %vm537_vm6, %v3804_v50, 1.0  ;;  %v3733_v10 = vmul.f32 %v5105_v52, %v7503_v43 }
 0xd52   :  { %v5107_v41 = vpop.eup %5106  ;;  %5116 = vrsqrt.f32 %v3687_v62  ;;  %v3688_v36 = vadd.f32 1e-05, %v3656_v28  ;;  %v3641_v20 = vmul.f32 0.037037037, %v3567_v55  ;;  %v3865_v25 = vpack.c.bf16 %v3836_v54, %v3835_v56 }
 0xd53   :  { %v3570_v34 = vpop.xlane.xlu1 %3569  ;;  %v3820_v14 = vadd.f32 %v7635_v15, %v3784_v40  ;;  %v3734_v26 = vmul.f32 %v5107_v41, %v7509_v58  ;;  %v3769_v16 = vmul.f32 %v7629_v3, %v3733_v10  ;;  %v3851_v44 = vsel %vm537_vm6, %v3819_v12, 1.0 }
 0xd54   :  { %v5109_v59 = vpop.eup %5108  ;;  %5118 = vrsqrt.f32 %v3688_v36  ;;  %v3673_v33 = vadd.f32 1e-05, %v3641_v20  ;;  %v3642_v30 = vmul.f32 0.037037037, %v3570_v34  ;;  %v3934_v8 = vsel %vm3911_vm1, %v3865_v25, 0 }
 0xd55   :  { %v3749_v43 = vmul.f32 %v5109_v59, %v7515_v2  ;;  %v3615_v11 = vpop.xlane.xlu0 %3614  ;;  %v3852_v31 = vsel %vm537_vm6, %v3820_v14, 1.0  ;;  %v3770_v61 = vmul.f32 %v7629_v3, %v3734_v26  ;;  %v3805_v17 = vadd.f32 %v7635_v15, %v3769_v16 }
 0xd56   :  { %v5111_v21 = vpop.eup %5110  ;;  %5120 = vrsqrt.f32 %v3673_v33  ;;  %v3674_v57 = vadd.f32 1e-05, %v3642_v30  ;;  %v3657_v58 = vmul.f32 0.037037037, %v3615_v11  ;;  %v3873_v47 = vpack.c.bf16 %v3852_v31, %v3851_v44 }
 0xd57   :  { %v3750_v6 = vmul.f32 %v5111_v21, %v7521_v60  ;;  %v3618_v24 = vpop.xlane.xlu1 %3617  ;;  %v3785_v48 = vmul.f32 %v7629_v3, %v3749_v43  ;;  %v3806_v2 = vadd.f32 %v7635_v15, %v3770_v61  ;;  %v3837_v62 = vsel %vm537_vm6, %v3805_v17, 1.0 }
 0xd58   :  { %v5113_v9 = vpop.eup %5112  ;;  %5122 = vrsqrt.f32 %v3674_v57  ;;  %v3689_v1 = vadd.f32 1e-05, %v3657_v58  ;;  %v3658_v7 = vmul.f32 0.037037037, %v3618_v24  ;;  %4832 = vmatprep.subr.msk.bf16.mxu1 %vm3911_vm1, %v3873_v47 }
 0xd59   :  { %4535 = vmatpush3.bf16.xpose.msra.mxu1 %v3934_v8  ;;  %v3786_v37 = vmul.f32 %v7629_v3, %v3750_v6  ;;  %v3821_v60 = vadd.f32 %v7635_v15, %v3785_v48  ;;  %v3838_v13 = vsel %vm537_vm6, %v3806_v2, 1.0  ;;  %v3735_v23 = vmul.f32 %v5113_v9, %v7527_v22 }
 0xd5a   :  { %v5115_v29 = vpop.eup %5114  ;;  %5124 = vrsqrt.f32 %v3689_v1  ;;  %v3690_v50 = vadd.f32 1e-05, %v3658_v7  ;;  %v3866_v40 = vpack.c.bf16 %v3838_v13, %v3837_v62 }
 0xd5b   :  { %v3822_v52 = vadd.f32 %v7635_v15, %v3786_v37  ;;  %v3736_v28 = vmul.f32 %v5115_v29, %v7533_v18  ;;  %v3771_v4 = vmul.f32 %v7629_v3, %v3735_v23  ;;  %v3853_v54 = vsel %vm537_vm6, %v3821_v60, 1.0  ;;  %v3576_v23 = vpop.xlane.xlu1 %3575  ;;  %v3573_v29 = vpop.xlane.xlu0 %3572 }
 0xd5c   :  { %v5117_v55 = vpop.eup %5116  ;;  %5126 = vrsqrt.f32 %v3690_v50  ;;  %v3644_v50 = vmul.f32 0.037037037, %v3576_v23 }
 0xd5d   :  { %v3751_v12 = vmul.f32 %v5117_v55, %v7539_v45  ;;  %v3854_v22 = vsel %vm537_vm6, %v3822_v52, 1.0  ;;  %v3772_v10 = vmul.f32 %v7629_v3, %v3736_v28  ;;  %v3807_v18 = vadd.f32 %v7635_v15, %v3771_v4 }
 0xd5e   :  { %v5119_v41 = vpop.eup %5118  ;;  %v3874_v36 = vpack.c.bf16 %v3854_v22, %v3853_v54  ;;  %v3937_v45 = vsel %vm3911_vm1, %v3866_v40, 0  ;;  %v3643_v52 = vmul.f32 0.037037037, %v3573_v29  ;;  %v3676_v62 = vadd.f32 1e-05, %v3644_v50 }
 0xd5f   :  { %v3752_v20 = vmul.f32 %v5119_v41, %v7545_v39  ;;  %v3787_v34 = vmul.f32 %v7629_v3, %v3751_v12  ;;  %v3808_v14 = vadd.f32 %v7635_v15, %v3772_v10  ;;  %v3839_v25 = vsel %vm537_vm6, %v3807_v18, 1.0 }
 0xd60   :  { %v5121_v56 = vpop.eup %5120  ;;  %4833 = vmatprep.subr.msk.bf16.mxu1 %vm3911_vm1, %v3874_v36  ;;  %v3675_v28 = vadd.f32 1e-05, %v3643_v52  ;;  %5128 = vrsqrt.f32 %v3676_v62 }
 0xd61   :  { %4537 = vmatpush3.bf16.xpose.msra.mxu1 %v3937_v45  ;;  %v3788_v26 = vmul.f32 %v7629_v3, %v3752_v20  ;;  %v3823_v16 = vadd.f32 %v7635_v15, %v3787_v34  ;;  %v3840_v59 = vsel %vm537_vm6, %v3808_v14, 1.0  ;;  %v3737_v39 = vmul.f32 %v5121_v56, %v7551_v19 }
 0xd62   :  { %v5123_v33 = vpop.eup %5122  ;;  %v3867_v31 = vpack.c.bf16 %v3840_v59, %v3839_v25  ;;  %5130 = vrsqrt.f32 %v3675_v28 }
 0xd63   :  { %v3824_v30 = vadd.f32 %v7635_v15, %v3788_v26  ;;  %v3738_v43 = vmul.f32 %v5123_v33, %v7557_v53  ;;  %v3773_v11 = vmul.f32 %v7629_v3, %v3737_v39  ;;  %v3855_v21 = vsel %vm537_vm6, %v3823_v16, 1.0 }
 0xd64   :  { %v5125_v44 = vpop.eup %5124 }
 0xd65   :  { %v3753_v61 = vmul.f32 %v5125_v44, %v7563_v5  ;;  %v3856_v57 = vsel %vm537_vm6, %v3824_v30, 1.0  ;;  %v3774_v58 = vmul.f32 %v7629_v3, %v3738_v43  ;;  %v3809_v53 = vadd.f32 %v7635_v15, %v3773_v11 }
 0xd66   :  { %v5127_v19 = vpop.eup %5126  ;;  %v3875_v47 = vpack.c.bf16 %v3856_v57, %v3855_v21  ;;  %v3940_v5 = vsel %vm3911_vm1, %v3867_v31, 0 }
 0xd67   :  { %v3754_v6 = vmul.f32 %v5127_v19, %v7569_v38  ;;  %v3789_v24 = vmul.f32 %v7629_v3, %v3753_v61  ;;  %v3810_v48 = vadd.f32 %v7635_v15, %v3774_v58  ;;  %v3841_v38 = vsel %vm537_vm6, %v3809_v53, 1.0 }
 0xd68   :  { %4834 = vmatprep.subr.msk.bf16.mxu1 %vm3911_vm1, %v3875_v47 }
 0xd69   :  { %4539 = vmatpush3.bf16.xpose.msra.mxu1 %v3940_v5  ;;  %v3790_v17 = vmul.f32 %v7629_v3, %v3754_v6  ;;  %v3825_v2 = vadd.f32 %v7635_v15, %v3789_v24  ;;  %v3842_v9 = vsel %vm537_vm6, %v3810_v48, 1.0 }
 0xd6a   :  { %v3868_v7 = vpack.c.bf16 %v3842_v9, %v3841_v38  ;;  %v5129_v10 = vpop.eup %5128 }
 0xd6b   :  { %v3826_v1 = vadd.f32 %v7635_v15, %v3790_v17  ;;  %v3857_v8 = vsel %vm537_vm6, %v3825_v2, 1.0  ;;  %v3740_v45 = vmul.f32 %v5129_v10, %v7581_v0 }
 0xd6c   :  { %v3943_v13 = vsel %vm3911_vm1, %v3868_v7, 0  ;;  %v5131_v34 = vpop.eup %5130 }
 0xd6d   :  { %v3858_v37 = vsel %vm537_vm6, %v3826_v1, 1.0  ;;  %v3739_v39 = vmul.f32 %v5131_v34, %v7575_v49  ;;  %v3776_v25 = vmul.f32 %v7629_v3, %v3740_v45 }
 0xd6e   :  { %v3876_v60 = vpack.c.bf16 %v3858_v37, %v3857_v8 }
 0xd6f   :  { %v3775_v11 = vmul.f32 %v7629_v3, %v3739_v39  ;;  %v3812_v0 = vadd.f32 %v7635_v15, %v3776_v25 }
 0xd70   :  { %4835 = vmatprep.subr.msk.bf16.mxu1 %vm3911_vm1, %v3876_v60 }
 0xd71   :  { %4541 = vmatpush3.bf16.xpose.msra.mxu1 %v3943_v13  ;;  %v3811_v57 = vadd.f32 %v7635_v15, %v3775_v11  ;;  %v3844_v6 = vsel %vm537_vm6, %v3812_v0, 1.0 }
 0xd73   :  { %v3843_v48 = vsel %vm537_vm6, %v3811_v57, 1.0 }
 0xd74   :  { %v3869_v2 = vpack.c.bf16 %v3844_v6, %v3843_v48 }
 0xda2   :  { %v3621_v4 = vpop.xlane.xlu0 %3620 }
 0xda3   :  { %v3659_v55 = vmul.f32 0.037037037, %v3621_v4 }
 0xda4   :  { %v3624_v40 = vpop.xlane.xlu1 %3623 }
 0xda5   :  { %v3691_v12 = vadd.f32 1e-05, %v3659_v55  ;;  %v3660_v54 = vmul.f32 0.037037037, %v3624_v40 }
 0xda6   :  { %v3579_v22 = vpop.xlane.xlu0 %3578 }
 0xda7   :  { %5132 = vrsqrt.f32 %v3691_v12  ;;  %v3692_v41 = vadd.f32 1e-05, %v3660_v54  ;;  %v3645_v36 = vmul.f32 0.037037037, %v3579_v22  ;;  %v5014_v12 = vld [vmem:[#allocation16 + $0x18] sm:$0xff]  }
 0xda8   :  { %v3582_v20 = vpop.xlane.xlu1 %3581  ;;  %v5015_v54 = vld [vmem:[#allocation16 + $0x20] ss:$0 sps:$4 sm:$0xff]  }
 0xda9   :  { %5134 = vrsqrt.f32 %v3692_v41  ;;  %v3677_v18 = vadd.f32 1e-05, %v3645_v36  ;;  %v3646_v14 = vmul.f32 0.037037037, %v3582_v20 }
 0xdaa   :  { %v3627_v56 = vpop.xlane.xlu0 %3626 }
 0xdab   :  { %5136 = vrsqrt.f32 %v3677_v18  ;;  %v3678_v26 = vadd.f32 1e-05, %v3646_v14  ;;  %v3661_v16 = vmul.f32 0.037037037, %v3627_v56 }
 0xdac   :  { %v3630_v59 = vpop.xlane.xlu1 %3629 }
 0xdad   :  { %5138 = vrsqrt.f32 %v3678_v26  ;;  %v3693_v33 = vadd.f32 1e-05, %v3661_v16  ;;  %v3662_v30 = vmul.f32 0.037037037, %v3630_v59 }
 0xdaf   :  { %5140 = vrsqrt.f32 %v3693_v33  ;;  %v3694_v43 = vadd.f32 1e-05, %v3662_v30 }
 0xdb1   :  { %v5133_v44 = vpop.eup %5132  ;;  %5142 = vrsqrt.f32 %v3694_v43 }
 0xdb2   :  { %v3755_v31 = vmul.f32 %v5133_v44, %v7591_v42 }
 0xdb3   :  { %v5135_v61 = vpop.eup %5134 }
 0xdb4   :  { %v3756_v21 = vmul.f32 %v5135_v61, %v7594_v46  ;;  %v3791_v49 = vmul.f32 %v7629_v3, %v3755_v31 }
 0xdb5   :  { %v5137_v58 = vpop.eup %5136 }
 0xdb6   :  { %v3792_v19 = vmul.f32 %v7629_v3, %v3756_v21  ;;  %v3827_v47 = vadd.f32 %v7635_v15, %v3791_v49  ;;  %v3741_v24 = vmul.f32 %v5137_v58, %v7599_v63 }
 0xdb7   :  { %v5139_v53 = vpop.eup %5138 }
 0xdb8   :  { %v3828_v42 = vadd.f32 %v7635_v15, %v3792_v19  ;;  %v3742_v46 = vmul.f32 %v5139_v53, %v7605_v51  ;;  %v3777_v5 = vmul.f32 %v7629_v3, %v3741_v24  ;;  %v3859_v1 = vsel %vm537_vm6, %v3827_v47, 1.0 }
 0xdb9   :  { %v5141_v17 = vpop.eup %5140 }
 0xdba   :  { %v3757_v9 = vmul.f32 %v5141_v17, %v7611_v32  ;;  %v3860_v38 = vsel %vm537_vm6, %v3828_v42, 1.0  ;;  %v3778_v7 = vmul.f32 %v7629_v3, %v3742_v46  ;;  %v3813_v51 = vadd.f32 %v7635_v15, %v3777_v5 }
 0xdbb   :  { %v5143_v63 = vpop.eup %5142  ;;  %v3877_v8 = vpack.c.bf16 %v3860_v38, %v3859_v1  ;;  %v3946_v32 = vsel %vm3911_vm1, %v3869_v2, 0 }
 0xdbc   :  { %v3758_v37 = vmul.f32 %v5143_v63, %v7617_v35  ;;  %v3793_v60 = vmul.f32 %v7629_v3, %v3757_v9  ;;  %v3814_v13 = vadd.f32 %v7635_v15, %v3778_v7  ;;  %v3845_v35 = vsel %vm537_vm6, %v3813_v51, 1.0 }
 0xdbd   :  { %4836 = vmatprep.subr.msk.bf16.mxu1 %vm3911_vm1, %v3877_v8 }
 0xdbe   :  { %4543 = vmatpush3.bf16.xpose.msra.mxu1 %v3946_v32  ;;  %v3794_v23 = vmul.f32 %v7629_v3, %v3758_v37  ;;  %v3829_v29 = vadd.f32 %v7635_v15, %v3793_v60  ;;  %v3846_v50 = vsel %vm537_vm6, %v3814_v13, 1.0  ;;  %v5012_v3 = vld [vmem:[#allocation16 + $0x8] sm:$0xff]  }
 0xdbf   :  { %v3870_v62 = vpack.c.bf16 %v3846_v50, %v3845_v35 }
 0xdc0   :  { %v3830_v52 = vadd.f32 %v7635_v15, %v3794_v23  ;;  %v3861_v28 = vsel %vm537_vm6, %v3829_v29, 1.0  ;;  %v5013_v15 = vld [vmem:[#allocation16 + $0x10] sm:$0xff]  }
 0xdc1   :  { %v3949_v40 = vsel %vm3911_vm1, %v3870_v62, 0 }
 0xdc2   :  { %v3862_v4 = vsel %vm537_vm6, %v3830_v52, 1.0 }
 0xdc3   :  { %v3878_v55 = vpack.c.bf16 %v3862_v4, %v3861_v28 }
 0xdc5   :  { %4837 = vmatprep.subr.msk.bf16.mxu1 %vm3911_vm1, %v3878_v55 }
 0xdc6   :  { %4545 = vmatpush3.bf16.xpose.msra.mxu1 %v3949_v40 }
 0xdcd   :  { %4547 = vmatmul.mubr.msk.bf16.vlgmr.msra.gmra.mrb[36].mxu1 %vm3911_vm1, %v7655_v27 }
 0xdce   :  { %4548 = vmatprep.mubr.msk.bf16.mxu1 %vm3911_vm1, %v5012_v3 }
 0xdd5   :  { %4549 = vmatmul.mubr.msk.bf16.gmra.mrb[40].mxu1 %vm3911_vm1, %v5012_v3 }
 0xdd6   :  { %4550 = vmatprep.mubr.msk.bf16.mxu1 %vm3911_vm1, %v5013_v15 }
 0xddd   :  { %4551 = vmatmul.mubr.msk.bf16.gmra.mrb[44].mxu1 %vm3911_vm1, %v5013_v15 }
 0xdde   :  { %4552 = vmatprep.mubr.msk.bf16.mxu1 %vm3911_vm1, %v5014_v12 }
 0xde5   :  { %4553 = vmatmul.mubr.msk.bf16.gmra.mrb[48].mxu1 %vm3911_vm1, %v5014_v12 }
 0xde6   :  { %4554 = vmatprep.mubr.msk.bf16.mxu1 %vm3911_vm1, %v5015_v54 }
 0xded   :  { %4555 = vmatmul.mubr.msk.bf16.gmra.mrb[52].mxu1 %vm3911_vm1, %v5015_v54 }
 0xea0   :  { %v7792_v27 = vpop.f32.mrb[36].mxu1 }
 0xea1   :  { %v7794_v22 = vpop.f32.mrb[37].mxu1 }
 0xea2   :  { %v7796_v10 = vpop.f32.mrb[38].mxu1 }
 0xea3   :  { %v7798_v41 = vpop.f32.mrb[39].mxu1 }
 0xea8   :  { %v7800_v36 = vpop.f32.mrb[40].mxu1 }
 0xea9   :  { %v4056_v20 = vmax.f32 %v7792_v27, %v7800_v36  ;;  %v7804_v34 = vpop.f32.mrb[41].mxu1 }
 0xeaa   :  { %v4070_v18 = vmax.f32 %v7794_v22, %v7804_v34  ;;  %v7808_v14 = vpop.f32.mrb[42].mxu1 }
 0xeab   :  { %v4057_v56 = vmax.f32 %v7796_v10, %v7808_v14  ;;  %v7812_v45 = vpop.f32.mrb[43].mxu1 }
 0xeac   :  { %v4071_v26 = vmax.f32 %v7798_v41, %v7812_v45 }
 0xeb0   :  { %v7816_v16 = vpop.f32.mrb[44].mxu1 }
 0xeb1   :  { %v4058_v59 = vmax.f32 %v4056_v20, %v7816_v16  ;;  %v7819_v39 = vpop.f32.mrb[45].mxu1 }
 0xeb2   :  { %v4072_v33 = vmax.f32 %v4070_v18, %v7819_v39  ;;  %v7822_v30 = vpop.f32.mrb[46].mxu1 }
 0xeb3   :  { %v4059_v25 = vmax.f32 %v4057_v56, %v7822_v30  ;;  %v7825_v43 = vpop.f32.mrb[47].mxu1 }
 0xeb4   :  { %v4073_v11 = vmax.f32 %v4071_v26, %v7825_v43 }
 0xeb8   :  { %v7828_v44 = vpop.f32.mrb[48].mxu1 }
 0xeb9   :  { %v4060_v31 = vmax.f32 %v4058_v59, %v7828_v44  ;;  %v7831_v0 = vpop.f32.mrb[49].mxu1 }
 0xeba   :  { %v4074_v61 = vmax.f32 %v4072_v33, %v7831_v0  ;;  %v7834_v21 = vpop.f32.mrb[50].mxu1 }
 0xebb   :  { %v4061_v49 = vmax.f32 %v4059_v25, %v7834_v21  ;;  %v7837_v57 = vpop.f32.mrb[51].mxu1 }
 0xebc   :  { %v4075_v58 = vmax.f32 %v4073_v11, %v7837_v57 }
 0xec0   :  { %v7840_v19 = vpop.f32.mrb[52].mxu1 }
 0xec1   :  { %v4062_v47 = vmax.f32 %v4060_v31, %v7840_v19  ;;  %v7843_v6 = vpop.f32.mrb[53].mxu1 }
 0xec2   :  { %v4076_v24 = vmax.f32 %v4074_v61, %v7843_v6  ;;  %v4053_v53 = vpop.f32.mrb[54].mxu1 }
 0xec3   :  { %v4063_v42 = vmax.f32 %v4062_v47, %v4061_v49  ;;  %v4054_v48 = vpop.f32.mrb[55].mxu1 }
 0xec4   :  { %v4077_v46 = vmax.f32 %v4076_v24, %v4075_v58 }
 0xec5   :  { %v4064_v5 = vrot.slane %v4063_v42, 4 }
 0xec6   :  { %v4078_v17 = vrot.slane %v4077_v46, 4 }
 0xec7   :  { %v4065_v2 = vmax.f32 %v4063_v42, %v4064_v5 }
 0xec8   :  { %v4079_v9 = vmax.f32 %v4077_v46, %v4078_v17 }
 0xec9   :  { %v4066_v1 = vrot.slane %v4065_v2, 2 }
 0xeca   :  { %v4080_v38 = vrot.slane %v4079_v9, 2 }
 0xecb   :  { %v4067_v7 = vmax.f32 %v4065_v2, %v4066_v1 }
 0xecc   :  { %v4081_v63 = vmax.f32 %v4079_v9, %v4080_v38 }
 0xecd   :  { %v4068_v8 = vrot.slane %v4067_v7, 1 }
 0xece   :  { %v4082_v37 = vrot.slane %v4081_v63, 1 }
 0xecf   :  { %v7846_v60 = vmax.f32 %v4067_v7, %v4068_v8 }
 0xed0   :  { %v7848_v51 = vmax.f32 %v4081_v63, %v4082_v37 }
 0xed1   :  { %v4084_v13 = vsub.f32 %v7792_v27, %v7846_v60  ;;  %v4086_v32 = vsub.f32 %v7796_v10, %v7846_v60  ;;  %v4088_v23 = vsub.f32 %v7800_v36, %v7846_v60  ;;  %v4090_v29 = vsub.f32 %v7808_v14, %v7846_v60 }
 0xed2   :  { %v4092_v50 = vsub.f32 %v7816_v16, %v7846_v60  ;;  %v4094_v52 = vsub.f32 %v7822_v30, %v7846_v60  ;;  %v4096_v35 = vsub.f32 %v7828_v44, %v7846_v60  ;;  %v4098_v62 = vsub.f32 %v7834_v21, %v7846_v60 }
 0xed3   :  { %v4100_v28 = vsub.f32 %v7840_v19, %v7846_v60  ;;  %v4102_v4 = vmul.f32 1.442695, %v4084_v13  ;;  %v4106_v55 = vmul.f32 1.442695, %v4086_v32  ;;  %v4110_v40 = vmul.f32 1.442695, %v4088_v23 }
 0xed4   :  { %v4085_v3 = vsub.f32 %v7794_v22, %v7848_v51  ;;  %v4114_v15 = vmul.f32 1.442695, %v4090_v29  ;;  %v4087_v12 = vsub.f32 %v7798_v41, %v7848_v51  ;;  %v4089_v54 = vsub.f32 %v7804_v34, %v7848_v51 }
 0xed5   :  { %5144 = vpow2.f32 %v4102_v4  ;;  %v4091_v20 = vsub.f32 %v7812_v45, %v7848_v51  ;;  %v4093_v18 = vsub.f32 %v7819_v39, %v7848_v51  ;;  %v4095_v56 = vsub.f32 %v7825_v43, %v7848_v51 }
 0xed6   :  { %5146 = vpow2.f32 %v4106_v55  ;;  %v4097_v26 = vsub.f32 %v7831_v0, %v7848_v51  ;;  %v4118_v59 = vmul.f32 1.442695, %v4092_v50  ;;  %v4099_v33 = vsub.f32 %v7837_v57, %v7848_v51 }
 0xed7   :  { %5148 = vpow2.f32 %v4110_v40  ;;  %v4101_v25 = vsub.f32 %v7843_v6, %v7848_v51  ;;  %v4122_v11 = vmul.f32 1.442695, %v4094_v52  ;;  %v4104_v31 = vmul.f32 1.442695, %v4085_v3 }
 0xed8   :  { %5150 = vpow2.f32 %v4114_v15  ;;  %v4108_v61 = vmul.f32 1.442695, %v4087_v12  ;;  %v4126_v49 = vmul.f32 1.442695, %v4096_v35  ;;  %v4112_v58 = vmul.f32 1.442695, %v4089_v54 }
 0xed9   :  { %5152 = vpow2.f32 %v4118_v59  ;;  %v4130_v47 = vmul.f32 1.442695, %v4098_v62  ;;  %v4116_v53 = vmul.f32 1.442695, %v4091_v20  ;;  %v4134_v48 = vmul.f32 1.442695, %v4100_v28 }
 0xeda   :  { %5154 = vpow2.f32 %v4122_v11  ;;  %v4120_v5 = vmul.f32 1.442695, %v4093_v18  ;;  %v4124_v9 = vmul.f32 1.442695, %v4095_v56  ;;  %v4128_v7 = vmul.f32 1.442695, %v4097_v26 }
 0xedb   :  { %5156 = vpow2.f32 %v4104_v31  ;;  %v4132_v13 = vmul.f32 1.442695, %v4099_v33  ;;  %v4136_v50 = vmul.f32 1.442695, %v4101_v25 }
 0xedc   :  { %5158 = vpow2.f32 %v4108_v61 }
 0xedd   :  { %5160 = vpow2.f32 %v4126_v49 }
 0xede   :  { %5162 = vpow2.f32 %v4112_v58 }
 0xedf   :  { %v5145_v24 = vpop.eup %5144  ;;  %5164 = vpow2.f32 %v4130_v47 }
 0xee0   :  { %v5147_v42 = vpop.eup %5146  ;;  %5166 = vpow2.f32 %v4116_v53 }
 0xee1   :  { %v4138_v46 = vadd.f32 %v5147_v42, %v5145_v24  ;;  %v5149_v17 = vpop.eup %5148  ;;  %5168 = vpow2.f32 %v4134_v48 }
 0xee2   :  { %v5151_v1 = vpop.eup %5150  ;;  %5170 = vpow2.f32 %v4120_v5 }
 0xee3   :  { %v4139_v2 = vadd.f32 %v5149_v17, %v4138_v46  ;;  %v5153_v63 = vpop.eup %5152  ;;  %5172 = vpow2.f32 %v4124_v9 }
 0xee4   :  { %v5155_v8 = vpop.eup %5154  ;;  %5174 = vpow2.f32 %v4128_v7 }
 0xee5   :  { %v4140_v38 = vadd.f32 %v5151_v1, %v4139_v2  ;;  %v5157_v32 = vpop.eup %5156  ;;  %5176 = vpow2.f32 %v4132_v13 }
 0xee6   :  { %v5159_v23 = vpop.eup %5158  ;;  %5178 = vpow2.f32 %v4136_v50 }
 0xee7   :  { %v4141_v37 = vadd.f32 %v5153_v63, %v4140_v38  ;;  %v5161_v52 = vpop.eup %5160  ;;  %v4152_v35 = vadd.f32 %v5159_v23, %v5157_v32 }
 0xee8   :  { %v5163_v62 = vpop.eup %5162 }
 0xee9   :  { %v4142_v29 = vadd.f32 %v5155_v8, %v4141_v37  ;;  %v5165_v4 = vpop.eup %5164  ;;  %v4153_v55 = vadd.f32 %v5163_v62, %v4152_v35 }
 0xeea   :  { %v5167_v40 = vpop.eup %5166 }
 0xeeb   :  { %v4143_v28 = vadd.f32 %v5161_v52, %v4142_v29  ;;  %v5169_v15 = vpop.eup %5168  ;;  %v4154_v12 = vadd.f32 %v5167_v40, %v4153_v55 }
 0xeec   :  { %v5171_v54 = vpop.eup %5170 }
 0xeed   :  { %v4144_v3 = vadd.f32 %v5165_v4, %v4143_v28  ;;  %v4155_v18 = vadd.f32 %v5171_v54, %v4154_v12  ;;  %v5173_v56 = vpop.eup %5172 }
 0xeee   :  { %v5175_v33 = vpop.eup %5174 }
 0xeef   :  { %v4145_v20 = vadd.f32 %v5169_v15, %v4144_v3  ;;  %v4156_v59 = vadd.f32 %v5173_v56, %v4155_v18  ;;  %v5177_v31 = vpop.eup %5176 }
 0xef0   :  { %v5179_v58 = vpop.eup %5178 }
 0xef1   :  { %v4146_v26 = vrot.slane %v4145_v20, 4  ;;  %v4157_v11 = vadd.f32 %v5175_v33, %v4156_v59 }
 0xef3   :  { %v4147_v25 = vadd.f32 %v4146_v26, %v4145_v20  ;;  %v4158_v49 = vadd.f32 %v5177_v31, %v4157_v11 }
 0xef5   :  { %v4148_v61 = vrot.slane %v4147_v25, 2  ;;  %v4159_v24 = vadd.f32 %v5179_v58, %v4158_v49 }
 0xef7   :  { %v4149_v47 = vadd.f32 %v4148_v61, %v4147_v25  ;;  %v4160_v42 = vrot.slane %v4159_v24, 4 }
 0xef9   :  { %v4150_v53 = vrot.slane %v4149_v47, 1  ;;  %v4161_v46 = vadd.f32 %v4160_v42, %v4159_v24 }
 0xefb   :  { %v4151_v48 = vadd.f32 %v4150_v53, %v4149_v47  ;;  %v4162_v5 = vrot.slane %v4161_v46, 2 }
 0xefd   :  { %5180 = vlog2.f32 %v4151_v48  ;;  %v4163_v17 = vadd.f32 %v4162_v5, %v4161_v46 }
 0xeff   :  { %v4164_v2 = vrot.slane %v4163_v17, 1 }
 0xf01   :  { %v4165_v9 = vadd.f32 %v4164_v2, %v4163_v17 }
 0xf03   :  { %5182 = vlog2.f32 %v4165_v9 }
 0xf07   :  { %v5181_v1 = vpop.eup %5180 }
 0xf08   :  { %v4167_v38 = vmul.f32 0.6931472, %v5181_v1 }
 0xf0a   :  { %v4170_v7 = vadd.f32 %v4167_v38, %v7846_v60 }
 0xf0c   :  { %v4172_v63 = vsub.f32 %v7792_v27, %v4170_v7  ;;  %v4174_v8 = vsub.f32 %v7796_v10, %v4170_v7  ;;  %v4176_v37 = vsub.f32 %v7800_v36, %v4170_v7  ;;  %v4178_v13 = vsub.f32 %v7808_v14, %v4170_v7 }
 0xf0d   :  { %v4180_v32 = vsub.f32 %v7816_v16, %v4170_v7  ;;  %v4182_v23 = vsub.f32 %v7822_v30, %v4170_v7  ;;  %v4184_v29 = vsub.f32 %v7828_v44, %v4170_v7  ;;  %v4186_v50 = vsub.f32 %v7834_v21, %v4170_v7  ;;  %v5183_v27 = vpop.eup %5182 }
 0xf0e   :  { %v4188_v52 = vsub.f32 %v7840_v19, %v4170_v7  ;;  %4190 = vst [vmem:[#allocation19] sm:$0xff] %v4172_v63  ;;  %4191 = vst [vmem:[#allocation19 + $0x8] sm:$0xff] %v4174_v8  ;;  %v4169_v10 = vmul.f32 0.6931472, %v5183_v27 }
 0xf0f   :  { %4192 = vst [vmem:[#allocation19 + $0x10] sm:$0xff] %v4176_v37  ;;  %4193 = vst [vmem:[#allocation19 + $0x18] sm:$0xff] %v4178_v13 }
 0xf10   :  { %4194 = vst [vmem:[#allocation19 + $0x20] sm:$0xff] %v4180_v32  ;;  %4195 = vst [vmem:[#allocation19 + $0x28] sm:$0xff] %v4182_v23  ;;  %v4171_v36 = vadd.f32 %v4169_v10, %v7848_v51 }
 0xf11   :  { %4196 = vst [vmem:[#allocation19 + $0x30] sm:$0xff] %v4184_v29  ;;  %4197 = vst [vmem:[#allocation19 + $0x38] sm:$0xff] %v4186_v50 }
 0xf12   :  { %4198 = vst [vmem:[#allocation19 + $0x40] sm:$0xff] %v4188_v52  ;;  %v4173_v14 = vsub.f32 %v7794_v22, %v4171_v36  ;;  %v4175_v16 = vsub.f32 %v7798_v41, %v4171_v36  ;;  %v4177_v30 = vsub.f32 %v7804_v34, %v4171_v36  ;;  %v4179_v44 = vsub.f32 %v7812_v45, %v4171_v36 }
 0xf13   :  { %v4181_v21 = vsub.f32 %v7819_v39, %v4171_v36  ;;  %v4183_v19 = vsub.f32 %v7825_v43, %v4171_v36  ;;  %v4185_v60 = vsub.f32 %v7831_v0, %v4171_v36  ;;  %v4187_v35 = vsub.f32 %v7837_v57, %v4171_v36 }
 0xf14   :  { %v4189_v51 = vsub.f32 %v7843_v6, %v4171_v36  ;;  %4200 = vst [vmem:[#allocation19 + $0x48] sm:$0xff] %v4173_v14  ;;  %4201 = vst [vmem:[#allocation19 + $0x50] sm:$0xff] %v4175_v16 }
 0xf15   :  { %4202 = vst [vmem:[#allocation19 + $0x58] sm:$0xff] %v4177_v30  ;;  %4203 = vst [vmem:[#allocation19 + $0x60] sm:$0xff] %v4179_v44 }
 0xf16   :  { %4204 = vst [vmem:[#allocation19 + $0x68] sm:$0xff] %v4181_v21  ;;  %4205 = vst [vmem:[#allocation19 + $0x70] sm:$0xff] %v4183_v19 }
 0xf17   :  { %4206 = vst [vmem:[#allocation19 + $0x78] sm:$0xff] %v4185_v60  ;;  %4207 = vst [vmem:[#allocation19 + $0x80] sm:$0xff] %v4187_v35 }
 0xf18   :  { %4208 = vst [vmem:[#allocation19 + $0x88] sm:$0xff] %v4189_v51 }
 0xf19   :  { %5393 = shalt.err (!%p5390_p7)
}
 0xf1a   :  { %s5394_s26 = scalar_lea.hbm %s7930_s9, 2304 }
 0xf1b   :  { %p5395_p8 = scmp.ne.s32.totalorder %s7930_s9, %s5394_s26  ;;  %p5398_p9 = scmp.lt.u32.totalorder %s5394_s26, %s7930_s9 }
 0xf1d   :  { %p5400_p10 = pnand %p5398_p9, %p5395_p8 }
 0xf1f   :  { %5403 = shalt.err (!%p5400_p10)
}
 0xf20   :  { %4220 = dma.vmem_to_hbm [thread:$0]  %s4215_s10, 2304, %s7930_s9, [#allocation6], %s5432_s0, %s5432_s0, %s5433_s30  }
 0xf21   :  { %5418 = dma.done.wait [#allocation6], 2304  }
 0xf22   :  { %5419 = vsyncadd [#allocation6], 4294964992 }
 0xf23   :  { %4224 = vsyncpa [#allocation5], 1 }
 0xf24   :  { %4225 = vsyncpa [#allocation8], 1 }
 0xf25   :  { %4226 = vsyncpa [#allocation11], 1 }
 0xf26   :  { %4227 = vsyncpa [#allocation14], 1 }
 0xf27   :  { %4228 = vsyncpa [#allocation17], 1 }
 0xf28   :  { %4229 = vsyncpa [#allocation6], 1 }

</bundles_post_ra>
